<compile_context>
chip_gen: v5e
topology: v5e:2x2
jax: 0.10.0
libtpu: 0.0.40
codegen_flags: <defaults>
</compile_context>

<pallas_src>
import functools

import jax
import jax.numpy as jnp
from jax import lax
from jax.experimental import pallas as pl
from jax.experimental.pallas import tpu as pltpu

_HIGHEST = lax.Precision.HIGHEST


def _dot(a, b):
    return jnp.dot(a, b, preferred_element_type=jnp.float32, precision=_HIGHEST)


def _convt1x1_kernel(x_ref, wt_ref, b_ref, o_ref, *, num_layers):
    # x_ref : (C, T)      pixel tile: channels on sublanes, pixels on lanes
    # wt_ref: (L, C, C)   per-layer transposed weights W_l^T (resident block)
    # b_ref : (L, C, 1)   per-layer biases as columns        (resident block)
    # o_ref : (C, T)
    #
    # Tree-compose the chain y = Wt_{L-1}(...(Wt_0 x + b_0)...) + b_{L-1} into a
    # single (W_eff^T, b_eff):  (Wt2, b2) o (Wt1, b1) = (Wt2@Wt1, Wt2@b1 + b2).
    maps = [(wt_ref[l], b_ref[l]) for l in range(num_layers)]
    while len(maps) > 1:
        nxt = []
        for i in range(0, len(maps) - 1, 2):
            wt1, b1 = maps[i]        # applied first
            wt2, b2 = maps[i + 1]    # applied second
            nxt.append((_dot(wt2, wt1), _dot(wt2, b1) + b2))
        if len(maps) % 2:
            nxt.append(maps[-1])
        maps = nxt
    wt_eff, b_eff = maps[0]

    y = _dot(wt_eff, x_ref[...])                    # (C, T) on the MXU
    o_ref[...] = (y + b_eff).astype(o_ref.dtype)    # lane-broadcast bias


# Conservative per-step VMEM budget (double-buffered input + output tiles):
# fits v5e's 16 MiB scoped-VMEM default and v7x's 32 MiB default with headroom.
_TILE_VMEM_BUDGET = 8 * 1024 * 1024


def _pick_t_hw(hw, c):
    """Largest lane-dense spatial tile that divides hw and fits the VMEM budget."""
    if hw % 128 != 0:
        return hw                         # full-extent last dim is always legal
    cap = _TILE_VMEM_BUDGET // (16 * c)   # bytes / (2 in + 2 out buffers * 4 B)
    if hw <= cap:
        return hw
    t = (cap // 128) * 128
    while t > 128 and hw % t != 0:
        t -= 128
    return max(t, 128)


@functools.partial(jax.jit, static_argnames=("t_hw",))
def convt1x1_forward(x_nchw, weights, biases, *, t_hw=None):
    """x_nchw: (N, C, H, W); weights: (L, C_in, C_out); biases: (L, C_out)."""
    n, c, h, w = x_nchw.shape
    num_layers = weights.shape[0]
    hw = h * w

    # Only layout plumbing on the hot path; chain composition happens in-kernel.
    wt_layers = jnp.transpose(weights, (0, 2, 1))   # (L, C_out, C_in) = W_l^T
    b_layers = biases.reshape(num_layers, c, 1)     # (L, C, 1)

    x_flat = x_nchw.reshape(n, c, hw)               # free reshape off NCHW

    if t_hw is None:
        t_hw = _pick_t_hw(hw, c)
    assert hw % t_hw == 0, "spatial tile must divide H*W"
    assert t_hw == hw or t_hw % 128 == 0, "tile must be lane-dense"

    steps_hw = hw // t_hw
    kernel = functools.partial(_convt1x1_kernel, num_layers=num_layers)

    if steps_hw == 1:                               # drop degenerate grid axis
        grid = (n,)
        x_map = lambda i: (i, 0, 0)
        const_map = lambda i: (0, 0, 0)
        semantics = ("parallel",)
    else:
        grid = (n, steps_hw)
        x_map = lambda i, j: (i, 0, j)
        const_map = lambda i, j: (0, 0, 0)
        semantics = ("parallel", "parallel")

    out_flat = pl.pallas_call(
        kernel,
        out_shape=jax.ShapeDtypeStruct((n, c, hw), x_flat.dtype),
        grid_spec=pltpu.PrefetchScalarGridSpec(
            num_scalar_prefetch=0,
            grid=grid,
            in_specs=[
                pl.BlockSpec((None, c, t_hw), x_map),          # x tile (C, t_hw)
                pl.BlockSpec((num_layers, c, c), const_map),   # W_l^T stack (resident)
                pl.BlockSpec((num_layers, c, 1), const_map),   # b_l columns (resident)
            ],
            out_specs=pl.BlockSpec((None, c, t_hw), x_map),
        ),
        compiler_params=pltpu.CompilerParams(dimension_semantics=semantics),
    )(x_flat, wt_layers, b_layers)

    return out_flat.reshape(n, c, h, w)


def _reference(x_nchw, weights, biases):
    """Layer-by-layer reference matching the PyTorch module semantics."""
    n, c, h, w = x_nchw.shape
    y = jnp.transpose(x_nchw, (0, 2, 3, 1)).reshape(-1, c)
    for l in range(weights.shape[0]):
        y = y @ weights[l] + biases[l]
    return jnp.transpose(y.reshape(n, h, w, c), (0, 3, 1, 2))


if __name__ == "__main__":
    LAYERS = 10
    CHANNELS = 32
    N, H, W = 2, 16, 16    # HW = 256 (lane-dense), grid = (2,)

    key = jax.random.PRNGKey(0)
    kx, kw, kb = jax.random.split(key, 3)

    x = jax.random.normal(kx, (N, CHANNELS, H, W), dtype=jnp.float32)
    # ConvTranspose2d(C, C, 1) weight is (C_in, C_out, 1, 1) -> stored (L, C_in, C_out);
    # bias (C,) -> stored (L, C).
    weights = 0.1 * jax.random.normal(kw, (LAYERS, CHANNELS, CHANNELS), dtype=jnp.float32)
    biases = 0.05 * jax.random.normal(kb, (LAYERS, CHANNELS), dtype=jnp.float32)

    out = jax.block_until_ready(convt1x1_forward(x, weights, biases))

    ref = _reference(x, weights, biases)
    assert out.shape == (N, CHANNELS, H, W)
    # Tolerance covers fp32 reassociation from (tree-)composing the 10-layer chain.
    assert jnp.allclose(out, ref, atol=1e-3, rtol=1e-3), "mismatch vs reference"

    print("KERNEL_OK")
</pallas_src>

<mosaic_0001>
module attributes {stable_mosaic.version = 11 : i64} {
  func.func @_convt1x1_kernel(%arg0: i32, %arg1: memref<1x32x256xf32, #tpu.memory_space<vmem>>, %arg2: memref<10x32x32xf32, #tpu.memory_space<vmem>>, %arg3: memref<10x32x1xf32, #tpu.memory_space<vmem>>, %arg4: memref<1x32x256xf32, #tpu.memory_space<vmem>>) attributes {dimension_semantics = [#tpu.dimension_semantics<parallel>], iteration_bounds = array<i64: 2>, scalar_prefetch = 0 : i64, scratch_operands = 0 : i64, tpu.core_type = #tpu.core_type<tc>, window_params = [{transform_indices = @transform_0, window_bounds = array<i64: 1, 32, 256>}, {pipeline_mode = #tpu.pipeline_mode<synchronous>, transform_indices = @transform_1, window_bounds = array<i64: 10, 32, 32>}, {pipeline_mode = #tpu.pipeline_mode<synchronous>, transform_indices = @transform_2, window_bounds = array<i64: 10, 32, 1>}, {transform_indices = @transform_3, window_bounds = array<i64: 1, 32, 256>}]} {
    %c0 = arith.constant 0 : index
    %c0_0 = arith.constant 0 : index
    %c0_1 = arith.constant 0 : index
    %0 = vector.load %arg2[%c0, %c0_0, %c0_1] : memref<10x32x32xf32, #tpu.memory_space<vmem>>, vector<1x32x32xf32>
    %1 = vector.shape_cast %0 : vector<1x32x32xf32> to vector<32x32xf32>
    %c0_2 = arith.constant 0 : index
    %c0_3 = arith.constant 0 : index
    %c0_4 = arith.constant 0 : index
    %2 = vector.load %arg3[%c0_2, %c0_3, %c0_4] : memref<10x32x1xf32, #tpu.memory_space<vmem>>, vector<1x32x1xf32>
    %3 = vector.shape_cast %2 : vector<1x32x1xf32> to vector<32x1xf32>
    %c1 = arith.constant 1 : index
    %c0_5 = arith.constant 0 : index
    %c0_6 = arith.constant 0 : index
    %4 = vector.load %arg2[%c1, %c0_5, %c0_6] : memref<10x32x32xf32, #tpu.memory_space<vmem>>, vector<1x32x32xf32>
    %5 = vector.shape_cast %4 : vector<1x32x32xf32> to vector<32x32xf32>
    %c1_7 = arith.constant 1 : index
    %c0_8 = arith.constant 0 : index
    %c0_9 = arith.constant 0 : index
    %6 = vector.load %arg3[%c1_7, %c0_8, %c0_9] : memref<10x32x1xf32, #tpu.memory_space<vmem>>, vector<1x32x1xf32>
    %7 = vector.shape_cast %6 : vector<1x32x1xf32> to vector<32x1xf32>
    %c2 = arith.constant 2 : index
    %c0_10 = arith.constant 0 : index
    %c0_11 = arith.constant 0 : index
    %8 = vector.load %arg2[%c2, %c0_10, %c0_11] : memref<10x32x32xf32, #tpu.memory_space<vmem>>, vector<1x32x32xf32>
    %9 = vector.shape_cast %8 : vector<1x32x32xf32> to vector<32x32xf32>
    %c2_12 = arith.constant 2 : index
    %c0_13 = arith.constant 0 : index
    %c0_14 = arith.constant 0 : index
    %10 = vector.load %arg3[%c2_12, %c0_13, %c0_14] : memref<10x32x1xf32, #tpu.memory_space<vmem>>, vector<1x32x1xf32>
    %11 = vector.shape_cast %10 : vector<1x32x1xf32> to vector<32x1xf32>
    %c3 = arith.constant 3 : index
    %c0_15 = arith.constant 0 : index
    %c0_16 = arith.constant 0 : index
    %12 = vector.load %arg2[%c3, %c0_15, %c0_16] : memref<10x32x32xf32, #tpu.memory_space<vmem>>, vector<1x32x32xf32>
    %13 = vector.shape_cast %12 : vector<1x32x32xf32> to vector<32x32xf32>
    %c3_17 = arith.constant 3 : index
    %c0_18 = arith.constant 0 : index
    %c0_19 = arith.constant 0 : index
    %14 = vector.load %arg3[%c3_17, %c0_18, %c0_19] : memref<10x32x1xf32, #tpu.memory_space<vmem>>, vector<1x32x1xf32>
    %15 = vector.shape_cast %14 : vector<1x32x1xf32> to vector<32x1xf32>
    %c4 = arith.constant 4 : index
    %c0_20 = arith.constant 0 : index
    %c0_21 = arith.constant 0 : index
    %16 = vector.load %arg2[%c4, %c0_20, %c0_21] : memref<10x32x32xf32, #tpu.memory_space<vmem>>, vector<1x32x32xf32>
    %17 = vector.shape_cast %16 : vector<1x32x32xf32> to vector<32x32xf32>
    %c4_22 = arith.constant 4 : index
    %c0_23 = arith.constant 0 : index
    %c0_24 = arith.constant 0 : index
    %18 = vector.load %arg3[%c4_22, %c0_23, %c0_24] : memref<10x32x1xf32, #tpu.memory_space<vmem>>, vector<1x32x1xf32>
    %19 = vector.shape_cast %18 : vector<1x32x1xf32> to vector<32x1xf32>
    %c5 = arith.constant 5 : index
    %c0_25 = arith.constant 0 : index
    %c0_26 = arith.constant 0 : index
    %20 = vector.load %arg2[%c5, %c0_25, %c0_26] : memref<10x32x32xf32, #tpu.memory_space<vmem>>, vector<1x32x32xf32>
    %21 = vector.shape_cast %20 : vector<1x32x32xf32> to vector<32x32xf32>
    %c5_27 = arith.constant 5 : index
    %c0_28 = arith.constant 0 : index
    %c0_29 = arith.constant 0 : index
    %22 = vector.load %arg3[%c5_27, %c0_28, %c0_29] : memref<10x32x1xf32, #tpu.memory_space<vmem>>, vector<1x32x1xf32>
    %23 = vector.shape_cast %22 : vector<1x32x1xf32> to vector<32x1xf32>
    %c6 = arith.constant 6 : index
    %c0_30 = arith.constant 0 : index
    %c0_31 = arith.constant 0 : index
    %24 = vector.load %arg2[%c6, %c0_30, %c0_31] : memref<10x32x32xf32, #tpu.memory_space<vmem>>, vector<1x32x32xf32>
    %25 = vector.shape_cast %24 : vector<1x32x32xf32> to vector<32x32xf32>
    %c6_32 = arith.constant 6 : index
    %c0_33 = arith.constant 0 : index
    %c0_34 = arith.constant 0 : index
    %26 = vector.load %arg3[%c6_32, %c0_33, %c0_34] : memref<10x32x1xf32, #tpu.memory_space<vmem>>, vector<1x32x1xf32>
    %27 = vector.shape_cast %26 : vector<1x32x1xf32> to vector<32x1xf32>
    %c7 = arith.constant 7 : index
    %c0_35 = arith.constant 0 : index
    %c0_36 = arith.constant 0 : index
    %28 = vector.load %arg2[%c7, %c0_35, %c0_36] : memref<10x32x32xf32, #tpu.memory_space<vmem>>, vector<1x32x32xf32>
    %29 = vector.shape_cast %28 : vector<1x32x32xf32> to vector<32x32xf32>
    %c7_37 = arith.constant 7 : index
    %c0_38 = arith.constant 0 : index
    %c0_39 = arith.constant 0 : index
    %30 = vector.load %arg3[%c7_37, %c0_38, %c0_39] : memref<10x32x1xf32, #tpu.memory_space<vmem>>, vector<1x32x1xf32>
    %31 = vector.shape_cast %30 : vector<1x32x1xf32> to vector<32x1xf32>
    %c8 = arith.constant 8 : index
    %c0_40 = arith.constant 0 : index
    %c0_41 = arith.constant 0 : index
    %32 = vector.load %arg2[%c8, %c0_40, %c0_41] : memref<10x32x32xf32, #tpu.memory_space<vmem>>, vector<1x32x32xf32>
    %33 = vector.shape_cast %32 : vector<1x32x32xf32> to vector<32x32xf32>
    %c8_42 = arith.constant 8 : index
    %c0_43 = arith.constant 0 : index
    %c0_44 = arith.constant 0 : index
    %34 = vector.load %arg3[%c8_42, %c0_43, %c0_44] : memref<10x32x1xf32, #tpu.memory_space<vmem>>, vector<1x32x1xf32>
    %35 = vector.shape_cast %34 : vector<1x32x1xf32> to vector<32x1xf32>
    %c9 = arith.constant 9 : index
    %c0_45 = arith.constant 0 : index
    %c0_46 = arith.constant 0 : index
    %36 = vector.load %arg2[%c9, %c0_45, %c0_46] : memref<10x32x32xf32, #tpu.memory_space<vmem>>, vector<1x32x32xf32>
    %37 = vector.shape_cast %36 : vector<1x32x32xf32> to vector<32x32xf32>
    %c9_47 = arith.constant 9 : index
    %c0_48 = arith.constant 0 : index
    %c0_49 = arith.constant 0 : index
    %38 = vector.load %arg3[%c9_47, %c0_48, %c0_49] : memref<10x32x1xf32, #tpu.memory_space<vmem>>, vector<1x32x1xf32>
    %39 = vector.shape_cast %38 : vector<1x32x1xf32> to vector<32x1xf32>
    %cst = arith.constant dense<0.000000e+00> : vector<32x32xf32>
    %40 = tpu.matmul %5, %1, %cst {dimension_numbers = #tpu.dot_dimension_numbers<[1], [0], [0], [1], [0, 0, 1, 1], [], []>, precision = #tpu.contract_precision<fp32>} : vector<32x32xf32>, vector<32x32xf32>, vector<32x32xf32> -> vector<32x32xf32>
    %cst_50 = arith.constant dense<0.000000e+00> : vector<32x1xf32>
    %41 = tpu.matmul %5, %3, %cst_50 {dimension_numbers = #tpu.dot_dimension_numbers<[1], [0], [0], [1], [0, 0, 1, 1], [], []>, precision = #tpu.contract_precision<fp32>} : vector<32x32xf32>, vector<32x1xf32>, vector<32x1xf32> -> vector<32x1xf32>
    %42 = arith.addf %41, %7 : vector<32x1xf32>
    %cst_51 = arith.constant dense<0.000000e+00> : vector<32x32xf32>
    %43 = tpu.matmul %13, %9, %cst_51 {dimension_numbers = #tpu.dot_dimension_numbers<[1], [0], [0], [1], [0, 0, 1, 1], [], []>, precision = #tpu.contract_precision<fp32>} : vector<32x32xf32>, vector<32x32xf32>, vector<32x32xf32> -> vector<32x32xf32>
    %cst_52 = arith.constant dense<0.000000e+00> : vector<32x1xf32>
    %44 = tpu.matmul %13, %11, %cst_52 {dimension_numbers = #tpu.dot_dimension_numbers<[1], [0], [0], [1], [0, 0, 1, 1], [], []>, precision = #tpu.contract_precision<fp32>} : vector<32x32xf32>, vector<32x1xf32>, vector<32x1xf32> -> vector<32x1xf32>
    %45 = arith.addf %44, %15 : vector<32x1xf32>
    %cst_53 = arith.constant dense<0.000000e+00> : vector<32x32xf32>
    %46 = tpu.matmul %21, %17, %cst_53 {dimension_numbers = #tpu.dot_dimension_numbers<[1], [0], [0], [1], [0, 0, 1, 1], [], []>, precision = #tpu.contract_precision<fp32>} : vector<32x32xf32>, vector<32x32xf32>, vector<32x32xf32> -> vector<32x32xf32>
    %cst_54 = arith.constant dense<0.000000e+00> : vector<32x1xf32>
    %47 = tpu.matmul %21, %19, %cst_54 {dimension_numbers = #tpu.dot_dimension_numbers<[1], [0], [0], [1], [0, 0, 1, 1], [], []>, precision = #tpu.contract_precision<fp32>} : vector<32x32xf32>, vector<32x1xf32>, vector<32x1xf32> -> vector<32x1xf32>
    %48 = arith.addf %47, %23 : vector<32x1xf32>
    %cst_55 = arith.constant dense<0.000000e+00> : vector<32x32xf32>
    %49 = tpu.matmul %29, %25, %cst_55 {dimension_numbers = #tpu.dot_dimension_numbers<[1], [0], [0], [1], [0, 0, 1, 1], [], []>, precision = #tpu.contract_precision<fp32>} : vector<32x32xf32>, vector<32x32xf32>, vector<32x32xf32> -> vector<32x32xf32>
    %cst_56 = arith.constant dense<0.000000e+00> : vector<32x1xf32>
    %50 = tpu.matmul %29, %27, %cst_56 {dimension_numbers = #tpu.dot_dimension_numbers<[1], [0], [0], [1], [0, 0, 1, 1], [], []>, precision = #tpu.contract_precision<fp32>} : vector<32x32xf32>, vector<32x1xf32>, vector<32x1xf32> -> vector<32x1xf32>
    %51 = arith.addf %50, %31 : vector<32x1xf32>
    %cst_57 = arith.constant dense<0.000000e+00> : vector<32x32xf32>
    %52 = tpu.matmul %37, %33, %cst_57 {dimension_numbers = #tpu.dot_dimension_numbers<[1], [0], [0], [1], [0, 0, 1, 1], [], []>, precision = #tpu.contract_precision<fp32>} : vector<32x32xf32>, vector<32x32xf32>, vector<32x32xf32> -> vector<32x32xf32>
    %cst_58 = arith.constant dense<0.000000e+00> : vector<32x1xf32>
    %53 = tpu.matmul %37, %35, %cst_58 {dimension_numbers = #tpu.dot_dimension_numbers<[1], [0], [0], [1], [0, 0, 1, 1], [], []>, precision = #tpu.contract_precision<fp32>} : vector<32x32xf32>, vector<32x1xf32>, vector<32x1xf32> -> vector<32x1xf32>
    %54 = arith.addf %53, %39 : vector<32x1xf32>
    %cst_59 = arith.constant dense<0.000000e+00> : vector<32x32xf32>
    %55 = tpu.matmul %43, %40, %cst_59 {dimension_numbers = #tpu.dot_dimension_numbers<[1], [0], [0], [1], [0, 0, 1, 1], [], []>, precision = #tpu.contract_precision<fp32>} : vector<32x32xf32>, vector<32x32xf32>, vector<32x32xf32> -> vector<32x32xf32>
    %cst_60 = arith.constant dense<0.000000e+00> : vector<32x1xf32>
    %56 = tpu.matmul %43, %42, %cst_60 {dimension_numbers = #tpu.dot_dimension_numbers<[1], [0], [0], [1], [0, 0, 1, 1], [], []>, precision = #tpu.contract_precision<fp32>} : vector<32x32xf32>, vector<32x1xf32>, vector<32x1xf32> -> vector<32x1xf32>
    %57 = arith.addf %56, %45 : vector<32x1xf32>
    %cst_61 = arith.constant dense<0.000000e+00> : vector<32x32xf32>
    %58 = tpu.matmul %49, %46, %cst_61 {dimension_numbers = #tpu.dot_dimension_numbers<[1], [0], [0], [1], [0, 0, 1, 1], [], []>, precision = #tpu.contract_precision<fp32>} : vector<32x32xf32>, vector<32x32xf32>, vector<32x32xf32> -> vector<32x32xf32>
    %cst_62 = arith.constant dense<0.000000e+00> : vector<32x1xf32>
    %59 = tpu.matmul %49, %48, %cst_62 {dimension_numbers = #tpu.dot_dimension_numbers<[1], [0], [0], [1], [0, 0, 1, 1], [], []>, precision = #tpu.contract_precision<fp32>} : vector<32x32xf32>, vector<32x1xf32>, vector<32x1xf32> -> vector<32x1xf32>
    %60 = arith.addf %59, %51 : vector<32x1xf32>
    %cst_63 = arith.constant dense<0.000000e+00> : vector<32x32xf32>
    %61 = tpu.matmul %58, %55, %cst_63 {dimension_numbers = #tpu.dot_dimension_numbers<[1], [0], [0], [1], [0, 0, 1, 1], [], []>, precision = #tpu.contract_precision<fp32>} : vector<32x32xf32>, vector<32x32xf32>, vector<32x32xf32> -> vector<32x32xf32>
    %cst_64 = arith.constant dense<0.000000e+00> : vector<32x1xf32>
    %62 = tpu.matmul %58, %57, %cst_64 {dimension_numbers = #tpu.dot_dimension_numbers<[1], [0], [0], [1], [0, 0, 1, 1], [], []>, precision = #tpu.contract_precision<fp32>} : vector<32x32xf32>, vector<32x1xf32>, vector<32x1xf32> -> vector<32x1xf32>
    %63 = arith.addf %62, %60 : vector<32x1xf32>
    %cst_65 = arith.constant dense<0.000000e+00> : vector<32x32xf32>
    %64 = tpu.matmul %52, %61, %cst_65 {dimension_numbers = #tpu.dot_dimension_numbers<[1], [0], [0], [1], [0, 0, 1, 1], [], []>, precision = #tpu.contract_precision<fp32>} : vector<32x32xf32>, vector<32x32xf32>, vector<32x32xf32> -> vector<32x32xf32>
    %cst_66 = arith.constant dense<0.000000e+00> : vector<32x1xf32>
    %65 = tpu.matmul %52, %63, %cst_66 {dimension_numbers = #tpu.dot_dimension_numbers<[1], [0], [0], [1], [0, 0, 1, 1], [], []>, precision = #tpu.contract_precision<fp32>} : vector<32x32xf32>, vector<32x1xf32>, vector<32x1xf32> -> vector<32x1xf32>
    %66 = arith.addf %65, %54 : vector<32x1xf32>
    %c0_67 = arith.constant 0 : index
    %c0_68 = arith.constant 0 : index
    %c0_69 = arith.constant 0 : index
    %67 = vector.load %arg1[%c0_67, %c0_68, %c0_69] : memref<1x32x256xf32, #tpu.memory_space<vmem>>, vector<1x32x256xf32>
    %68 = vector.shape_cast %67 : vector<1x32x256xf32> to vector<32x256xf32>
    %cst_70 = arith.constant dense<0.000000e+00> : vector<32x256xf32>
    %69 = tpu.matmul %64, %68, %cst_70 {dimension_numbers = #tpu.dot_dimension_numbers<[1], [0], [0], [1], [0, 0, 1, 1], [], []>, precision = #tpu.contract_precision<fp32>} : vector<32x32xf32>, vector<32x256xf32>, vector<32x256xf32> -> vector<32x256xf32>
    %70 = vector.broadcast %66 : vector<32x1xf32> to vector<32x256xf32>
    %71 = arith.addf %69, %70 : vector<32x256xf32>
    %c0_71 = arith.constant 0 : index
    %c0_72 = arith.constant 0 : index
    %c0_73 = arith.constant 0 : index
    %72 = vector.load %arg4[%c0_71, %c0_72, %c0_73] : memref<1x32x256xf32, #tpu.memory_space<vmem>>, vector<1x32x256xf32>
    %73 = vector.shape_cast %72 : vector<1x32x256xf32> to vector<32x256xf32>
    %74 = vector.shape_cast %71 : vector<32x256xf32> to vector<1x32x256xf32>
    tpu.vector_store %arg4[%c0_71, %c0_72, %c0_73], %74 {strides = array<i32>} : memref<1x32x256xf32, #tpu.memory_space<vmem>>, vector<1x32x256xf32>,
    return
  }
  func.func @transform_0(%arg0: i32) -> (i32, i32, i32) {
    %c0_i32 = arith.constant 0 : i32
    %c0_i32_0 = arith.constant 0 : i32
    %c0_i32_1 = arith.constant 0 : i32
    return %arg0, %c0_i32, %c0_i32_0 : i32, i32, i32
  }
  func.func @transform_1(%arg0: i32) -> (i32, i32, i32) {
    %c0_i32 = arith.constant 0 : i32
    %c0_i32_0 = arith.constant 0 : i32
    %c0_i32_1 = arith.constant 0 : i32
    %c0_i32_2 = arith.constant 0 : i32
    return %c0_i32, %c0_i32_0, %c0_i32_1 : i32, i32, i32
  }
  func.func @transform_2(%arg0: i32) -> (i32, i32, i32) {
    %c0_i32 = arith.constant 0 : i32
    %c0_i32_0 = arith.constant 0 : i32
    %c0_i32_1 = arith.constant 0 : i32
    %c0_i32_2 = arith.constant 0 : i32
    return %c0_i32, %c0_i32_0, %c0_i32_1 : i32, i32, i32
  }
  func.func @transform_3(%arg0: i32) -> (i32, i32, i32) {
    %c0_i32 = arith.constant 0 : i32
    %c0_i32_0 = arith.constant 0 : i32
    %c0_i32_1 = arith.constant 0 : i32
    return %arg0, %c0_i32, %c0_i32_0 : i32, i32, i32
  }
}

</mosaic_0001>

<bundles_post_ra>
// kernel: convt1x1_forward.1
= control target key start
LH: loop header
LB: loop body
LE: loop exit
PB: predicated region body
PF: predicated region fallthrough
CT: control target
= control target key end

     0   :  { %s6166_s12 = smov 0   ;;  %s8513_s0 = inlined_call_operand.vmem [shape: f32[2,32,256], index: 0, kind: input, shape index: {}]   ;;  %s8514_s1 = inlined_call_operand.vmem [shape: f32[10,32,32], index: 1, kind: input, shape index: {}]   ;;  %s8515_s2 = inlined_call_operand.vmem [shape: f32[10,32,1], index: 2, kind: input, shape index: {}]   ;;  %s8516_s3 = inlined_call_operand.vmem [shape: f32[2,32,256], index: 3, kind: output, shape index: {}]  }
   0x1 LB: > { %s6041_s13 = sadd.s32 4294967295, %s6143_s12   ;;  %p6045_p0 = scmp.ge.s32.totalorder %s6143_s12, 1  ;;  %s6143_s12 = sphi %s6166_s12, %s13_s12  }
   0x2   : > { %p137_p1 = scmp.lt.s32.totalorder %s6143_s12, 3 }
   0x4   : > { %p138_p2 = pnand %p6045_p0, %p137_p1 }
   0x6   : > { %141 = sbr.rel (%p138_p2) target bundleno = 1380 (0x564), region = 32 }
   0xb   : > { %v174_v0 = vld [vmem:[%s8514_s1 + $0x18] sm:$0xff]  ;;  %v173_v1 = vld [vmem:[%s8514_s1 + $0x10] sm:$0xff]  ;;  %v172_v2 = vld [vmem:[%s8514_s1 + $0x8] sm:$0xff]  ;;  %vm269_vm0 = vcmask 261120   ;;  %p161_p3 = scmp.lt.s32.totalorder %s6041_s13, 1 }
   0xc   : > { %v6183_v3 = vand.u32 4294901760, %v174_v0  ;;  %v6185_v4 = vand.u32 4294901760, %v173_v1  ;;  %v6187_v5 = vand.u32 4294901760, %v172_v2  ;;  %v171_v6 = vld [vmem:[%s8514_s1] sm:$0xff]  ;;  %v6051_v8 = vld [vmem:[%s8514_s1 + $0x28] sm:$0xff]  ;;  %v6052_v12 = vld [vmem:[%s8514_s1 + $0x30] sm:$0xff] }
   0xd   : > { %v6050_v7 = vld [vmem:[%s8514_s1 + $0x20] sm:$0xff]  ;;  %v6198_v9 = vand.u32 4294901760, %v171_v6  ;;  %v274_v11 = vsel %vm269_vm0, %v6051_v8, 0  ;;  %v277_v19 = vsel %vm269_vm0, %v6052_v12, 0  ;;  %v178_v32 = vld [vmem:[%s8515_s2 + $0x18] sm:$0xff]  ;;  %v177_v33 = vld [vmem:[%s8515_s2 + $0x10] sm:$0xff] }
   0xe   : > { %v271_v10 = vsel %vm269_vm0, %v6050_v7, 0  ;;  %446 = vmatpush.msra.mxu3 %v6183_v3  ;;  %295 = vmatpush.msra.mxu0 %v6183_v3  ;;  %v348_v13 = vsub.f32 %v174_v0, %v6183_v3  ;;  %v354_v14 = vsub.f32 %v173_v1, %v6185_v4  ;;  %v6210_v15 = vsub.f32 %v172_v2, %v6187_v5  ;;  %v176_v34 = vld [vmem:[%s8515_s2 + $0x8] sm:$0xff]  ;;  %v6053_v39 = vld [vmem:[%s8514_s1 + $0x38] sm:$0xff]  ;;  %v175_v40 = vld [vmem:[%s8515_s2] sm:$0xff]  ;;  %s8630_s13 = smov (!%p161_p3, %s6041_s13), 1 }
   0xf   : > { %v6212_v16 = vand.u32 4294901760, %v271_v10  ;;  %v6215_v17 = vsub.f32 %v171_v6, %v6198_v9  ;;  %v6217_v18 = vand.u32 4294901760, %v274_v11  ;;  %v6239_v31 = vand.u32 4294901760, %v277_v19  ;;  %s6124_s24 = sshll.u32 %s8630_s13, 6 }
  0x10   : > { %402 = vmatpush.msra.mxu2 %v348_v13  ;;  %448 = vmatpush.msra.mxu3 %v6185_v4  ;;  %v349_v21 = vand.u32 4294901760, %v348_v13  ;;  %v355_v22 = vand.u32 4294901760, %v354_v14  ;;  %v361_v23 = vand.u32 4294901760, %v6210_v15  ;;  %v6268_v43 = vand.u32 4294901760, %v178_v32  ;;  %s8325_s27 = scalar_lea.vmem %s8513_s0, %s6124_s24  ;;  %s8500_s30 = scalar_lea.vmem %s8516_s3, %s6124_s24 }
  0x11   : > { %v6222_v20 = vsub.f32 %v271_v10, %v6212_v16  ;;  %297 = vmatpush.msra.mxu0 %v6185_v4  ;;  %v367_v24 = vand.u32 4294901760, %v6215_v17  ;;  %v6228_v25 = vsub.f32 %v274_v11, %v6217_v18  ;;  %v6270_v44 = vand.u32 4294901760, %v177_v33 }
  0x12   : > { %405 = vmatpush.msra.mxu2 %v354_v14  ;;  %450 = vmatpush.msra.mxu3 %v6187_v5  ;;  %v350_v27 = vsub.f32 %v348_v13, %v349_v21  ;;  %v356_v28 = vsub.f32 %v354_v14, %v355_v22  ;;  %v362_v29 = vsub.f32 %v6210_v15, %v361_v23  ;;  %v6272_v45 = vand.u32 4294901760, %v176_v34  ;;  %v6060_v14 = vld [vmem:[%s8514_s1 + $0x50] sm:$0xff] }
  0x13   : > { %v6232_v26 = vand.u32 4294901760, %v6222_v20  ;;  %299 = vmatpush.msra.mxu0 %v6187_v5  ;;  %v6237_v30 = vand.u32 4294901760, %v6228_v25  ;;  %v368_v38 = vsub.f32 %v6215_v17, %v367_v24  ;;  %v6278_v47 = vsub.f32 %v277_v19, %v6239_v31  ;;  %v6059_v19 = vld [vmem:[%s8514_s1 + $0x48] sm:$0xff] }
  0x14   : > { %408 = vmatpush.msra.mxu2 %v6210_v15  ;;  %452 = vmatpush.msra.mxu3 %v6198_v9  ;;  %v351_v35 = vand.u32 4294901760, %v350_v27  ;;  %v357_v37 = vand.u32 4294901760, %v356_v28  ;;  %v363_v41 = vand.u32 4294901760, %v362_v29  ;;  %v280_v48 = vsel %vm269_vm0, %v6053_v39, 0 }
  0x15   : > { %v305_v36 = vsub.f32 %v6222_v20, %v6232_v26  ;;  %456 = vmatmul.f32.vlgmr.msra.gmra.mxu3 %v6232_v26  ;;  %301 = vmatpush.msra.mxu0 %v6198_v9  ;;  %v313_v46 = vsub.f32 %v6228_v25, %v6237_v30  ;;  %v6281_v49 = vand.u32 4294901760, %v175_v40  ;;  %v369_v50 = vand.u32 4294901760, %v368_v38 }
  0x16   : > { %352 = vmatpush.msra.mxu1 %v351_v35  ;;  %411 = vmatpush.msra.mxu2 %v6215_v17  ;;  %v626_v51 = vsub.f32 %v178_v32, %v6268_v43  ;;  %v632_v52 = vsub.f32 %v177_v33, %v6270_v44  ;;  %v638_v53 = vsub.f32 %v176_v34, %v6272_v45  ;;  %v6290_v58 = vand.u32 4294901760, %v6278_v47 }
  0x17   : > { %v6266_v42 = vand.u32 4294901760, %v305_v36  ;;  %414 = vmatmul.f32.vlgmr.msra.gmra.mxu2 %v6222_v20  ;;  %493 = vmatpush.msrb.mxu0 %v349_v21  ;;  %v644_v54 = vsub.f32 %v175_v40, %v6281_v49  ;;  %v6292_v59 = vand.u32 4294901760, %v280_v48  ;;  %v314_v61 = vand.u32 4294901760, %v313_v46  ;;  %v6058_v21 = vld [vmem:[%s8514_s1 + $0x40] sm:$0xff] }
  0x18   : > { %358 = vmatpush.msra.mxu1 %v357_v37  ;;  %573 = vmatpush.msrb.mxu2 %v6268_v43  ;;  %v627_v55 = vand.u32 4294901760, %v626_v51  ;;  %v633_v56 = vand.u32 4294901760, %v632_v52  ;;  %v639_v57 = vand.u32 4294901760, %v638_v53  ;;  %v321_v7 = vsub.f32 %v6278_v47, %v6290_v58 }
  0x19   : > { %307 = vmatmul.f32.vlgmr.msra.gmra.mxu0 %v6266_v42  ;;  %v645_v60 = vand.u32 4294901760, %v644_v54  ;;  %v6305_v8 = vsub.f32 %v280_v48, %v6292_v59  ;;  %v864_v17 = vand.u32 4294901760, %v6060_v14  ;;  %v6063_v48 = vld [vmem:[%s8515_s2 + $0x48] sm:$0xff] }
  0x1a   : > { %497 = vmatpush.msrb.mxu0 %v355_v22  ;;  %364 = vmatpush.msra.mxu1 %v363_v41  ;;  %v628_v62 = vsub.f32 %v626_v51, %v627_v55  ;;  %v634_v63 = vsub.f32 %v632_v52, %v633_v56  ;;  %v640_v0 = vsub.f32 %v638_v53, %v639_v57 }
  0x1b   : > { %575 = vmatpush.msrb.mxu2 %v6270_v44  ;;  %v646_v6 = vsub.f32 %v644_v54, %v645_v60  ;;  %v6311_v12 = vand.u32 4294901760, %v6305_v8  ;;  %v922_v22 = vsub.f32 %v6060_v14, %v864_v17 }
  0x1c   : > { %501 = vmatpush.msrb.mxu0 %v361_v23  ;;  %370 = vmatpush.msra.mxu1 %v369_v50  ;;  %v629_v1 = vand.u32 4294901760, %v628_v62  ;;  %v635_v2 = vand.u32 4294901760, %v634_v63  ;;  %v641_v10 = vand.u32 4294901760, %v640_v0  ;;  %v866_v23 = vand.u32 4294901760, %v6059_v19  ;;  %v6068_v0 = vld [vmem:[%s8514_s1 + $0x70] sm:$0xff] }
  0x1d   : > { %372 = vmatmul.f32.vlgmr.msra.gmra.mxu1 %v6212_v16  ;;  %462 = vmatmul.f32.gmra.mxu3 %v6237_v30  ;;  %v647_v11 = vand.u32 4294901760, %v646_v6  ;;  %v923_v32 = vand.u32 4294901760, %v922_v22 }
  0x1e   : > { %577 = vmatpush.msrb.mxu2 %v6272_v45  ;;  %505 = vmatpush.msrb.mxu0 %v367_v24  ;;  %v868_v24 = vand.u32 4294901760, %v6058_v21  ;;  %v928_v28 = vsub.f32 %v6059_v19, %v866_v23 }
  0x1f   : > { %419 = vmatmul.f32.gmra.mxu2 %v6228_v25  ;;  %536 = vmatpush.msrb.mxu1 %v6183_v3  ;;  %v322_v3 = vand.u32 4294901760, %v321_v7  ;;  %v924_v35 = vsub.f32 %v922_v22, %v923_v32 }
  0x20   : > { %630 = vmatpush.msrb.mxu3 %v629_v1  ;;  %579 = vmatpush.msrb.mxu2 %v6281_v49  ;;  %v934_v34 = vsub.f32 %v6058_v21, %v868_v24  ;;  %v929_v36 = vand.u32 4294901760, %v928_v28 }
  0x21   : > { %315 = vmatmul.f32.gmra.mxu0 %v314_v61  ;;  %538 = vmatpush.msrb.mxu1 %v6185_v4  ;;  %v329_v4 = vsub.f32 %v6305_v8, %v6311_v12  ;;  %v925_v37 = vand.u32 4294901760, %v924_v35 }
  0x22   : > { %636 = vmatpush.msrb.mxu3 %v635_v2  ;;  %680 = vmatpush.msra.mxu0 %v626_v51  ;;  %v930_v38 = vsub.f32 %v928_v28, %v929_v36  ;;  %v935_v39 = vand.u32 4294901760, %v934_v34  ;;  %v6396_v51 = vand.u32 4294901760, %v6063_v48 }
  0x23   : > { %540 = vmatpush.msrb.mxu1 %v6187_v5  ;;  %771 = vmatpush.msra.mxu2 %v627_v55  ;;  %v330_v5 = vand.u32 4294901760, %v329_v4 }
  0x24   : > { %642 = vmatpush.msrb.mxu3 %v641_v10  ;;  %683 = vmatpush.msra.mxu0 %v632_v52  ;;  %v931_v40 = vand.u32 4294901760, %v930_v38  ;;  %v936_v41 = vsub.f32 %v934_v34, %v935_v39  ;;  %v845_v10 = vsel %vm269_vm0, %v6068_v0, 0  ;;  %v6074_v0 = vld [vmem:[%s8514_s1 + $0x80] sm:$0xff] }
  0x25   : > { %376 = vmatmul.f32.gmra.mxu1 %v6217_v18  ;;  %468 = vmatmul.f32.gmra.mxu3 %v6290_v58 }
  0x26   : > { %648 = vmatpush.msrb.mxu3 %v647_v11  ;;  %542 = vmatpush.msrb.mxu1 %v6198_v9  ;;  %v6061_v9 = vld [vmem:[%s8514_s1 + $0x58] sm:$0xff] }
  0x27   : > { %424 = vmatmul.f32.gmra.mxu2 %v6278_v47  ;;  %686 = vmatpush.msra.mxu0 %v638_v53  ;;  %v862_v13 = vand.u32 4294901760, %v6061_v9 }
  0x28   : > { %814 = vmatpush.msra.mxu3 %v6268_v43  ;;  %775 = vmatpush.msra.mxu2 %v633_v56 }
  0x29   : > { %323 = vmatmul.f32.gmra.mxu0 %v322_v3  ;;  %724 = vmatpush.msra.mxu1 %v6268_v43  ;;  %v916_v15 = vsub.f32 %v6061_v9, %v862_v13  ;;  %v6429_v9 = vand.u32 4294901760, %v845_v10 }
  0x2a   : > { %816 = vmatpush.msra.mxu3 %v6270_v44  ;;  %779 = vmatpush.msra.mxu2 %v639_v57 }
  0x2b   : > { %689 = vmatpush.msra.mxu0 %v644_v54  ;;  %726 = vmatpush.msra.mxu1 %v6270_v44  ;;  %v917_v27 = vand.u32 4294901760, %v916_v15  ;;  %v1206_v54 = vsub.f32 %v6063_v48, %v6396_v51  ;;  %v6441_v14 = vsub.f32 %v845_v10, %v6429_v9 }
  0x2c   : > { %818 = vmatpush.msra.mxu3 %v6272_v45  ;;  %783 = vmatpush.msra.mxu2 %v645_v60 }
  0x2d   : > { %380 = vmatmul.f32.gmra.mxu1 %v6239_v31  ;;  %474 = vmatmul.f32.gmra.mxu3 %v6311_v12  ;;  %v918_v29 = vsub.f32 %v916_v15, %v917_v27  ;;  %v1207_v62 = vand.u32 4294901760, %v1206_v54 }
  0x2e   : > { %820 = vmatpush.msra.mxu3 %v6281_v49  ;;  %728 = vmatpush.msra.mxu1 %v6272_v45 }
  0x2f   : > { %429 = vmatmul.f32.gmra.mxu2 %v6305_v8  ;;  %v919_v33 = vand.u32 4294901760, %v918_v29  ;;  %v1208_v2 = vsub.f32 %v1206_v54, %v1207_v62 }
  0x30   : > { %730 = vmatpush.msra.mxu1 %v6281_v49 }
  0x31   : > { %331 = vmatmul.f32.gmra.mxu0 %v330_v5  ;;  %v1209_v11 = vand.u32 4294901760, %v1208_v2 }
  0x35   : > { %384 = vmatmul.f32.gmra.mxu1 %v6292_v59  ;;  %650 = vmatmul.f32.vlgmr.msrb.gmra.mxu3 %v6212_v16 }
  0x36   : > { %1014 = vmatpush.msrb.mxu3 %v862_v13 }
  0x37   : > { %585 = vmatmul.f32.vlgmr.msrb.gmra.mxu2 %v6266_v42  ;;  %v937_v42 = vand.u32 4294901760, %v936_v41 }
  0x38   : > { %970 = vmatpush.msrb.mxu2 %v916_v15  ;;  %1016 = vmatpush.msrb.mxu3 %v864_v17 }
  0x39   : > { %507 = vmatmul.f32.vlgmr.msrb.gmra.mxu0 %v6212_v16 }
  0x3a   : > { %863 = vmatpush.msrb.mxu0 %v862_v13  ;;  %973 = vmatpush.msrb.mxu2 %v922_v22 }
  0x3b   : > { %1018 = vmatpush.msrb.mxu3 %v866_v23 }
  0x3c   : > { %865 = vmatpush.msrb.mxu0 %v864_v17  ;;  %976 = vmatpush.msrb.mxu2 %v928_v28 }
  0x3d   : > { %544 = vmatmul.f32.vlgmr.msrb.gmra.mxu1 %v6212_v16  ;;  %654 = vmatmul.f32.gmra.mxu3 %v6217_v18 }
  0x3e   : > { %867 = vmatpush.msrb.mxu0 %v866_v23  ;;  %1020 = vmatpush.msrb.mxu3 %v868_v24 }
  0x3f   : > { %593 = vmatmul.f32.gmra.mxu2 %v314_v61  ;;  %920 = vmatpush.msrb.mxu1 %v919_v33 }
  0x40   : > { %869 = vmatpush.msrb.mxu0 %v868_v24  ;;  %979 = vmatpush.msrb.mxu2 %v934_v34 }
  0x41   : > { %511 = vmatmul.f32.gmra.mxu0 %v6217_v18  ;;  %926 = vmatpush.msrb.mxu1 %v925_v37 }
  0x43   : > { %932 = vmatpush.msrb.mxu1 %v931_v40 }
  0x45   : > { %548 = vmatmul.f32.gmra.mxu1 %v6217_v18  ;;  %658 = vmatmul.f32.gmra.mxu3 %v6239_v31 }
  0x46   : > { %938 = vmatpush.msrb.mxu1 %v937_v42 }
  0x47   : > { %601 = vmatmul.f32.gmra.mxu2 %v322_v3 }
  0x49   : > { %515 = vmatmul.f32.gmra.mxu0 %v6239_v31 }
  0x4d   : > { %552 = vmatmul.f32.gmra.mxu1 %v6239_v31  ;;  %662 = vmatmul.f32.gmra.mxu3 %v6292_v59 }
  0x4f   : > { %609 = vmatmul.f32.gmra.mxu2 %v330_v5 }
  0x51   : > { %519 = vmatmul.f32.gmra.mxu0 %v6292_v59 }
  0x55   : > { %556 = vmatmul.f32.gmra.mxu1 %v6292_v59  ;;  %822 = vmatmul.f32.vlgmr.msra.gmra.mxu3 %v6212_v16 }
  0x57   : > { %785 = vmatmul.f32.vlgmr.msra.gmra.mxu2 %v6212_v16  ;;  %v6066_v16 = vld [vmem:[%s8514_s1 + $0x60] sm:$0xff] }
  0x59   : > { %692 = vmatmul.f32.vlgmr.msra.gmra.mxu0 %v6222_v20  ;;  %v839_v20 = vsel %vm269_vm0, %v6066_v16, 0 }
  0x5a   : > { %1061 = vmatpush.msra.mxu0 %v917_v27  ;;  %v6367_v43 = vand.u32 4294901760, %v839_v20 }
  0x5c   : > { %1065 = vmatpush.msra.mxu0 %v923_v32 }
  0x5d   : > { %734 = vmatmul.f32.vlgmr.msra.gmra.mxu1 %v6232_v26  ;;  %826 = vmatmul.f32.gmra.mxu3 %v6217_v18  ;;  %v6065_v26 = vld [vmem:[%s8515_s2 + $0x58] sm:$0xff] }
  0x5e   : > { %1069 = vmatpush.msra.mxu0 %v929_v36  ;;  %1104 = vmatpush.msra.mxu1 %v862_v13  ;;  %v6374_v44 = vand.u32 4294901760, %v6065_v26 }
  0x5f   : > { %789 = vmatmul.f32.gmra.mxu2 %v6217_v18  ;;  %v6067_v18 = vld [vmem:[%s8514_s1 + $0x68] sm:$0xff] }
  0x60   : > { %1073 = vmatpush.msra.mxu0 %v935_v39  ;;  %1106 = vmatpush.msra.mxu1 %v864_v17  ;;  %v1194_v45 = vsub.f32 %v6065_v26, %v6374_v44  ;;  %v842_v49 = vsel %vm269_vm0, %v6067_v18, 0  ;;  %v6447_v17 = vand.u32 4294901760, %v6441_v14 }
  0x61   : > { %697 = vmatmul.f32.gmra.mxu0 %v6228_v25  ;;  %v6064_v25 = vld [vmem:[%s8515_s2 + $0x50] sm:$0xff]  ;;  %1141 = vmatpush.msra.mxu2 %v6374_v44  ;;  %v6408_v57 = vand.u32 4294901760, %v842_v49 }
  0x62   : > { %1108 = vmatpush.msra.mxu1 %v866_v23  ;;  %v6384_v46 = vand.u32 4294901760, %v6064_v25  ;;  %v1195_v50 = vand.u32 4294901760, %v1194_v45  ;;  %v889_v21 = vsub.f32 %v6441_v14, %v6447_v17 }
  0x63   : > { %v6423_v7 = vsub.f32 %v842_v49, %v6408_v57 }
  0x64   : > { %1110 = vmatpush.msra.mxu1 %v868_v24  ;;  %1143 = vmatpush.msra.mxu2 %v6384_v46  ;;  %v1196_v52 = vsub.f32 %v1194_v45, %v1195_v50  ;;  %v890_v23 = vand.u32 4294901760, %v889_v21 }
  0x65   : > { %740 = vmatmul.f32.gmra.mxu1 %v6237_v30  ;;  %830 = vmatmul.f32.gmra.mxu3 %v6239_v31  ;;  %v6388_v30 = vsub.f32 %v839_v20, %v6367_v43  ;;  %v6427_v5 = vand.u32 4294901760, %v6423_v7 }
  0x66   : > { %1145 = vmatpush.msra.mxu2 %v6396_v51  ;;  %v1197_v60 = vand.u32 4294901760, %v1196_v52 }
  0x67   : > { %793 = vmatmul.f32.gmra.mxu2 %v6239_v31  ;;  %v1200_v31 = vsub.f32 %v6064_v25, %v6384_v46  ;;  %v6406_v56 = vand.u32 4294901760, %v6388_v30  ;;  %v881_v13 = vsub.f32 %v6423_v7, %v6427_v5 }
  0x68   : > { %1198 = vmatpush.msra.mxu3 %v1197_v60 }
  0x69   : > { %702 = vmatmul.f32.gmra.mxu0 %v6278_v47  ;;  %v6062_v47 = vld [vmem:[%s8515_s2 + $0x40] sm:$0xff]  ;;  %v1201_v53 = vand.u32 4294901760, %v1200_v31  ;;  %v882_v15 = vand.u32 4294901760, %v881_v13 }
  0x6a   : > { %v6403_v55 = vand.u32 4294901760, %v6062_v47 }
  0x6b   : > { %v1202_v61 = vsub.f32 %v1200_v31, %v1201_v53 }
  0x6c   : > { %v1212_v63 = vsub.f32 %v6062_v47, %v6403_v55  ;;  %1147 = vmatpush.msra.mxu2 %v6403_v55 }
  0x6d   : > { %746 = vmatmul.f32.gmra.mxu1 %v6290_v58  ;;  %834 = vmatmul.f32.gmra.mxu3 %v6292_v59  ;;  %v1203_v1 = vand.u32 4294901760, %v1202_v61  ;;  %v873_v58 = vsub.f32 %v6388_v30, %v6406_v56 }
  0x6e   : > { %v1213_v6 = vand.u32 4294901760, %v1212_v63 }
  0x6f   : > { %797 = vmatmul.f32.gmra.mxu2 %v6292_v59  ;;  %1204 = vmatpush.msra.mxu3 %v1203_v1  ;;  %v874_v59 = vand.u32 4294901760, %v873_v58 }
  0x70   : > { %v1214_v3 = vsub.f32 %v1212_v63, %v1213_v6 }
  0x71   : > { %707 = vmatmul.f32.gmra.mxu0 %v6305_v8  ;;  %1210 = vmatpush.msra.mxu3 %v1209_v11  ;;  %v6069_v8 = vld [vmem:[%s8514_s1 + $0x78] sm:$0xff] }
  0x72   : > { %v1215_v4 = vand.u32 4294901760, %v1214_v3 }
  0x74   : > { %1216 = vmatpush.msra.mxu3 %v1215_v4 }
  0x75   : > { %752 = vmatmul.f32.gmra.mxu1 %v6311_v12  ;;  %1024 = vmatmul.f32.vlgmr.msrb.gmra.mxu3 %v6406_v56  ;;  %v848_v12 = vsel %vm269_vm0, %v6069_v8, 0 }
  0x76   : > { %1382 = vmatpush.msrb.mxu3 %v6374_v44  ;;  %v6449_v19 = vand.u32 4294901760, %v848_v12 }
  0x77   : > { %982 = vmatmul.f32.vlgmr.msrb.gmra.mxu2 %v6388_v30 }
  0x78   : > { %1339 = vmatpush.msrb.mxu2 %v1195_v50  ;;  %1384 = vmatpush.msrb.mxu3 %v6384_v46  ;;  %v6459_v22 = vsub.f32 %v848_v12, %v6449_v19 }
  0x79   : > { %875 = vmatmul.f32.vlgmr.msrb.gmra.mxu0 %v874_v59 }
  0x7a   : > { %1248 = vmatpush.msrb.mxu0 %v1194_v45  ;;  %1343 = vmatpush.msrb.mxu2 %v1201_v53  ;;  %v6464_v24 = vand.u32 4294901760, %v6459_v22 }
  0x7b   : > { %1386 = vmatpush.msrb.mxu3 %v6396_v51 }
  0x7c   : > { %1251 = vmatpush.msrb.mxu0 %v1200_v31  ;;  %1347 = vmatpush.msrb.mxu2 %v1207_v62  ;;  %v897_v27 = vsub.f32 %v6459_v22, %v6464_v24  ;;  %v6076_v31 = vld [vmem:[%s8514_s1 + $0x90] sm:$0xff] }
  0x7d   : > { %940 = vmatmul.f32.vlgmr.msrb.gmra.mxu1 %v6367_v43  ;;  %1030 = vmatmul.f32.gmra.mxu3 %v6427_v5  ;;  %v6502_v52 = vand.u32 4294901760, %v6076_v31 }
  0x7e   : > { %1254 = vmatpush.msrb.mxu0 %v1206_v54  ;;  %1388 = vmatpush.msrb.mxu3 %v6403_v55  ;;  %v898_v28 = vand.u32 4294901760, %v897_v27  ;;  %v6075_v54 = vld [vmem:[%s8514_s1 + $0x88] sm:$0xff]  ;;  %v6054_v27 = vld [vmem:[%s8515_s2 + $0x20] sm:$0xff] }
  0x7f   : > { %987 = vmatmul.f32.gmra.mxu2 %v6423_v7  ;;  %1292 = vmatpush.msrb.mxu1 %v6374_v44  ;;  %v6510_v60 = vand.u32 4294901760, %v6075_v54 }
  0x80   : > { %1351 = vmatpush.msrb.mxu2 %v1213_v6  ;;  %1257 = vmatpush.msrb.mxu0 %v1212_v63  ;;  %v6518_v6 = vand.u32 4294901760, %v6074_v0 }
  0x81   : > { %883 = vmatmul.f32.gmra.mxu0 %v882_v15  ;;  %1294 = vmatpush.msrb.mxu1 %v6384_v46  ;;  %v6077_v46 = vld [vmem:[%s8514_s1 + $0x98] sm:$0xff]  ;;  %v1496_v2 = vsub.f32 %v6075_v54, %v6510_v60 }
  0x82   : > { %v6493_v50 = vand.u32 4294901760, %v6077_v46 }
  0x83   : > { %1296 = vmatpush.msrb.mxu1 %v6396_v51  ;;  %v1497_v8 = vand.u32 4294901760, %v1496_v2 }
  0x84   : > { %v1484_v47 = vsub.f32 %v6077_v46, %v6493_v50 }
  0x85   : > { %944 = vmatmul.f32.gmra.mxu1 %v6408_v57  ;;  %1036 = vmatmul.f32.gmra.mxu3 %v6447_v17 }
  0x86   : > { %1298 = vmatpush.msrb.mxu1 %v6403_v55  ;;  %v1490_v55 = vsub.f32 %v6076_v31, %v6502_v52  ;;  %v1485_v61 = vand.u32 4294901760, %v1484_v47 }
  0x87   : > { %992 = vmatmul.f32.gmra.mxu2 %v6441_v14 }
  0x88   : > { %v1486_v58 = vsub.f32 %v1484_v47, %v1485_v61  ;;  %v1491_v10 = vand.u32 4294901760, %v1490_v55 }
  0x89   : > { %891 = vmatmul.f32.gmra.mxu0 %v890_v23 }
  0x8a   : > { %v1487_v4 = vand.u32 4294901760, %v1486_v58  ;;  %v1492_v13 = vsub.f32 %v1490_v55, %v1491_v10 }
  0x8d   : > { %948 = vmatmul.f32.gmra.mxu1 %v6429_v9  ;;  %1042 = vmatmul.f32.gmra.mxu3 %v6464_v24 }
  0x8f   : > { %997 = vmatmul.f32.gmra.mxu2 %v6459_v22 }
  0x91   : > { %899 = vmatmul.f32.gmra.mxu0 %v898_v28 }
  0x95   : > { %952 = vmatmul.f32.gmra.mxu1 %v6449_v19  ;;  %1218 = vmatmul.f32.vlgmr.msra.gmra.mxu3 %v6367_v43 }
  0x96   : > { %v308_v29 = vpop.f32.mrf.mxu0  ;;  %1582 = vmatpush.msra.mxu3 %v6493_v50 }
  0x97   : > { %1153 = vmatmul.f32.vlgmr.msra.gmra.mxu2 %v874_v59  ;;  %v1502_v59 = vsub.f32 %v6074_v0, %v6518_v6 }
  0x98   : > { %v457_v32 = vpop.f32.mrf.mxu3  ;;  %1538 = vmatpush.msra.mxu2 %v1484_v47  ;;  %1584 = vmatpush.msra.mxu3 %v6502_v52 }
  0x99   : > { %1075 = vmatmul.f32.vlgmr.msra.gmra.mxu0 %v6367_v43  ;;  %v1503_v21 = vand.u32 4294901760, %v1502_v59 }
  0x9a   : > { %v373_v33 = vpop.f32.mrf.mxu1  ;;  %v415_v34 = vpop.f32.mrf.mxu2  ;;  %1431 = vmatpush.msra.mxu0 %v6493_v50  ;;  %1541 = vmatpush.msra.mxu2 %v1490_v55  ;;  %v6078_v55 = vld [vmem:[%s8515_s2 + $0x80] sm:$0xff] }
  0x9b   : > { %v374_v35 = vadd.f32 %v373_v33, %v308_v29  ;;  %1586 = vmatpush.msra.mxu3 %v6510_v60 }
  0x9c   : > { %1433 = vmatpush.msra.mxu0 %v6502_v52  ;;  %1544 = vmatpush.msra.mxu2 %v1496_v2 }
  0x9d   : > { %v416_v36 = vadd.f32 %v415_v34, %v374_v35  ;;  %1112 = vmatmul.f32.vlgmr.msra.gmra.mxu1 %v6367_v43  ;;  %1222 = vmatmul.f32.gmra.mxu3 %v6408_v57 }
  0x9e   : > { %v316_v37 = vpop.f32.mrf.mxu0  ;;  %1435 = vmatpush.msra.mxu0 %v6510_v60  ;;  %1588 = vmatpush.msra.mxu3 %v6518_v6 }
  0x9f   : > { %1161 = vmatmul.f32.gmra.mxu2 %v882_v15  ;;  %v6480_v38 = vadd.f32 %v457_v32, %v416_v36  ;;  %v1498_v15 = vsub.f32 %v1496_v2, %v1497_v8  ;;  %1488 = vmatpush.msra.mxu1 %v1487_v4  ;;  %v6619_v2 = vand.u32 4294901760, %v6078_v55  ;;  %v6084_v4 = vld [vmem:[%s8514_s1 + $0xb0] sm:$0xff] }
  0xa0   : > { %v463_v39 = vpop.f32.mrf.mxu3  ;;  %1437 = vmatpush.msra.mxu0 %v6518_v6  ;;  %1547 = vmatpush.msra.mxu2 %v1502_v59 }
  0xa1   : > { %1079 = vmatmul.f32.gmra.mxu0 %v6408_v57  ;;  %v1499_v29 = vand.u32 4294901760, %v1498_v15  ;;  %v6057_v15 = vld [vmem:[%s8515_s2 + $0x38] sm:$0xff] }
  0xa2   : > { %v377_v40 = vpop.f32.mrf.mxu1  ;;  %v420_v41 = vpop.f32.mrf.mxu2 }
  0xa3   : > { %v378_v42 = vadd.f32 %v377_v40, %v316_v37  ;;  %v6082_v37 = vld [vmem:[%s8514_s1 + $0xa0] sm:$0xff] }
  0xa4   : > { %v1407_v40 = vsel %vm269_vm0, %v6082_v37, 0 }
  0xa5   : > { %v421_v16 = vadd.f32 %v420_v41, %v378_v42  ;;  %1116 = vmatmul.f32.gmra.mxu1 %v6408_v57  ;;  %1226 = vmatmul.f32.gmra.mxu3 %v6429_v9 }
  0xa6   : > { %v324_v20 = vpop.f32.mrf.mxu0 }
  0xa7   : > { %1169 = vmatmul.f32.gmra.mxu2 %v890_v23  ;;  %v6485_v26 = vadd.f32 %v463_v39, %v421_v16 }
  0xa8   : > { %v469_v44 = vpop.f32.mrf.mxu3 }
  0xa9   : > { %1083 = vmatmul.f32.gmra.mxu0 %v6429_v9 }
  0xaa   : > { %v381_v18 = vpop.f32.mrf.mxu1  ;;  %v425_v25 = vpop.f32.mrf.mxu2 }
  0xab   : > { %v382_v45 = vadd.f32 %v381_v18, %v324_v20 }
  0xad   : > { %v426_v48 = vadd.f32 %v425_v25, %v382_v45  ;;  %1120 = vmatmul.f32.gmra.mxu1 %v6429_v9  ;;  %1230 = vmatmul.f32.gmra.mxu3 %v6449_v19  ;;  %v6083_v25 = vld [vmem:[%s8514_s1 + $0xa8] sm:$0xff]  ;;  %v6080_v45 = vld [vmem:[%s8515_s2 + $0x90] sm:$0xff] }
  0xae   : > { %v332_v49 = vpop.f32.mrf.mxu0  ;;  %v6582_v46 = vand.u32 4294901760, %v6080_v45  ;;  %v1410_v31 = vsel %vm269_vm0, %v6083_v25, 0 }
  0xaf   : > { %1177 = vmatmul.f32.gmra.mxu2 %v898_v28  ;;  %v6498_v51 = vadd.f32 %v469_v44, %v426_v48  ;;  %v1493_v28 = vand.u32 4294901760, %v1492_v13  ;;  %v6613_v0 = vand.u32 4294901760, %v1410_v31 }
  0xb0   : > { %v475_v53 = vpop.f32.mrf.mxu3 }
  0xb1   : > { %1087 = vmatmul.f32.gmra.mxu0 %v6449_v19  ;;  %1494 = vmatpush.msra.mxu1 %v1493_v28 }
  0xb2   : > { %v385_v62 = vpop.f32.mrf.mxu1  ;;  %v430_v63 = vpop.f32.mrf.mxu2 }
  0xb3   : > { %v386_v1 = vadd.f32 %v385_v62, %v332_v49  ;;  %1500 = vmatpush.msra.mxu1 %v1499_v29  ;;  %v6056_v49 = vld [vmem:[%s8515_s2 + $0x30] sm:$0xff] }
  0xb5   : > { %v431_v11 = vadd.f32 %v430_v63, %v386_v1  ;;  %1124 = vmatmul.f32.gmra.mxu1 %v6449_v19  ;;  %1390 = vmatmul.f32.vlgmr.msrb.gmra.mxu3 %v6367_v43 }
  0xb6   : > { %v6521_v3 = vpop.f32.mrf.mxu0 }
  0xb7   : > { %1353 = vmatmul.f32.vlgmr.msrb.gmra.mxu2 %v6367_v43  ;;  %v6528_v12 = vadd.f32 %v475_v53, %v431_v11  ;;  %v1504_v43 = vsub.f32 %v1502_v59, %v1503_v21 }
  0xb8   : > { %v651_v23 = vpop.f32.mrf.mxu3 }
  0xb9   : > { %1260 = vmatmul.f32.vlgmr.msrb.gmra.mxu0 %v6388_v30  ;;  %v1505_v35 = vand.u32 4294901760, %v1504_v43 }
  0xba   : > { %v6536_v32 = vpop.f32.mrf.mxu1  ;;  %v586_v33 = vpop.f32.mrf.mxu2  ;;  %1629 = vmatpush.msrb.mxu0 %v1485_v61 }
  0xbb   : > { %v587_v34 = vadd.f32 %v6054_v27, %v586_v33  ;;  %1506 = vmatpush.msra.mxu1 %v1505_v35 }
  0xbc   : > { %1633 = vmatpush.msrb.mxu0 %v1491_v10 }
  0xbd   : > { %1302 = vmatmul.f32.vlgmr.msrb.gmra.mxu1 %v6406_v56  ;;  %1394 = vmatmul.f32.gmra.mxu3 %v6408_v57  ;;  %v6542_v36 = vadd.f32 %v651_v23, %v587_v34  ;;  %v6055_v56 = vld [vmem:[%s8515_s2 + $0x28] sm:$0xff]  ;;  %v6644_v23 = vsub.f32 %v1410_v31, %v6613_v0 }
  0xbe   : > { %v6538_v30 = vpop.f32.mrf.mxu0  ;;  %1637 = vmatpush.msrb.mxu0 %v1497_v8  ;;  %1672 = vmatpush.msrb.mxu1 %v6493_v50  ;;  %v6633_v8 = vsub.f32 %v6078_v55, %v6619_v2 }
  0xbf   : > { %1357 = vmatmul.f32.gmra.mxu2 %v6408_v57  ;;  %v6558_v57 = vand.u32 4294901760, %v1407_v40  ;;  %v6655_v37 = vand.u32 4294901760, %v6644_v23 }
  0xc0   : > { %v655_v39 = vpop.f32.mrf.mxu3  ;;  %1641 = vmatpush.msrb.mxu0 %v1503_v21  ;;  %1674 = vmatpush.msrb.mxu1 %v6502_v52  ;;  %v1781_v28 = vand.u32 4294901760, %v6633_v8 }
  0xc1   : > { %1265 = vmatmul.f32.gmra.mxu0 %v6423_v7  ;;  %v6081_v7 = vld [vmem:[%s8515_s2 + $0x98] sm:$0xff]  ;;  %v6589_v50 = vsub.f32 %v1407_v40, %v6558_v57 }
  0xc2   : > { %v6555_v41 = vpop.f32.mrf.mxu1  ;;  %v594_v42 = vpop.f32.mrf.mxu2  ;;  %1676 = vmatpush.msrb.mxu1 %v6510_v60  ;;  %v6569_v18 = vand.u32 4294901760, %v6081_v7  ;;  %v1782_v33 = vsub.f32 %v6633_v8, %v1781_v28 }
  0xc3   : > { %v595_v16 = vadd.f32 %v6055_v56, %v594_v42  ;;  %v6611_v63 = vand.u32 4294901760, %v6589_v50 }
  0xc4   : > { %1678 = vmatpush.msrb.mxu1 %v6518_v6  ;;  %1709 = vmatpush.msrb.mxu2 %v6569_v18  ;;  %v1783_v56 = vand.u32 4294901760, %v1782_v33 }
  0xc5   : > { %1308 = vmatmul.f32.gmra.mxu1 %v6427_v5  ;;  %1398 = vmatmul.f32.gmra.mxu3 %v6429_v9  ;;  %v6567_v44 = vadd.f32 %v655_v39, %v595_v16  ;;  %v6580_v5 = vsub.f32 %v6081_v7, %v6569_v18  ;;  %v1441_v21 = vsub.f32 %v6589_v50, %v6611_v63  ;;  %v6085_v16 = vld [vmem:[%s8514_s1 + $0xb8] sm:$0xff] }
  0xc6   : > { %v6563_v20 = vpop.f32.mrf.mxu0  ;;  %1711 = vmatpush.msrb.mxu2 %v6582_v46 }
  0xc7   : > { %1361 = vmatmul.f32.gmra.mxu2 %v6429_v9  ;;  %v6079_v9 = vld [vmem:[%s8515_s2 + $0x88] sm:$0xff]  ;;  %v1763_v47 = vand.u32 4294901760, %v6580_v5  ;;  %v6652_v35 = vand.u32 4294901760, %v1441_v21 }
  0xc8   : > { %v659_v48 = vpop.f32.mrf.mxu3  ;;  %v6600_v52 = vand.u32 4294901760, %v6079_v9 }
  0xc9   : > { %1270 = vmatmul.f32.gmra.mxu0 %v6441_v14  ;;  %v6598_v14 = vsub.f32 %v6080_v45, %v6582_v46  ;;  %v1764_v61 = vsub.f32 %v6580_v5, %v1763_v47 }
  0xca   : > { %v6602_v53 = vpop.f32.mrf.mxu1  ;;  %v602_v54 = vpop.f32.mrf.mxu2  ;;  %v6616_v1 = vsub.f32 %v6079_v9, %v6600_v52  ;;  %1713 = vmatpush.msrb.mxu2 %v6600_v52 }
  0xcb   : > { %v603_v60 = vadd.f32 %v6056_v49, %v602_v54  ;;  %v1769_v62 = vand.u32 4294901760, %v6598_v14  ;;  %v1765_v10 = vand.u32 4294901760, %v1764_v61 }
  0xcc   : > { %v1775_v59 = vand.u32 4294901760, %v6616_v1  ;;  %1715 = vmatpush.msrb.mxu2 %v6619_v2 }
  0xcd   : > { %1314 = vmatmul.f32.gmra.mxu1 %v6447_v17  ;;  %1402 = vmatmul.f32.gmra.mxu3 %v6449_v19  ;;  %v6625_v58 = vadd.f32 %v659_v48, %v603_v60  ;;  %v1770_v11 = vsub.f32 %v6598_v14, %v1769_v62  ;;  %v1416_v48 = vsel %vm269_vm0, %v6085_v16, 0 }
  0xce   : > { %v6621_v6 = vpop.f32.mrf.mxu0  ;;  %1766 = vmatpush.msrb.mxu3 %v1765_v10  ;;  %v1776_v27 = vsub.f32 %v6616_v1, %v1775_v59 }
  0xcf   : > { %1365 = vmatmul.f32.gmra.mxu2 %v6449_v19  ;;  %v1771_v17 = vand.u32 4294901760, %v1770_v11  ;;  %v1413_v19 = vsel %vm269_vm0, %v6084_v4, 0 }
  0xd0   : > { %v663_v13 = vpop.f32.mrf.mxu3  ;;  %v1777_v43 = vand.u32 4294901760, %v1776_v27  ;;  %v6657_v39 = vand.u32 4294901760, %v1413_v19 }
  0xd1   : > { %1275 = vmatmul.f32.gmra.mxu0 %v6459_v22  ;;  %1772 = vmatpush.msrb.mxu3 %v1771_v17 }
  0xd2   : > { %v6649_v29 = vpop.f32.mrf.mxu1  ;;  %v610_v22 = vpop.f32.mrf.mxu2  ;;  %v6673_v45 = vsub.f32 %v1413_v19, %v6657_v39 }
  0xd3   : > { %v611_v34 = vadd.f32 %v6057_v15, %v610_v22  ;;  %1778 = vmatpush.msrb.mxu3 %v1777_v43 }
  0xd4   : > { %v6683_v54 = vand.u32 4294901760, %v6673_v45 }
  0xd5   : > { %1320 = vmatmul.f32.gmra.mxu1 %v6464_v24  ;;  %1592 = vmatmul.f32.vlgmr.msra.gmra.mxu3 %v6611_v63  ;;  %v6661_v42 = vadd.f32 %v663_v13, %v611_v34  ;;  %v1449_v24 = vsub.f32 %v6644_v23, %v6655_v37 }
  0xd6   : > { %v693_v40 = vpop.f32.mrf.mxu0  ;;  %1784 = vmatpush.msrb.mxu3 %v1783_v56 }
  0xd7   : > { %v694_v7 = vadd.f32 %v693_v40, %v6542_v36  ;;  %1550 = vmatmul.f32.vlgmr.msra.gmra.mxu2 %v6589_v50  ;;  %v6680_v31 = vand.u32 4294901760, %v1449_v24 }
  0xd8   : > { %1950 = vmatpush.msra.mxu3 %v6569_v18  ;;  %v823_v25 = vpop.f32.mrf.mxu3  ;;  %1907 = vmatpush.msra.mxu2 %v1763_v47  ;;  %v6685_v47 = vand.u32 4294901760, %v1416_v48 }
  0xd9   : > { %1443 = vmatmul.f32.vlgmr.msra.gmra.mxu0 %v6652_v35 }
  0xda   : > { %1816 = vmatpush.msra.mxu0 %v6580_v5  ;;  %1952 = vmatpush.msra.mxu3 %v6582_v46  ;;  %v735_v36 = vpop.f32.mrf.mxu1  ;;  %v786_v49 = vpop.f32.mrf.mxu2  ;;  %v6700_v10 = vsub.f32 %v1416_v48, %v6685_v47 }
  0xdb   : > { %1911 = vmatpush.msra.mxu2 %v1769_v62  ;;  %v736_v9 = vadd.f32 %v735_v36, %v694_v7  ;;  %v1457_v62 = vsub.f32 %v6673_v45, %v6683_v54 }
  0xdc   : > { %1819 = vmatpush.msra.mxu0 %v6598_v14  ;;  %1954 = vmatpush.msra.mxu3 %v6600_v52  ;;  %v6706_v4 = vand.u32 4294901760, %v6700_v10 }
  0xdd   : > { %1915 = vmatpush.msra.mxu2 %v1775_v59  ;;  %v787_v55 = vadd.f32 %v786_v49, %v736_v9  ;;  %1508 = vmatmul.f32.vlgmr.msra.gmra.mxu1 %v6558_v57 }
  0xde   : > { %v698_v5 = vpop.f32.mrf.mxu0  ;;  %1598 = vmatmul.f32.gmra.mxu3 %v6655_v37  ;;  %1822 = vmatpush.msra.mxu0 %v6616_v1  ;;  %v1465_v13 = vsub.f32 %v6700_v10, %v6706_v4 }
  0xdf   : > { %1956 = vmatpush.msra.mxu3 %v6619_v2  ;;  %v6691_v14 = vadd.f32 %v823_v25, %v787_v55  ;;  %v699_v60 = vadd.f32 %v698_v5, %v6567_v44  ;;  %1555 = vmatmul.f32.gmra.mxu2 %v6644_v23 }
  0xe0   : > { %1860 = vmatpush.msra.mxu1 %v6569_v18  ;;  %v827_v61 = vpop.f32.mrf.mxu3  ;;  %1919 = vmatpush.msra.mxu2 %v1781_v28  ;;  %v1458_v18 = vand.u32 4294901760, %v1457_v62  ;;  %v1466_v28 = vand.u32 4294901760, %v1465_v13 }
  0xe1   : > { %1451 = vmatmul.f32.gmra.mxu0 %v6680_v31 }
  0xe2   : > { %1825 = vmatpush.msra.mxu0 %v6633_v8  ;;  %1862 = vmatpush.msra.mxu1 %v6582_v46  ;;  %v741_v1 = vpop.f32.mrf.mxu1  ;;  %v790_v44 = vpop.f32.mrf.mxu2 }
  0xe3   : > { %v742_v11 = vadd.f32 %v741_v1, %v699_v60 }
  0xe4   : > { %1864 = vmatpush.msra.mxu1 %v6600_v52 }
  0xe5   : > { %v791_v59 = vadd.f32 %v790_v44, %v742_v11  ;;  %1512 = vmatmul.f32.gmra.mxu1 %v6613_v0 }
  0xe6   : > { %v703_v17 = vpop.f32.mrf.mxu0  ;;  %1604 = vmatmul.f32.gmra.mxu3 %v6683_v54  ;;  %1866 = vmatpush.msra.mxu1 %v6619_v2 }
  0xe7   : > { %v6711_v8 = vadd.f32 %v827_v61, %v791_v59  ;;  %v704_v46 = vadd.f32 %v703_v17, %v6625_v58  ;;  %1560 = vmatmul.f32.gmra.mxu2 %v6673_v45  ;;  %v6093_v17 = vld [vmem:[%s8514_s1 + $0xd8] sm:$0xff] }
  0xe8   : > { %v831_v52 = vpop.f32.mrf.mxu3  ;;  %v6745_v13 = vand.u32 4294901760, %v6093_v17 }
  0xe9   : > { %1459 = vmatmul.f32.gmra.mxu0 %v1458_v18 }
  0xea   : > { %v747_v15 = vpop.f32.mrf.mxu1  ;;  %v794_v21 = vpop.f32.mrf.mxu2 }
  0xeb   : > { %v748_v27 = vadd.f32 %v747_v15, %v704_v46 }
  0xed   : > { %v795_v19 = vadd.f32 %v794_v21, %v748_v27  ;;  %1516 = vmatmul.f32.gmra.mxu1 %v6657_v39  ;;  %v2052_v21 = vsub.f32 %v6093_v17, %v6745_v13 }
  0xee   : > { %v708_v22 = vpop.f32.mrf.mxu0  ;;  %1610 = vmatmul.f32.gmra.mxu3 %v6706_v4 }
  0xef   : > { %v6719_v2 = vadd.f32 %v831_v52, %v795_v19  ;;  %v709_v58 = vadd.f32 %v708_v22, %v6661_v42  ;;  %1565 = vmatmul.f32.gmra.mxu2 %v6700_v10  ;;  %v6091_v22 = vld [vmem:[%s8514_s1 + $0xc8] sm:$0xff] }
  0xf0   : > { %v835_v43 = vpop.f32.mrf.mxu3 }
  0xf1   : > { %1467 = vmatmul.f32.gmra.mxu0 %v1466_v28 }
  0xf2   : > { %v753_v33 = vpop.f32.mrf.mxu1  ;;  %v798_v34 = vpop.f32.mrf.mxu2 }
  0xf3   : > { %v754_v56 = vadd.f32 %v753_v33, %v709_v58  ;;  %v6762_v58 = vand.u32 4294901760, %v6091_v22 }
  0xf5   : > { %v799_v40 = vadd.f32 %v798_v34, %v754_v56  ;;  %1520 = vmatmul.f32.gmra.mxu1 %v6685_v47  ;;  %v6090_v56 = vld [vmem:[%s8514_s1 + $0xc0] sm:$0xff] }
  0xf6   : > { %v876_v16 = vpop.f32.mrf.mxu0  ;;  %1786 = vmatmul.f32.vlgmr.msrb.gmra.mxu3 %v6558_v57 }
  0xf7   : > { %v6725_v7 = vadd.f32 %v835_v43, %v799_v40  ;;  %1721 = vmatmul.f32.vlgmr.msrb.gmra.mxu2 %v6652_v35  ;;  %2150 = vmatpush.msrb.mxu3 %v6745_v13  ;;  %v2053_v43 = vand.u32 4294901760, %v2052_v21 }
  0xf8   : > { %v1025_v42 = vpop.f32.mrf.mxu3  ;;  %2106 = vmatpush.msrb.mxu2 %v2052_v21 }
  0xf9   : > { %1643 = vmatmul.f32.vlgmr.msrb.gmra.mxu0 %v6558_v57 }
  0xfa   : > { %v941_v25 = vpop.f32.mrf.mxu1  ;;  %v983_v24 = vpop.f32.mrf.mxu2  ;;  %1999 = vmatpush.msrb.mxu0 %v6745_v13 }
  0xfb   : > { %v942_v48 = vadd.f32 %v941_v25, %v876_v16  ;;  %v2064_v16 = vsub.f32 %v6091_v22, %v6762_v58  ;;  %v2054_v25 = vsub.f32 %v2052_v21, %v2053_v43 }
  0xfd   : > { %v984_v36 = vadd.f32 %v983_v24, %v942_v48  ;;  %1680 = vmatmul.f32.vlgmr.msrb.gmra.mxu1 %v6558_v57 }
  0xfe   : > { %v884_v49 = vpop.f32.mrf.mxu0  ;;  %1790 = vmatmul.f32.gmra.mxu3 %v6613_v0 }
  0xff   : > { %1729 = vmatmul.f32.gmra.mxu2 %v6680_v31  ;;  %v6732_v9 = vadd.f32 %v1025_v42, %v984_v36  ;;  %v6770_v42 = vand.u32 4294901760, %v6090_v56 }
 0x100   : > { %v1031_v55 = vpop.f32.mrf.mxu3 }
 0x101   : > { %1647 = vmatmul.f32.gmra.mxu0 %v6613_v0 }
 0x102   : > { %v945_v35 = vpop.f32.mrf.mxu1  ;;  %v988_v5 = vpop.f32.mrf.mxu2 }
 0x103   : > { %v946_v60 = vadd.f32 %v945_v35, %v884_v49  ;;  %v2055_v49 = vand.u32 4294901760, %v2054_v25  ;;  %v2065_v35 = vand.u32 4294901760, %v2064_v16 }
 0x105   : > { %v989_v61 = vadd.f32 %v988_v5, %v946_v60  ;;  %1684 = vmatmul.f32.gmra.mxu1 %v6613_v0 }
 0x106   : > { %v892_v62 = vpop.f32.mrf.mxu0  ;;  %1794 = vmatmul.f32.gmra.mxu3 %v6657_v39  ;;  %2056 = vmatpush.msrb.mxu1 %v2055_v49 }
 0x107   : > { %1737 = vmatmul.f32.gmra.mxu2 %v1458_v18  ;;  %v6737_v1 = vadd.f32 %v1031_v55, %v989_v61  ;;  %v6092_v18 = vld [vmem:[%s8514_s1 + $0xd0] sm:$0xff]  ;;  %v2070_v55 = vsub.f32 %v6090_v56, %v6770_v42  ;;  %v2066_v61 = vsub.f32 %v2064_v16, %v2065_v35 }
 0x108   : > { %v1037_v31 = vpop.f32.mrf.mxu3  ;;  %v6754_v27 = vand.u32 4294901760, %v6092_v18 }
 0x109   : > { %1651 = vmatmul.f32.gmra.mxu0 %v6657_v39 }
 0x10a   : > { %v949_v44 = vpop.f32.mrf.mxu1  ;;  %v993_v11 = vpop.f32.mrf.mxu2  ;;  %2152 = vmatpush.msrb.mxu3 %v6754_v27  ;;  %2001 = vmatpush.msrb.mxu0 %v6754_v27 }
 0x10b   : > { %v950_v59 = vadd.f32 %v949_v44, %v892_v62  ;;  %v2071_v62 = vand.u32 4294901760, %v2070_v55  ;;  %v6070_v44 = vld [vmem:[%s8515_s2 + $0x60] sm:$0xff] }
 0x10c   : > { %2154 = vmatpush.msrb.mxu3 %v6762_v58  ;;  %2003 = vmatpush.msrb.mxu0 %v6762_v58 }
 0x10d   : > { %v994_v46 = vadd.f32 %v993_v11, %v950_v59  ;;  %1688 = vmatmul.f32.gmra.mxu1 %v6657_v39  ;;  %v2067_v59 = vand.u32 4294901760, %v2066_v61  ;;  %v6094_v61 = vld [vmem:[%s8515_s2 + $0xc0] sm:$0xff] }
 0x10e   : > { %v900_v52 = vpop.f32.mrf.mxu0  ;;  %1798 = vmatmul.f32.gmra.mxu3 %v6685_v47  ;;  %2005 = vmatpush.msrb.mxu0 %v6770_v42 }
 0x10f   : > { %1745 = vmatmul.f32.gmra.mxu2 %v1466_v28  ;;  %v6750_v15 = vadd.f32 %v1037_v31, %v994_v46  ;;  %v2058_v28 = vsub.f32 %v6092_v18, %v6754_v27  ;;  %2156 = vmatpush.msrb.mxu3 %v6770_v42 }
 0x110   : > { %v1043_v19 = vpop.f32.mrf.mxu3 }
 0x111   : > { %1655 = vmatmul.f32.gmra.mxu0 %v6685_v47  ;;  %2109 = vmatpush.msrb.mxu2 %v2058_v28  ;;  %v2059_v24 = vand.u32 4294901760, %v2058_v28 }
 0x112   : > { %v953_v33 = vpop.f32.mrf.mxu1  ;;  %v998_v34 = vpop.f32.mrf.mxu2 }
 0x113   : > { %v954_v40 = vadd.f32 %v953_v33, %v900_v52  ;;  %2112 = vmatpush.msrb.mxu2 %v2064_v16  ;;  %v2060_v5 = vsub.f32 %v2058_v28, %v2059_v24 }
 0x115   : > { %v999_v48 = vadd.f32 %v998_v34, %v954_v40  ;;  %1692 = vmatmul.f32.gmra.mxu1 %v6685_v47  ;;  %v2061_v11 = vand.u32 4294901760, %v2060_v5  ;;  %2115 = vmatpush.msrb.mxu2 %v2070_v55  ;;  %v6096_v40 = vld [vmem:[%s8515_s2 + $0xd0] sm:$0xff] }
 0x116   : > { %v6773_v36 = vpop.f32.mrf.mxu0  ;;  %1958 = vmatmul.f32.vlgmr.msra.gmra.mxu3 %v6558_v57  ;;  %v6834_v16 = vand.u32 4294901760, %v6096_v40 }
 0x117   : > { %1921 = vmatmul.f32.vlgmr.msra.gmra.mxu2 %v6558_v57  ;;  %v6780_v60 = vadd.f32 %v1043_v19, %v999_v48  ;;  %v2072_v57 = vsub.f32 %v2070_v55, %v2071_v62  ;;  %2062 = vmatpush.msrb.mxu1 %v2061_v11  ;;  %v6098_v19 = vld [vmem:[%s8514_s1 + $0xe0] sm:$0xff] }
 0x118   : > { %v1219_v31 = vpop.f32.mrf.mxu3  ;;  %v1975_v28 = vsel %vm269_vm0, %v6098_v19, 0 }
 0x119   : > { %1828 = vmatmul.f32.vlgmr.msra.gmra.mxu0 %v6589_v50  ;;  %v2073_v18 = vand.u32 4294901760, %v2072_v57  ;;  %2068 = vmatpush.msrb.mxu1 %v2067_v59 }
 0x11a   : > { %v6788_v17 = vpop.f32.mrf.mxu1  ;;  %v1154_v46 = vpop.f32.mrf.mxu2  ;;  %2197 = vmatpush.msra.mxu0 %v2053_v43 }
 0x11b   : > { %v1155_v52 = vadd.f32 %v6070_v44, %v1154_v46  ;;  %2074 = vmatpush.msrb.mxu1 %v2073_v18  ;;  %v6871_v46 = vand.u32 4294901760, %v6094_v61 }
 0x11c   : > { %2201 = vmatpush.msra.mxu0 %v2059_v24  ;;  %v6072_v24 = vld [vmem:[%s8515_s2 + $0x70] sm:$0xff] }
 0x11d   : > { %1870 = vmatmul.f32.vlgmr.msra.gmra.mxu1 %v6611_v63  ;;  %v6794_v21 = vadd.f32 %v1219_v31, %v1155_v52  ;;  %v6071_v63 = vld [vmem:[%s8515_s2 + $0x68] sm:$0xff] }
 0x11e   : > { %v6790_v50 = vpop.f32.mrf.mxu0  ;;  %1962 = vmatmul.f32.gmra.mxu3 %v6613_v0  ;;  %2205 = vmatpush.msra.mxu0 %v2065_v35 }
 0x11f   : > { %1925 = vmatmul.f32.gmra.mxu2 %v6613_v0  ;;  %2240 = vmatpush.msra.mxu1 %v6745_v13  ;;  %v6810_v0 = vand.u32 4294901760, %v1975_v28 }
 0x120   : > { %v1223_v22 = vpop.f32.mrf.mxu3  ;;  %2209 = vmatpush.msra.mxu0 %v2071_v62 }
 0x121   : > { %1833 = vmatmul.f32.gmra.mxu0 %v6644_v23  ;;  %2242 = vmatpush.msra.mxu1 %v6754_v27  ;;  %v6097_v23 = vld [vmem:[%s8515_s2 + $0xd8] sm:$0xff]  ;;  %v6841_v48 = vsub.f32 %v1975_v28, %v6810_v0 }
 0x122   : > { %v6807_v43 = vpop.f32.mrf.mxu1  ;;  %v1162_v33 = vpop.f32.mrf.mxu2  ;;  %v6821_v27 = vand.u32 4294901760, %v6097_v23 }
 0x123   : > { %v1163_v34 = vadd.f32 %v6071_v63, %v1162_v33  ;;  %2244 = vmatpush.msra.mxu1 %v6762_v58  ;;  %v6099_v58 = vld [vmem:[%s8514_s1 + $0xe8] sm:$0xff]  ;;  %v6863_v11 = vand.u32 4294901760, %v6841_v48  ;;  %v6100_v63 = vld [vmem:[%s8514_s1 + $0xf0] sm:$0xff] }
 0x124   : > { %2277 = vmatpush.msra.mxu2 %v6821_v27 }
 0x125   : > { %1876 = vmatmul.f32.gmra.mxu1 %v6655_v37  ;;  %v6819_v56 = vadd.f32 %v1223_v22, %v1163_v34  ;;  %v6832_v37 = vsub.f32 %v6097_v23, %v6821_v27  ;;  %v6073_v23 = vld [vmem:[%s8515_s2 + $0x78] sm:$0xff] }
 0x126   : > { %v6815_v13 = vpop.f32.mrf.mxu0  ;;  %1966 = vmatmul.f32.gmra.mxu3 %v6657_v39  ;;  %2246 = vmatpush.msra.mxu1 %v6770_v42  ;;  %v1978_v42 = vsel %vm269_vm0, %v6099_v58, 0  ;;  %v2009_v58 = vsub.f32 %v6841_v48, %v6863_v11 }
 0x127   : > { %1929 = vmatmul.f32.gmra.mxu2 %v6657_v39  ;;  %v6095_v39 = vld [vmem:[%s8515_s2 + $0xc8] sm:$0xff]  ;;  %v2331_v49 = vand.u32 4294901760, %v6832_v37  ;;  %v6865_v59 = vand.u32 4294901760, %v1978_v42 }
 0x128   : > { %v1227_v25 = vpop.f32.mrf.mxu3  ;;  %v6852_v55 = vand.u32 4294901760, %v6095_v39  ;;  %2279 = vmatpush.msra.mxu2 %v6834_v16 }
 0x129   : > { %1838 = vmatmul.f32.gmra.mxu0 %v6673_v45  ;;  %v6850_v45 = vsub.f32 %v6096_v40, %v6834_v16  ;;  %v2332_v31 = vsub.f32 %v6832_v37, %v2331_v49  ;;  %v6894_v40 = vsub.f32 %v1978_v42, %v6865_v59 }
 0x12a   : > { %v6854_v35 = vpop.f32.mrf.mxu1  ;;  %v1170_v5 = vpop.f32.mrf.mxu2  ;;  %v6868_v57 = vsub.f32 %v6095_v39, %v6852_v55  ;;  %2281 = vmatpush.msra.mxu2 %v6852_v55 }
 0x12b   : > { %v1171_v62 = vadd.f32 %v6072_v24, %v1170_v5  ;;  %v2337_v44 = vand.u32 4294901760, %v6850_v45  ;;  %v2333_v19 = vand.u32 4294901760, %v2332_v31  ;;  %v6900_v31 = vand.u32 4294901760, %v2009_v58 }
 0x12c   : > { %v2343_v28 = vand.u32 4294901760, %v6868_v57  ;;  %2283 = vmatpush.msra.mxu2 %v6871_v46 }
 0x12d   : > { %1882 = vmatmul.f32.gmra.mxu1 %v6683_v54  ;;  %v6877_v18 = vadd.f32 %v1227_v25, %v1171_v62  ;;  %v2338_v22 = vsub.f32 %v6850_v45, %v2337_v44  ;;  %2334 = vmatpush.msra.mxu3 %v2333_v19  ;;  %v2348_v54 = vsub.f32 %v6094_v61, %v6871_v46  ;;  %v6903_v19 = vand.u32 4294901760, %v6894_v40 }
 0x12e   : > { %v6873_v52 = vpop.f32.mrf.mxu0  ;;  %1970 = vmatmul.f32.gmra.mxu3 %v6685_v47  ;;  %v2344_v25 = vsub.f32 %v6868_v57, %v2343_v28 }
 0x12f   : > { %1933 = vmatmul.f32.gmra.mxu2 %v6685_v47  ;;  %v2339_v33 = vand.u32 4294901760, %v2338_v22  ;;  %v1981_v47 = vsel %vm269_vm0, %v6100_v63, 0  ;;  %v2349_v24 = vand.u32 4294901760, %v2348_v54 }
 0x130   : > { %v1231_v34 = vpop.f32.mrf.mxu3  ;;  %v2345_v5 = vand.u32 4294901760, %v2344_v25  ;;  %v6905_v22 = vand.u32 4294901760, %v1981_v47 }
 0x131   : > { %1843 = vmatmul.f32.gmra.mxu0 %v6700_v10  ;;  %2340 = vmatpush.msra.mxu3 %v2339_v33  ;;  %v2350_v62 = vsub.f32 %v2348_v54, %v2349_v24 }
 0x132   : > { %v6898_v39 = vpop.f32.mrf.mxu1  ;;  %v1178_v10 = vpop.f32.mrf.mxu2 }
 0x133   : > { %v1179_v61 = vadd.f32 %v6073_v23, %v1178_v10  ;;  %2346 = vmatpush.msra.mxu3 %v2345_v5  ;;  %v2351_v33 = vand.u32 4294901760, %v2350_v62  ;;  %v6101_v23 = vld [vmem:[%s8514_s1 + $0xf8] sm:$0xff]  ;;  %v6920_v10 = vsub.f32 %v1981_v47, %v6905_v22 }
 0x135   : > { %1888 = vmatmul.f32.gmra.mxu1 %v6706_v4  ;;  %v6909_v63 = vadd.f32 %v1231_v34, %v1179_v61  ;;  %2352 = vmatpush.msra.mxu3 %v2351_v33  ;;  %v2017_v4 = vsub.f32 %v6894_v40, %v6903_v19  ;;  %v1984_v34 = vsel %vm269_vm0, %v6101_v23, 0  ;;  %v6930_v47 = vand.u32 4294901760, %v6920_v10 }
 0x136   : > { %v1261_v42 = vpop.f32.mrf.mxu0  ;;  %2160 = vmatmul.f32.vlgmr.msrb.gmra.mxu3 %v6863_v11 }
 0x137   : > { %v1262_v58 = vadd.f32 %v1261_v42, %v6794_v21  ;;  %2118 = vmatmul.f32.vlgmr.msrb.gmra.mxu2 %v6841_v48  ;;  %2518 = vmatpush.msrb.mxu3 %v6821_v27  ;;  %v6927_v62 = vand.u32 4294901760, %v2017_v4  ;;  %v6932_v42 = vand.u32 4294901760, %v1984_v34  ;;  %v2025_v23 = vsub.f32 %v6920_v10, %v6930_v47 }
 0x138   : > { %v1391_v25 = vpop.f32.mrf.mxu3  ;;  %2475 = vmatpush.msrb.mxu2 %v2331_v49 }
 0x139   : > { %2011 = vmatmul.f32.vlgmr.msrb.gmra.mxu0 %v6900_v31  ;;  %2520 = vmatpush.msrb.mxu3 %v6834_v16 }
 0x13a   : > { %2384 = vmatpush.msrb.mxu0 %v6832_v37  ;;  %v1303_v21 = vpop.f32.mrf.mxu1  ;;  %v1354_v5 = vpop.f32.mrf.mxu2  ;;  %2479 = vmatpush.msrb.mxu2 %v2337_v44 }
 0x13b   : > { %v1304_v61 = vadd.f32 %v1303_v21, %v1262_v58  ;;  %2522 = vmatpush.msrb.mxu3 %v6852_v55  ;;  %v6947_v58 = vsub.f32 %v1984_v34, %v6932_v42 }
 0x13c   : > { %2387 = vmatpush.msrb.mxu0 %v6850_v45  ;;  %2483 = vmatpush.msrb.mxu2 %v2343_v28 }
 0x13d   : > { %v1355_v33 = vadd.f32 %v1354_v5, %v1304_v61  ;;  %2076 = vmatmul.f32.vlgmr.msrb.gmra.mxu1 %v6810_v0  ;;  %2524 = vmatpush.msrb.mxu3 %v6871_v46  ;;  %v6952_v4 = vand.u32 4294901760, %v6947_v58 }
 0x13e   : > { %v1266_v37 = vpop.f32.mrf.mxu0  ;;  %2166 = vmatmul.f32.gmra.mxu3 %v6903_v19  ;;  %2390 = vmatpush.msrb.mxu0 %v6868_v57 }
 0x13f   : > { %v1267_v49 = vadd.f32 %v1266_v37, %v6819_v56  ;;  %2123 = vmatmul.f32.gmra.mxu2 %v6894_v40  ;;  %v6941_v45 = vadd.f32 %v1391_v25, %v1355_v33  ;;  %2428 = vmatpush.msrb.mxu1 %v6821_v27  ;;  %v2026_v25 = vand.u32 4294901760, %v2025_v23 }
 0x140   : > { %v1395_v44 = vpop.f32.mrf.mxu3  ;;  %2393 = vmatpush.msrb.mxu0 %v2348_v54  ;;  %2487 = vmatpush.msrb.mxu2 %v2349_v24  ;;  %v2033_v24 = vsub.f32 %v6947_v58, %v6952_v4 }
 0x141   : > { %8535 = vst [vmem:[#allocation2_spill] sm:$0xff] %v6941_v45  ;;  %2019 = vmatmul.f32.gmra.mxu0 %v6927_v62  ;;  %2430 = vmatpush.msrb.mxu1 %v6834_v16 }
 0x142   : > { %v1309_v56 = vpop.f32.mrf.mxu1  ;;  %v1358_v57 = vpop.f32.mrf.mxu2  ;;  %v2034_v33 = vand.u32 4294901760, %v2033_v24 }
 0x143   : > { %v1310_v28 = vadd.f32 %v1309_v56, %v1267_v49  ;;  %2432 = vmatpush.msrb.mxu1 %v6852_v55 }
 0x145   : > { %v1359_v21 = vadd.f32 %v1358_v57, %v1310_v28  ;;  %2080 = vmatmul.f32.gmra.mxu1 %v6865_v59 }
 0x146   : > { %v1271_v5 = vpop.f32.mrf.mxu0  ;;  %2172 = vmatmul.f32.gmra.mxu3 %v6930_v47  ;;  %2434 = vmatpush.msrb.mxu1 %v6871_v46 }
 0x147   : > { %v1272_v27 = vadd.f32 %v1271_v5, %v6877_v18  ;;  %2128 = vmatmul.f32.gmra.mxu2 %v6920_v10  ;;  %v6960_v16 = vadd.f32 %v1395_v44, %v1359_v21 }
 0x148   : > { %v1399_v54 = vpop.f32.mrf.mxu3 }
 0x149   : > { %8536 = vst [vmem:[#allocation3_spill] sm:$0xff] %v6960_v16  ;;  %2027 = vmatmul.f32.gmra.mxu0 %v2026_v25 }
 0x14a   : > { %v1315_v55 = vpop.f32.mrf.mxu1  ;;  %v1362_v34 = vpop.f32.mrf.mxu2 }
 0x14b   : > { %v1316_v61 = vadd.f32 %v1315_v55, %v1272_v27 }
 0x14d   : > { %v1363_v37 = vadd.f32 %v1362_v34, %v1316_v61  ;;  %2084 = vmatmul.f32.gmra.mxu1 %v6905_v22 }
 0x14e   : > { %v1276_v49 = vpop.f32.mrf.mxu0  ;;  %2178 = vmatmul.f32.gmra.mxu3 %v6952_v4 }
 0x14f   : > { %v1277_v46 = vadd.f32 %v1276_v49, %v6909_v63  ;;  %2133 = vmatmul.f32.gmra.mxu2 %v6947_v58  ;;  %v6968_v18 = vadd.f32 %v1399_v54, %v1363_v37 }
 0x150   : > { %v1403_v44 = vpop.f32.mrf.mxu3 }
 0x151   : > { %8537 = vst [vmem:[#allocation4_spill] sm:$0xff] %v6968_v18  ;;  %2035 = vmatmul.f32.gmra.mxu0 %v2034_v33 }
 0x152   : > { %v1321_v23 = vpop.f32.mrf.mxu1  ;;  %v1366_v56 = vpop.f32.mrf.mxu2 }
 0x153   : > { %v1322_v57 = vadd.f32 %v1321_v23, %v1277_v46 }
 0x155   : > { %v1367_v28 = vadd.f32 %v1366_v56, %v1322_v57  ;;  %2088 = vmatmul.f32.gmra.mxu1 %v6932_v42 }
 0x156   : > { %v1444_v21 = vpop.f32.mrf.mxu0  ;;  %2354 = vmatmul.f32.vlgmr.msra.gmra.mxu3 %v6810_v0 }
 0x157   : > { %2289 = vmatmul.f32.vlgmr.msra.gmra.mxu2 %v6900_v31  ;;  %v6973_v5 = vadd.f32 %v1403_v44, %v1367_v28 }
 0x158   : > { %v1593_v63 = vpop.f32.mrf.mxu3 }
 0x159   : > { %8538 = vst [vmem:[#allocation5_spill] sm:$0xff] %v6973_v5  ;;  %2211 = vmatmul.f32.vlgmr.msra.gmra.mxu0 %v6810_v0 }
 0x15a   : > { %v1509_v27 = vpop.f32.mrf.mxu1  ;;  %v1551_v54 = vpop.f32.mrf.mxu2 }
 0x15b   : > { %v1510_v24 = vadd.f32 %v1509_v27, %v1444_v21 }
 0x15d   : > { %v1552_v55 = vadd.f32 %v1551_v54, %v1510_v24  ;;  %2248 = vmatmul.f32.vlgmr.msra.gmra.mxu1 %v6810_v0 }
 0x15e   : > { %v1452_v34 = vpop.f32.mrf.mxu0  ;;  %2358 = vmatmul.f32.gmra.mxu3 %v6865_v59 }
 0x15f   : > { %2297 = vmatmul.f32.gmra.mxu2 %v6927_v62  ;;  %v6979_v61 = vadd.f32 %v1593_v63, %v1552_v55  ;;  %v6109_v63 = vld [vmem:[%s8514_s1 + $0x118] sm:$0xff] }
 0x160   : > { %v6992_v24 = vand.u32 4294901760, %v6109_v63 }
 0x161   : > { %8539 = vst [vmem:[#allocation6_spill] sm:$0xff] %v6979_v61  ;;  %2215 = vmatmul.f32.gmra.mxu0 %v6865_v59  ;;  %v1599_v31 = vpop.f32.mrf.mxu3 }
 0x162   : > { %v1513_v37 = vpop.f32.mrf.mxu1  ;;  %v1556_v49 = vpop.f32.mrf.mxu2  ;;  %2718 = vmatpush.msra.mxu3 %v6992_v24  ;;  %2567 = vmatpush.msra.mxu0 %v6992_v24 }
 0x163   : > { %v1514_v46 = vadd.f32 %v1513_v37, %v1452_v34  ;;  %v2620_v34 = vsub.f32 %v6109_v63, %v6992_v24 }
 0x165   : > { %v1557_v44 = vadd.f32 %v1556_v49, %v1514_v46  ;;  %2252 = vmatmul.f32.gmra.mxu1 %v6865_v59  ;;  %v6107_v49 = vld [vmem:[%s8514_s1 + $0x108] sm:$0xff]  ;;  %2674 = vmatpush.msra.mxu2 %v2620_v34 }
 0x166   : > { %v1460_v23 = vpop.f32.mrf.mxu0  ;;  %2362 = vmatmul.f32.gmra.mxu3 %v6905_v22  ;;  %v7009_v46 = vand.u32 4294901760, %v6107_v49 }
 0x167   : > { %2305 = vmatmul.f32.gmra.mxu2 %v2026_v25  ;;  %v6984_v56 = vadd.f32 %v1599_v31, %v1557_v44  ;;  %v6108_v25 = vld [vmem:[%s8514_s1 + $0x110] sm:$0xff]  ;;  %v2621_v44 = vand.u32 4294901760, %v2620_v34 }
 0x168   : > { %v7001_v31 = vand.u32 4294901760, %v6108_v25 }
 0x169   : > { %8540 = vst [vmem:[#allocation7_spill] sm:$0xff] %v6984_v56  ;;  %2219 = vmatmul.f32.gmra.mxu0 %v6905_v22  ;;  %v1605_v62 = vpop.f32.mrf.mxu3 }
 0x16a   : > { %v1517_v57 = vpop.f32.mrf.mxu1  ;;  %v1561_v28 = vpop.f32.mrf.mxu2  ;;  %2720 = vmatpush.msra.mxu3 %v7001_v31  ;;  %2569 = vmatpush.msra.mxu0 %v7001_v31 }
 0x16b   : > { %v1518_v21 = vadd.f32 %v1517_v57, %v1460_v23  ;;  %v6106_v57 = vld [vmem:[%s8514_s1 + $0x100] sm:$0xff] }
 0x16c   : > { %v7017_v63 = vand.u32 4294901760, %v6106_v57  ;;  %2722 = vmatpush.msra.mxu3 %v7009_v46  ;;  %2571 = vmatpush.msra.mxu0 %v7009_v46 }
 0x16d   : > { %v1562_v27 = vadd.f32 %v1561_v28, %v1518_v21  ;;  %2256 = vmatmul.f32.gmra.mxu1 %v6905_v22  ;;  %v2632_v21 = vsub.f32 %v6107_v49, %v7009_v46 }
 0x16e   : > { %v1468_v54 = vpop.f32.mrf.mxu0  ;;  %2366 = vmatmul.f32.gmra.mxu3 %v6932_v42  ;;  %2573 = vmatpush.msra.mxu0 %v7017_v63 }
 0x16f   : > { %2313 = vmatmul.f32.gmra.mxu2 %v2034_v33  ;;  %v6997_v55 = vadd.f32 %v1605_v62, %v1562_v27  ;;  %v2626_v33 = vsub.f32 %v6108_v25, %v7001_v31  ;;  %v2622_v27 = vsub.f32 %v2620_v34, %v2621_v44  ;;  %2724 = vmatpush.msra.mxu3 %v7017_v63 }
 0x171   : > { %2223 = vmatmul.f32.gmra.mxu0 %v6932_v42  ;;  %v1611_v37 = vpop.f32.mrf.mxu3  ;;  %2677 = vmatpush.msra.mxu2 %v2626_v33  ;;  %v2627_v25 = vand.u32 4294901760, %v2626_v33  ;;  %v2623_v45 = vand.u32 4294901760, %v2622_v27 }
 0x172   : > { %v1521_v23 = vpop.f32.mrf.mxu1  ;;  %v1566_v62 = vpop.f32.mrf.mxu2 }
 0x173   : > { %v1522_v28 = vadd.f32 %v1521_v23, %v1468_v54  ;;  %v2638_v54 = vsub.f32 %v6106_v57, %v7017_v63  ;;  %v2633_v23 = vand.u32 4294901760, %v2632_v21  ;;  %2680 = vmatpush.msra.mxu2 %v2632_v21  ;;  %v2628_v49 = vsub.f32 %v2626_v33, %v2627_v25  ;;  %v6086_v57 = vld [vmem:[%s8515_s2 + $0xa0] sm:$0xff]  ;;  %2624 = vmatpush.msra.mxu1 %v2623_v45 }
 0x175   : > { %v1567_v5 = vadd.f32 %v1566_v62, %v1522_v28  ;;  %2260 = vmatmul.f32.gmra.mxu1 %v6932_v42  ;;  %v2634_v62 = vsub.f32 %v2632_v21, %v2633_v23  ;;  %v2639_v28 = vand.u32 4294901760, %v2638_v54  ;;  %v2629_v27 = vand.u32 4294901760, %v2628_v49  ;;  %2683 = vmatpush.msra.mxu2 %v2638_v54 }
 0x176   : > { %v7020_v18 = vpop.f32.mrf.mxu0  ;;  %2526 = vmatmul.f32.vlgmr.msrb.gmra.mxu3 %v6810_v0 }
 0x177   : > { %8541 = vst [vmem:[#allocation8_spill] sm:$0xff] %v7020_v18  ;;  %2489 = vmatmul.f32.vlgmr.msrb.gmra.mxu2 %v6810_v0  ;;  %v7027_v34 = vadd.f32 %v1611_v37, %v1567_v5  ;;  %v2635_v33 = vand.u32 4294901760, %v2634_v62  ;;  %v2640_v0 = vsub.f32 %v2638_v54, %v2639_v28  ;;  %2630 = vmatpush.msra.mxu1 %v2629_v27  ;;  %v6113_v54 = vld [vmem:[%s8515_s2 + $0x118] sm:$0xff] }
 0x178   : > { %v7049_v49 = vand.u32 4294901760, %v6113_v54 }
 0x179   : > { %2396 = vmatmul.f32.vlgmr.msrb.gmra.mxu0 %v6841_v48  ;;  %v1787_v16 = vpop.f32.mrf.mxu3  ;;  %v2641_v18 = vand.u32 4294901760, %v2640_v0  ;;  %2636 = vmatpush.msra.mxu1 %v2635_v33 }
 0x17a   : > { %v7035_v5 = vpop.f32.mrf.mxu1  ;;  %v1722_v37 = vpop.f32.mrf.mxu2  ;;  %2765 = vmatpush.msrb.mxu0 %v2621_v44  ;;  %v6114_v44 = vld [vmem:[%s8514_s1 + $0x120] sm:$0xff]  ;;  %2845 = vmatpush.msrb.mxu2 %v7049_v49 }
 0x17b   : > { %8542 = vst [vmem:[#allocation9_spill] sm:$0xff] %v7035_v5  ;;  %v1723_v21 = vadd.f32 %v6086_v57, %v1722_v37  ;;  %2642 = vmatpush.msra.mxu1 %v2641_v18  ;;  %v7061_v18 = vsub.f32 %v6113_v54, %v7049_v49  ;;  %v6110_v37 = vld [vmem:[%s8515_s2 + $0x100] sm:$0xff] }
 0x17c   : > { %2769 = vmatpush.msrb.mxu0 %v2627_v25  ;;  %v6087_v25 = vld [vmem:[%s8515_s2 + $0xa8] sm:$0xff] }
 0x17d   : > { %2438 = vmatmul.f32.vlgmr.msrb.gmra.mxu1 %v6863_v11  ;;  %v7041_v45 = vadd.f32 %v1787_v16, %v1723_v21  ;;  %v6112_v11 = vld [vmem:[%s8515_s2 + $0x110] sm:$0xff]  ;;  %v8517_v57 = vand.u32 4294901760, %v7061_v18 }
 0x17e   : > { %v7037_v48 = vpop.f32.mrf.mxu0  ;;  %2530 = vmatmul.f32.gmra.mxu3 %v6865_v59  ;;  %2773 = vmatpush.msrb.mxu0 %v2633_v23  ;;  %v7064_v23 = vand.u32 4294901760, %v6112_v11 }
 0x17f   : > { %8543 = vst [vmem:[#allocation10_spill] sm:$0xff] %v7037_v48  ;;  %2493 = vmatmul.f32.gmra.mxu2 %v6865_v59  ;;  %2808 = vmatpush.msrb.mxu1 %v6992_v24  ;;  %v2543_v59 = vsel %vm269_vm0, %v6114_v44, 0  ;;  %v6111_v24 = vld [vmem:[%s8515_s2 + $0x108] sm:$0xff] }
 0x180   : > { %2777 = vmatpush.msrb.mxu0 %v2639_v28  ;;  %v7075_v27 = vsub.f32 %v6112_v11, %v7064_v23  ;;  %2847 = vmatpush.msrb.mxu2 %v7064_v23  ;;  %v7078_v33 = vand.u32 4294901760, %v6111_v24  ;;  %v2900_v28 = vsub.f32 %v7061_v18, %v8517_v57  ;;  %v7100_v11 = vand.u32 4294901760, %v6110_v37 }
 0x181   : > { %2401 = vmatmul.f32.gmra.mxu0 %v6894_v40  ;;  %v1791_v16 = vpop.f32.mrf.mxu3  ;;  %2810 = vmatpush.msrb.mxu1 %v7001_v31  ;;  %v7084_v31 = vand.u32 4294901760, %v2543_v59 }
 0x182   : > { %v7071_v40 = vpop.f32.mrf.mxu1  ;;  %v1730_v62 = vpop.f32.mrf.mxu2  ;;  %v8518_v21 = vand.u32 4294901760, %v7075_v27  ;;  %v7091_v54 = vsub.f32 %v6111_v24, %v7078_v33  ;;  %2849 = vmatpush.msrb.mxu2 %v7078_v33 }
 0x183   : > { %8544 = vst [vmem:[#allocation11_spill] sm:$0xff] %v7071_v40  ;;  %v1731_v0 = vadd.f32 %v6087_v25, %v1730_v62  ;;  %2812 = vmatpush.msrb.mxu1 %v7009_v46  ;;  %v6115_v25 = vld [vmem:[%s8514_s1 + $0x128] sm:$0xff]  ;;  %v2901_v62 = vand.u32 4294901760, %v2900_v28  ;;  %v6088_v28 = vld [vmem:[%s8515_s2 + $0xb0] sm:$0xff]  ;;  %v7119_v57 = vsub.f32 %v2543_v59, %v7084_v31 }
 0x184   : > { %v2906_v24 = vsub.f32 %v7075_v27, %v8518_v21  ;;  %2851 = vmatpush.msrb.mxu2 %v7100_v11 }
 0x185   : > { %2444 = vmatmul.f32.gmra.mxu1 %v6903_v19  ;;  %v7098_v46 = vadd.f32 %v1791_v16, %v1731_v0  ;;  %v8519_v19 = vand.u32 4294901760, %v7091_v54  ;;  %v7112_v16 = vsub.f32 %v6110_v37, %v7100_v11  ;;  %2902 = vmatpush.msrb.mxu3 %v2901_v62  ;;  %v7130_v59 = vand.u32 4294901760, %v7119_v57 }
 0x186   : > { %v7094_v44 = vpop.f32.mrf.mxu0  ;;  %2534 = vmatmul.f32.gmra.mxu3 %v6905_v22  ;;  %2814 = vmatpush.msrb.mxu1 %v7017_v63  ;;  %v2907_v21 = vand.u32 4294901760, %v2906_v24  ;;  %v2546_v63 = vsel %vm269_vm0, %v6115_v25, 0 }
 0x187   : > { %8545 = vst [vmem:[#allocation12_spill] sm:$0xff] %v7094_v44  ;;  %2497 = vmatmul.f32.gmra.mxu2 %v6905_v22  ;;  %v2912_v22 = vsub.f32 %v7091_v54, %v8519_v19  ;;  %v8520_v37 = vand.u32 4294901760, %v7112_v16  ;;  %v7132_v62 = vand.u32 4294901760, %v2546_v63 }
 0x188   : > { %2908 = vmatpush.msrb.mxu3 %v2907_v21 }
 0x189   : > { %2406 = vmatmul.f32.gmra.mxu0 %v6920_v10  ;;  %v1795_v0 = vpop.f32.mrf.mxu3  ;;  %v2913_v61 = vand.u32 4294901760, %v2912_v22  ;;  %v2918_v25 = vsub.f32 %v7112_v16, %v8520_v37  ;;  %v6089_v22 = vld [vmem:[%s8515_s2 + $0xb8] sm:$0xff] }
 0x18a   : > { %v7127_v10 = vpop.f32.mrf.mxu1  ;;  %v1738_v5 = vpop.f32.mrf.mxu2 }
 0x18b   : > { %8546 = vst [vmem:[#allocation13_spill] sm:$0xff] %v7127_v10  ;;  %v1739_v40 = vadd.f32 %v6088_v28, %v1738_v5  ;;  %v6116_v5 = vld [vmem:[%s8514_s1 + $0x130] sm:$0xff]  ;;  %2914 = vmatpush.msrb.mxu3 %v2913_v61  ;;  %v2919_v21 = vand.u32 4294901760, %v2918_v25 }
 0x18d   : > { %2450 = vmatmul.f32.gmra.mxu1 %v6930_v47  ;;  %v7141_v19 = vadd.f32 %v1795_v0, %v1739_v40  ;;  %v2577_v47 = vsub.f32 %v7119_v57, %v7130_v59  ;;  %v7154_v40 = vsub.f32 %v2546_v63, %v7132_v62  ;;  %2920 = vmatpush.msrb.mxu3 %v2919_v21  ;;  %v2549_v0 = vsel %vm269_vm0, %v6116_v5, 0  ;;  %v6117_v5 = vld [vmem:[%s8514_s1 + $0x138] sm:$0xff] }
 0x18e   : > { %v7137_v24 = vpop.f32.mrf.mxu0  ;;  %2538 = vmatmul.f32.gmra.mxu3 %v6932_v42  ;;  %v7164_v10 = vand.u32 4294901760, %v2549_v0 }
 0x18f   : > { %2501 = vmatmul.f32.gmra.mxu2 %v6932_v42  ;;  %v7159_v37 = vand.u32 4294901760, %v2577_v47 }
 0x190   : > { %v7180_v47 = vsub.f32 %v2549_v0, %v7164_v10 }
 0x191   : > { %2411 = vmatmul.f32.gmra.mxu0 %v6947_v58  ;;  %v1799_v28 = vpop.f32.mrf.mxu3  ;;  %v7162_v58 = vand.u32 4294901760, %v7154_v40 }
 0x192   : > { %v7157_v61 = vpop.f32.mrf.mxu1  ;;  %v1746_v25 = vpop.f32.mrf.mxu2 }
 0x193   : > { %8547 = vst [vmem:[#allocation14_spill] sm:$0xff] %v7157_v61  ;;  %v1747_v42 = vadd.f32 %v6089_v22, %v1746_v25  ;;  %v2552_v25 = vsel %vm269_vm0, %v6117_v5, 0 }
 0x194   : > { %v7196_v5 = vand.u32 4294901760, %v2552_v25 }
 0x195   : > { %2456 = vmatmul.f32.gmra.mxu1 %v6952_v4  ;;  %v7168_v63 = vadd.f32 %v1799_v28, %v1747_v42  ;;  %v2585_v4 = vsub.f32 %v7154_v40, %v7162_v58  ;;  %v8548_v28 = vand.u32 4294901760, %v7061_v18  ;;  %v8549_v42 = vand.u32 4294901760, %v7075_v27 }
 0x196   : > { %v1829_v48 = vpop.f32.mrf.mxu0  ;;  %2728 = vmatmul.f32.vlgmr.msra.gmra.mxu3 %v7130_v59 }
 0x197   : > { %3086 = vmatpush.msra.mxu3 %v7049_v49  ;;  %v1830_v21 = vadd.f32 %v1829_v48, %v7041_v45  ;;  %2686 = vmatmul.f32.vlgmr.msra.gmra.mxu2 %v7119_v57  ;;  %v7191_v0 = vand.u32 4294901760, %v2585_v4 }
 0x198   : > { %3043 = vmatpush.msra.mxu2 %v8548_v28  ;;  %v7194_v28 = vand.u32 4294901760, %v7180_v47 }
 0x199   : > { %2579 = vmatmul.f32.vlgmr.msra.gmra.mxu0 %v7159_v37  ;;  %v1959_v22 = vpop.f32.mrf.mxu3  ;;  %3088 = vmatpush.msra.mxu3 %v7064_v23 }
 0x19a   : > { %2952 = vmatpush.msra.mxu0 %v7061_v18  ;;  %v1871_v48 = vpop.f32.mrf.mxu1  ;;  %v1922_v45 = vpop.f32.mrf.mxu2  ;;  %3047 = vmatpush.msra.mxu2 %v8549_v42  ;;  %v8550_v18 = vand.u32 4294901760, %v7091_v54  ;;  %v2593_v4 = vsub.f32 %v7180_v47, %v7194_v28 }
 0x19b   : > { %v1872_v56 = vadd.f32 %v1871_v48, %v1830_v21  ;;  %3090 = vmatpush.msra.mxu3 %v7078_v33  ;;  %v7213_v48 = vsub.f32 %v2552_v25, %v7196_v5 }
 0x19c   : > { %2955 = vmatpush.msra.mxu0 %v7075_v27  ;;  %3051 = vmatpush.msra.mxu2 %v8550_v18 }
 0x19d   : > { %v1923_v61 = vadd.f32 %v1922_v45, %v1872_v56  ;;  %2644 = vmatmul.f32.vlgmr.msra.gmra.mxu1 %v7084_v31  ;;  %3092 = vmatpush.msra.mxu3 %v7100_v11 }
 0x19e   : > { %v1834_v44 = vpop.f32.mrf.mxu0  ;;  %2734 = vmatmul.f32.gmra.mxu3 %v7162_v58  ;;  %2958 = vmatpush.msra.mxu0 %v7091_v54  ;;  %v8551_v54 = vand.u32 4294901760, %v7112_v16 }
 0x19f   : > { %v7204_v27 = vadd.f32 %v1959_v22, %v1923_v61  ;;  %v1835_v21 = vadd.f32 %v1834_v44, %v7098_v46  ;;  %2691 = vmatmul.f32.gmra.mxu2 %v7154_v40  ;;  %2996 = vmatpush.msra.mxu1 %v7049_v49  ;;  %v7220_v49 = vand.u32 4294901760, %v2593_v4  ;;  %v7223_v22 = vand.u32 4294901760, %v7213_v48 }
 0x1a0   : > { %3055 = vmatpush.msra.mxu2 %v8551_v54  ;;  %2961 = vmatpush.msra.mxu0 %v7112_v16 }
 0x1a1   : > { %2587 = vmatmul.f32.gmra.mxu0 %v7191_v0  ;;  %v1963_v56 = vpop.f32.mrf.mxu3  ;;  %2998 = vmatpush.msra.mxu1 %v7064_v23  ;;  %v521_v23 = vadd.f32 %v6621_v6, %v6528_v12  ;;  %v2601_v18 = vsub.f32 %v7213_v48, %v7223_v22  ;;  %v513_v12 = vadd.f32 %v6538_v30, %v6485_v26 }
 0x1a2   : > { %v1877_v44 = vpop.f32.mrf.mxu1  ;;  %v1926_v46 = vpop.f32.mrf.mxu2 }
 0x1a3   : > { %v1878_v61 = vadd.f32 %v1877_v44, %v1835_v21  ;;  %3000 = vmatpush.msra.mxu1 %v7078_v33  ;;  %v517_v21 = vadd.f32 %v6563_v20, %v6498_v51  ;;  %v509_v44 = vadd.f32 %v6521_v3, %v6480_v38 }
 0x1a5   : > { %v1927_v45 = vadd.f32 %v1926_v46, %v1878_v61  ;;  %2648 = vmatmul.f32.gmra.mxu1 %v7132_v62  ;;  %v554_v6 = vadd.f32 %v6602_v53, %v517_v21  ;;  %v550_v46 = vadd.f32 %v6555_v41, %v513_v12  ;;  %v546_v26 = vadd.f32 %v6536_v32, %v509_v44 }
 0x1a6   : > { %v1839_v25 = vpop.f32.mrf.mxu0  ;;  %2740 = vmatmul.f32.gmra.mxu3 %v7194_v28  ;;  %3002 = vmatpush.msra.mxu1 %v7100_v11  ;;  %v558_v11 = vadd.f32 %v6649_v29, %v521_v23 }
 0x1a7   : > { %v7230_v16 = vadd.f32 %v1963_v56, %v1927_v45  ;;  %v1840_v33 = vadd.f32 %v1839_v25, %v7141_v19  ;;  %2696 = vmatmul.f32.gmra.mxu2 %v7180_v47  ;;  %v7243_v56 = vand.u32 4294901760, %v2601_v18  ;;  %v7253_v30 = vand.u32 4294901760, %v554_v6 }
 0x1a8   : > { %v7248_v61 = vand.u32 4294901760, %v558_v11  ;;  %v7260_v3 = vand.u32 4294901760, %v550_v46  ;;  %v7265_v23 = vand.u32 4294901760, %v546_v26 }
 0x1a9   : > { %2595 = vmatmul.f32.gmra.mxu0 %v7220_v49  ;;  %v1967_v42 = vpop.f32.mrf.mxu3  ;;  %v7268_v32 = vsub.f32 %v554_v6, %v7253_v30 }
 0x1aa   : > { %v1883_v4 = vpop.f32.mrf.mxu1  ;;  %v1930_v54 = vpop.f32.mrf.mxu2  ;;  %v7263_v41 = vsub.f32 %v558_v11, %v7248_v61  ;;  %v7278_v11 = vsub.f32 %v546_v26, %v7265_v23 }
 0x1ab   : > { %v1884_v19 = vadd.f32 %v1883_v4, %v1840_v33 }
 0x1ad   : > { %v1931_v51 = vadd.f32 %v1930_v54, %v1884_v19  ;;  %2652 = vmatmul.f32.gmra.mxu1 %v7164_v10  ;;  %v8523_v54 = vand.u32 4294901760, %v7268_v32 }
 0x1ae   : > { %v1844_v20 = vpop.f32.mrf.mxu0  ;;  %2746 = vmatmul.f32.gmra.mxu3 %v7223_v22 }
 0x1af   : > { %v7255_v53 = vadd.f32 %v1967_v42, %v1931_v51  ;;  %v1845_v29 = vadd.f32 %v1844_v20, %v7168_v63  ;;  %2701 = vmatmul.f32.gmra.mxu2 %v7213_v48  ;;  %v7271_v63 = vsub.f32 %v550_v46, %v7260_v3  ;;  %v8524_v42 = vand.u32 4294901760, %v7263_v41 }
 0x1b0   : > { %v3196_v51 = vsub.f32 %v7268_v32, %v8523_v54  ;;  %v8521_v20 = vand.u32 4294901760, %v7278_v11 }
 0x1b1   : > { %2603 = vmatmul.f32.gmra.mxu0 %v7243_v56  ;;  %v1971_v38 = vpop.f32.mrf.mxu3  ;;  %v3190_v6 = vsub.f32 %v7263_v41, %v8524_v42  ;;  %v8522_v19 = vand.u32 4294901760, %v7271_v63 }
 0x1b2   : > { %v1889_v45 = vpop.f32.mrf.mxu1  ;;  %v1934_v25 = vpop.f32.mrf.mxu2 }
 0x1b3   : > { %v1890_v33 = vadd.f32 %v1889_v45, %v1845_v29  ;;  %v3202_v45 = vsub.f32 %v7271_v63, %v8522_v19 }
 0x1b5   : > { %v1935_v18 = vadd.f32 %v1934_v25, %v1890_v33  ;;  %2656 = vmatmul.f32.gmra.mxu1 %v7196_v5  ;;  %v3197_v25 = vand.u32 4294901760, %v3196_v51  ;;  %v3208_v33 = vsub.f32 %v7278_v11, %v8521_v20 }
 0x1b6   : > { %v2012_v21 = vpop.f32.mrf.mxu0  ;;  %2922 = vmatmul.f32.vlgmr.msrb.gmra.mxu3 %v7084_v31 }
 0x1b7   : > { %3286 = vmatpush.msrb.mxu3 %v7248_v61  ;;  %v7280_v4 = vadd.f32 %v1971_v38, %v1935_v18  ;;  %2857 = vmatmul.f32.vlgmr.msrb.gmra.mxu2 %v7159_v37  ;;  %v3191_v38 = vand.u32 4294901760, %v3190_v6  ;;  %v3203_v6 = vand.u32 4294901760, %v3202_v45  ;;  %v3209_v51 = vand.u32 4294901760, %v3208_v33 }
 0x1b8   : > { %3242 = vmatpush.msrb.mxu2 %v7263_v41 }
 0x1b9   : > { %2779 = vmatmul.f32.vlgmr.msrb.gmra.mxu0 %v7084_v31  ;;  %v2161_v12 = vpop.f32.mrf.mxu3  ;;  %3288 = vmatpush.msrb.mxu3 %v7253_v30 }
 0x1ba   : > { %3135 = vmatpush.msrb.mxu0 %v7248_v61  ;;  %3245 = vmatpush.msrb.mxu2 %v7268_v32  ;;  %v2077_v37 = vpop.f32.mrf.mxu1  ;;  %v2119_v44 = vpop.f32.mrf.mxu2 }
 0x1bb   : > { %3290 = vmatpush.msrb.mxu3 %v7260_v3  ;;  %v2078_v46 = vadd.f32 %v2077_v37, %v2012_v21 }
 0x1bc   : > { %3137 = vmatpush.msrb.mxu0 %v7253_v30  ;;  %3248 = vmatpush.msrb.mxu2 %v7271_v63 }
 0x1bd   : > { %v2120_v26 = vadd.f32 %v2119_v44, %v2078_v46  ;;  %3292 = vmatpush.msrb.mxu3 %v7265_v23  ;;  %2816 = vmatmul.f32.vlgmr.msrb.gmra.mxu1 %v7084_v31 }
 0x1be   : > { %3139 = vmatpush.msrb.mxu0 %v7260_v3  ;;  %v2020_v29 = vpop.f32.mrf.mxu0  ;;  %2926 = vmatmul.f32.gmra.mxu3 %v7132_v62 }
 0x1bf   : > { %3192 = vmatpush.msrb.mxu1 %v3191_v38  ;;  %v7311_v18 = vadd.f32 %v2161_v12, %v2120_v26  ;;  %3251 = vmatpush.msrb.mxu2 %v7278_v11  ;;  %v7317_v38 = vand.u32 4294901760, %v6725_v7 }
 0x1c0   : > { %3141 = vmatpush.msrb.mxu0 %v7265_v23  ;;  %2865 = vmatmul.f32.gmra.mxu2 %v7191_v0  ;;  %v7324_v0 = vand.u32 4294901760, %v6719_v2 }
 0x1c1   : > { %2783 = vmatmul.f32.gmra.mxu0 %v7132_v62  ;;  %v2167_v21 = vpop.f32.mrf.mxu3  ;;  %3198 = vmatpush.msrb.mxu1 %v3197_v25  ;;  %v7333_v25 = vand.u32 4294901760, %v6711_v8 }
 0x1c2   : > { %v2081_v37 = vpop.f32.mrf.mxu1  ;;  %v2124_v44 = vpop.f32.mrf.mxu2 }
 0x1c3   : > { %3204 = vmatpush.msrb.mxu1 %v3203_v6  ;;  %v2082_v46 = vadd.f32 %v2081_v37, %v2020_v29  ;;  %v7329_v29 = vsub.f32 %v6725_v7, %v7317_v38 }
 0x1c5   : > { %v2125_v20 = vadd.f32 %v2124_v44, %v2082_v46  ;;  %3210 = vmatpush.msrb.mxu1 %v3209_v51  ;;  %v3467_v7 = vand.u32 4294901760, %v7329_v29 }
 0x1c6   : > { %v2028_v12 = vpop.f32.mrf.mxu0  ;;  %2820 = vmatmul.f32.gmra.mxu1 %v7132_v62  ;;  %2930 = vmatmul.f32.gmra.mxu3 %v7164_v10 }
 0x1c7   : > { %v7321_v26 = vadd.f32 %v2167_v21, %v2125_v20  ;;  %v7336_v20 = vand.u32 4294901760, %v6691_v14  ;;  %v7340_v21 = vsub.f32 %v6719_v2, %v7324_v0 }
 0x1c8   : > { %2873 = vmatmul.f32.gmra.mxu2 %v7220_v49  ;;  %v7345_v49 = vsub.f32 %v6711_v8, %v7333_v25  ;;  %v3468_v8 = vsub.f32 %v7329_v29, %v3467_v7 }
 0x1c9   : > { %2787 = vmatmul.f32.gmra.mxu0 %v7164_v10  ;;  %v2173_v45 = vpop.f32.mrf.mxu3 }
 0x1ca   : > { %v2085_v33 = vpop.f32.mrf.mxu1  ;;  %v2129_v6 = vpop.f32.mrf.mxu2 }
 0x1cb   : > { %v2086_v37 = vadd.f32 %v2085_v33, %v2028_v12  ;;  %v7353_v12 = vsub.f32 %v6691_v14, %v7336_v20  ;;  %v8525_v33 = vand.u32 4294901760, %v7340_v21 }
 0x1cd   : > { %v2130_v44 = vadd.f32 %v2129_v6, %v2086_v37  ;;  %v3474_v14 = vsub.f32 %v7340_v21, %v8525_v33  ;;  %v8526_v19 = vand.u32 4294901760, %v7353_v12 }
 0x1ce   : > { %v2036_v46 = vpop.f32.mrf.mxu0  ;;  %2824 = vmatmul.f32.gmra.mxu1 %v7164_v10  ;;  %2934 = vmatmul.f32.gmra.mxu3 %v7196_v5 }
 0x1cf   : > { %v7349_v51 = vadd.f32 %v2173_v45, %v2130_v44  ;;  %v3479_v45 = vand.u32 4294901760, %v7345_v49 }
 0x1d0   : > { %2881 = vmatmul.f32.gmra.mxu2 %v7243_v56 }
 0x1d1   : > { %8552 = vst [vmem:[#allocation15_spill] sm:$0xff] %v7349_v51  ;;  %2791 = vmatmul.f32.gmra.mxu0 %v7196_v5  ;;  %v2179_v2 = vpop.f32.mrf.mxu3  ;;  %v3469_v51 = vand.u32 4294901760, %v3468_v8  ;;  %v3480_v56 = vsub.f32 %v7345_v49, %v3479_v45  ;;  %v3486_v8 = vsub.f32 %v7353_v12, %v8526_v19 }
 0x1d2   : > { %v2089_v6 = vpop.f32.mrf.mxu1  ;;  %v2134_v37 = vpop.f32.mrf.mxu2 }
 0x1d3   : > { %v2090_v44 = vadd.f32 %v2089_v6, %v2036_v46  ;;  %v3475_v6 = vand.u32 4294901760, %v3474_v14  ;;  %v3487_v19 = vand.u32 4294901760, %v3486_v8 }
 0x1d5   : > { %v2135_v54 = vadd.f32 %v2134_v37, %v2090_v44  ;;  %v6102_v37 = vld [vmem:[%s8515_s2 + $0xe0] sm:$0xff]  ;;  %v8553_v44 = vand.u32 4294901760, %v7263_v41 }
 0x1d6   : > { %v7366_v42 = vpop.f32.mrf.mxu0  ;;  %2828 = vmatmul.f32.gmra.mxu1 %v7196_v5  ;;  %3094 = vmatmul.f32.vlgmr.msra.gmra.mxu3 %v7084_v31 }
 0x1d7   : > { %3470 = vmatpush.msra.mxu3 %v3469_v51  ;;  %v7373_v46 = vadd.f32 %v2179_v2, %v2135_v54  ;;  %v3481_v54 = vand.u32 4294901760, %v3480_v56  ;;  %v8554_v2 = vand.u32 4294901760, %v7268_v32  ;;  %v1077_v56 = vadd.f32 %v6773_v36, %v6732_v9 }
 0x1d8   : > { %3057 = vmatmul.f32.vlgmr.msra.gmra.mxu2 %v7084_v31  ;;  %v8555_v31 = vand.u32 4294901760, %v7271_v63 }
 0x1d9   : > { %2964 = vmatmul.f32.vlgmr.msra.gmra.mxu0 %v7119_v57  ;;  %v2355_v33 = vpop.f32.mrf.mxu3  ;;  %3413 = vmatpush.msra.mxu2 %v7317_v38  ;;  %v1114_v32 = vadd.f32 %v6788_v17, %v1077_v56 }
 0x1da   : > { %3333 = vmatpush.msra.mxu0 %v8553_v44  ;;  %3476 = vmatpush.msra.mxu3 %v3475_v6  ;;  %v7386_v57 = vpop.f32.mrf.mxu1  ;;  %v2290_v51 = vpop.f32.mrf.mxu2  ;;  %v8556_v6 = vand.u32 4294901760, %v7278_v11 }
 0x1db   : > { %v2291_v14 = vadd.f32 %v6102_v37, %v2290_v51  ;;  %3415 = vmatpush.msra.mxu2 %v7324_v0  ;;  %v6103_v37 = vld [vmem:[%s8515_s2 + $0xe8] sm:$0xff] }
 0x1dc   : > { %3337 = vmatpush.msra.mxu0 %v8554_v2  ;;  %3482 = vmatpush.msra.mxu3 %v3481_v54 }
 0x1dd   : > { %v2356_v44 = vadd.f32 %v2355_v33, %v2291_v14  ;;  %3417 = vmatpush.msra.mxu2 %v7333_v25 }
 0x1de   : > { %3341 = vmatpush.msra.mxu0 %v8555_v31  ;;  %v7393_v41 = vpop.f32.mrf.mxu0  ;;  %3488 = vmatpush.msra.mxu3 %v3487_v19 }
 0x1df   : > { %3006 = vmatmul.f32.vlgmr.msra.gmra.mxu1 %v7130_v59  ;;  %3098 = vmatmul.f32.gmra.mxu3 %v7132_v62  ;;  %v3111_v59 = vsel %vm269_vm0, %v1114_v32, 0 }
 0x1e0   : > { %3345 = vmatpush.msra.mxu0 %v8556_v6  ;;  %3376 = vmatpush.msra.mxu1 %v7248_v61  ;;  %v7415_v61 = vand.u32 4294901760, %v3111_v59 }
 0x1e1   : > { %v2359_v63 = vpop.f32.mrf.mxu3  ;;  %3419 = vmatpush.msra.mxu2 %v7336_v20  ;;  %2969 = vmatmul.f32.gmra.mxu0 %v7154_v40  ;;  %v1081_v40 = vadd.f32 %v6790_v50, %v6737_v1 }
 0x1e2   : > { %3061 = vmatmul.f32.gmra.mxu2 %v7132_v62  ;;  %3378 = vmatpush.msra.mxu1 %v7253_v30  ;;  %v7408_v9 = vpop.f32.mrf.mxu1  ;;  %v2298_v36 = vpop.f32.mrf.mxu2  ;;  %v7429_v11 = vsub.f32 %v3111_v59, %v7415_v61 }
 0x1e3   : > { %v1118_v30 = vadd.f32 %v6807_v43, %v1081_v40 }
 0x1e4   : > { %3380 = vmatpush.msra.mxu1 %v7260_v3  ;;  %v7439_v43 = vand.u32 4294901760, %v7429_v11 }
 0x1e5   : > { %v3114_v1 = vsel %vm269_vm0, %v1118_v30, 0 }
 0x1e6   : > { %v7412_v17 = vpop.f32.mrf.mxu0  ;;  %3382 = vmatpush.msra.mxu1 %v7265_v23 }
 0x1e7   : > { %3012 = vmatmul.f32.gmra.mxu1 %v7162_v58  ;;  %3102 = vmatmul.f32.gmra.mxu3 %v7164_v10  ;;  %v1085_v58 = vadd.f32 %v6815_v13, %v6750_v15  ;;  %v3145_v13 = vsub.f32 %v7429_v11, %v7439_v43 }
 0x1e9   : > { %v7421_v62 = vpop.f32.mrf.mxu3  ;;  %2974 = vmatmul.f32.gmra.mxu0 %v7180_v47  ;;  %v1122_v19 = vadd.f32 %v6854_v35, %v1085_v58  ;;  %v7465_v51 = vand.u32 4294901760, %v3145_v13 }
 0x1ea   : > { %3065 = vmatmul.f32.gmra.mxu2 %v7164_v10  ;;  %v7426_v3 = vpop.f32.mrf.mxu1  ;;  %v2306_v23 = vpop.f32.mrf.mxu2  ;;  %v7441_v10 = vand.u32 4294901760, %v3114_v1 }
 0x1eb   : > { %v3117_v35 = vsel %vm269_vm0, %v1122_v19, 0 }
 0x1ec   : > { %v7467_v2 = vand.u32 4294901760, %v3117_v35 }
 0x1ee   : > { %v7432_v50 = vpop.f32.mrf.mxu0  ;;  %v7481_v32 = vsub.f32 %v3117_v35, %v7467_v2 }
 0x1ef   : > { %3018 = vmatmul.f32.gmra.mxu1 %v7194_v28  ;;  %3106 = vmatmul.f32.gmra.mxu3 %v7196_v5  ;;  %v7455_v28 = vsub.f32 %v3114_v1, %v7441_v10 }
 0x1f0   : > { %v7506_v19 = vand.u32 4294901760, %v7481_v32 }
 0x1f1   : > { %v7443_v47 = vpop.f32.mrf.mxu3  ;;  %2979 = vmatmul.f32.gmra.mxu0 %v7213_v48  ;;  %v2299_v48 = vadd.f32 %v6103_v37, %v2298_v36  ;;  %v7471_v31 = vand.u32 4294901760, %v7455_v28 }
 0x1f2   : > { %3069 = vmatmul.f32.gmra.mxu2 %v7196_v5  ;;  %v7448_v33 = vpop.f32.mrf.mxu1  ;;  %v7450_v15 = vpop.f32.mrf.mxu2  ;;  %v1089_v5 = vadd.f32 %v6873_v52, %v6780_v60 }
 0x1f3   : > { %v3153_v6 = vsub.f32 %v7455_v28, %v7471_v31 }
 0x1f4   : > { %v1126_v56 = vadd.f32 %v6898_v39, %v1089_v5  ;;  %v6104_v39 = vld [vmem:[%s8515_s2 + $0xf0] sm:$0xff] }
 0x1f5   : > { %v2307_v59 = vadd.f32 %v6104_v39, %v2306_v23  ;;  %v8560_v39 = vld [vmem:[#allocation14_spill] sm:$0xff] }
 0x1f6   : > { %v2397_v8 = vpop.f32.mrf.mxu0  ;;  %v3120_v36 = vsel %vm269_vm0, %v1126_v56, 0 }
 0x1f7   : > { %v2398_v54 = vadd.f32 %v2397_v8, %v2356_v44  ;;  %3024 = vmatmul.f32.gmra.mxu1 %v7223_v22  ;;  %3296 = vmatmul.f32.vlgmr.msrb.gmra.mxu3 %v7439_v43  ;;  %v2360_v44 = vadd.f32 %v2359_v63, %v2299_v48  ;;  %v7499_v1 = vand.u32 4294901760, %v3120_v36  ;;  %v2364_v37 = vadd.f32 %v7421_v62, %v2307_v59  ;;  %v8563_v59 = vld [vmem:[#allocation13_spill] sm:$0xff] }
 0x1f8   : > { %3654 = vmatpush.msrb.mxu3 %v7317_v38 }
 0x1f9   : > { %v2527_v14 = vpop.f32.mrf.mxu3  ;;  %3147 = vmatmul.f32.vlgmr.msrb.gmra.mxu0 %v7465_v51  ;;  %v7517_v35 = vsub.f32 %v3120_v36, %v7499_v1 }
 0x1fa   : > { %3254 = vmatmul.f32.vlgmr.msrb.gmra.mxu2 %v7429_v11  ;;  %3520 = vmatpush.msrb.mxu0 %v7329_v29  ;;  %v2439_v60 = vpop.f32.mrf.mxu1  ;;  %v2490_v52 = vpop.f32.mrf.mxu2  ;;  %v8557_v29 = vand.u32 4294901760, %v7340_v21 }
 0x1fb   : > { %3611 = vmatpush.msrb.mxu2 %v3467_v7  ;;  %3656 = vmatpush.msrb.mxu3 %v7324_v0  ;;  %v2440_v22 = vadd.f32 %v2439_v60, %v2398_v54  ;;  %v7534_v56 = vand.u32 4294901760, %v7517_v35 }
 0x1fc   : > { %3523 = vmatpush.msrb.mxu0 %v7340_v21  ;;  %v7503_v21 = vand.u32 4294901760, %v3153_v6 }
 0x1fd   : > { %3615 = vmatpush.msrb.mxu2 %v8557_v29  ;;  %3658 = vmatpush.msrb.mxu3 %v7333_v25  ;;  %v2491_v7 = vadd.f32 %v2490_v52, %v2440_v22  ;;  %v8559_v22 = vld [vmem:[#allocation12_spill] sm:$0xff]  ;;  %v3169_v36 = vsub.f32 %v7517_v35, %v7534_v56 }
 0x1fe   : > { %v2402_v63 = vpop.f32.mrf.mxu0  ;;  %3526 = vmatpush.msrb.mxu0 %v7345_v49  ;;  %v8558_v49 = vand.u32 4294901760, %v7353_v12 }
 0x1ff   : > { %3619 = vmatpush.msrb.mxu2 %v3479_v45  ;;  %3660 = vmatpush.msrb.mxu3 %v7336_v20  ;;  %v2403_v40 = vadd.f32 %v2402_v63, %v2360_v44  ;;  %v7497_v30 = vadd.f32 %v2527_v14, %v2491_v7  ;;  %v1653_v44 = vadd.f32 %v8559_v22, %v6997_v55 }
 0x200   : > { %3212 = vmatmul.f32.vlgmr.msrb.gmra.mxu1 %v7415_v61  ;;  %3302 = vmatmul.f32.gmra.mxu3 %v7471_v31 }
 0x201   : > { %v2531_v58 = vpop.f32.mrf.mxu3  ;;  %3529 = vmatpush.msrb.mxu0 %v7353_v12  ;;  %3564 = vmatpush.msrb.mxu1 %v7317_v38  ;;  %v6105_v38 = vld [vmem:[%s8515_s2 + $0xf8] sm:$0xff]  ;;  %v3161_v12 = vsub.f32 %v7481_v32, %v7506_v19 }
 0x202   : > { %3623 = vmatpush.msrb.mxu2 %v8558_v49  ;;  %3155 = vmatmul.f32.gmra.mxu0 %v7503_v21  ;;  %v2445_v45 = vpop.f32.mrf.mxu1  ;;  %v2494_v23 = vpop.f32.mrf.mxu2  ;;  %v2315_v48 = vadd.f32 %v6105_v38, %v7450_v15  ;;  %v7558_v38 = vand.u32 4294901760, %v3169_v36 }
 0x203   : > { %3259 = vmatmul.f32.gmra.mxu2 %v7455_v28  ;;  %3566 = vmatpush.msrb.mxu1 %v7324_v0  ;;  %v2446_v13 = vadd.f32 %v2445_v45, %v2403_v40  ;;  %v7531_v54 = vand.u32 4294901760, %v3161_v12  ;;  %v1690_v40 = vadd.f32 %v8563_v59, %v1653_v44  ;;  %v8565_v45 = vld [vmem:[#allocation6_spill] sm:$0xff] }
 0x204   : > { %v2368_v52 = vadd.f32 %v7443_v47, %v2315_v48  ;;  %v8566_v47 = vld [vmem:[#allocation8_spill] sm:$0xff] }
 0x205   : > { %3568 = vmatpush.msrb.mxu1 %v7333_v25  ;;  %v2495_v8 = vadd.f32 %v2494_v23, %v2446_v13  ;;  %v1657_v25 = vadd.f32 %v7137_v24, %v7027_v34  ;;  %v8561_v34 = vld [vmem:[#allocation7_spill] sm:$0xff]  ;;  %v8562_v24 = vld [vmem:[#allocation10_spill] sm:$0xff]  ;;  %v1645_v23 = vadd.f32 %v8566_v47, %v8565_v45  ;;  %v7561_v48 = vand.u32 4294901760, %v1690_v40 }
 0x206   : > { %v2407_v5 = vpop.f32.mrf.mxu0  ;;  %v1649_v63 = vadd.f32 %v8562_v24, %v8561_v34  ;;  %v8567_v13 = vld [vmem:[#allocation11_spill] sm:$0xff] }
 0x207   : > { %3570 = vmatpush.msrb.mxu1 %v7336_v20  ;;  %v2408_v0 = vadd.f32 %v2407_v5, %v2364_v37  ;;  %v7527_v62 = vadd.f32 %v2531_v58, %v2495_v8  ;;  %v1694_v6 = vadd.f32 %v8560_v39, %v1657_v25  ;;  %v8568_v8 = vld [vmem:[#allocation9_spill] sm:$0xff]  ;;  %v7573_v44 = vsub.f32 %v1690_v40, %v7561_v48 }
 0x208   : > { %3216 = vmatmul.f32.gmra.mxu1 %v7441_v10  ;;  %3308 = vmatmul.f32.gmra.mxu3 %v7506_v19  ;;  %v1686_v55 = vadd.f32 %v8567_v13, %v1649_v63  ;;  %v1682_v5 = vadd.f32 %v8568_v8, %v1645_v23 }
 0x209   : > { %v2535_v14 = vpop.f32.mrf.mxu3  ;;  %v7554_v37 = vand.u32 4294901760, %v1694_v6  ;;  %v8529_v63 = vand.u32 4294901760, %v7573_v44 }
 0x20a   : > { %3163 = vmatmul.f32.gmra.mxu0 %v7531_v54  ;;  %v2451_v15 = vpop.f32.mrf.mxu1  ;;  %v2498_v20 = vpop.f32.mrf.mxu2  ;;  %v7570_v22 = vand.u32 4294901760, %v1682_v5 }
 0x20b   : > { %3264 = vmatmul.f32.gmra.mxu2 %v7481_v32  ;;  %v2452_v60 = vadd.f32 %v2451_v15, %v2408_v0  ;;  %v7565_v15 = vand.u32 4294901760, %v1686_v55 }
 0x20d   : > { %v2499_v29 = vadd.f32 %v2498_v20, %v2452_v60  ;;  %v7568_v20 = vsub.f32 %v1694_v6, %v7554_v37  ;;  %v7578_v36 = vsub.f32 %v1686_v55, %v7565_v15 }
 0x20e   : > { %v2412_v7 = vpop.f32.mrf.mxu0 }
 0x20f   : > { %v2413_v58 = vadd.f32 %v2412_v7, %v2368_v52  ;;  %v7549_v49 = vadd.f32 %v2535_v14, %v2499_v29  ;;  %v8530_v29 = vand.u32 4294901760, %v7568_v20  ;;  %v7585_v7 = vsub.f32 %v1682_v5, %v7570_v22 }
 0x210   : > { %3220 = vmatmul.f32.gmra.mxu1 %v7467_v2  ;;  %3314 = vmatmul.f32.gmra.mxu3 %v7534_v56 }
 0x211   : > { %8564 = vst [vmem:[#allocation12_spill] sm:$0xff] %v7549_v49  ;;  %v2539_v12 = vpop.f32.mrf.mxu3  ;;  %v3758_v40 = vsub.f32 %v7568_v20, %v8530_v29  ;;  %v8527_v23 = vand.u32 4294901760, %v7585_v7 }
 0x212   : > { %3171 = vmatmul.f32.gmra.mxu0 %v7558_v38  ;;  %v2457_v0 = vpop.f32.mrf.mxu1  ;;  %v2502_v14 = vpop.f32.mrf.mxu2 }
 0x213   : > { %3269 = vmatmul.f32.gmra.mxu2 %v7517_v35  ;;  %v2458_v25 = vadd.f32 %v2457_v0, %v2413_v58  ;;  %v8528_v58 = vand.u32 4294901760, %v7578_v36  ;;  %v3759_v55 = vand.u32 4294901760, %v3758_v40 }
 0x215   : > { %v2503_v60 = vadd.f32 %v2502_v14, %v2458_v25  ;;  %v3770_v8 = vsub.f32 %v7578_v36, %v8528_v58  ;;  %v3776_v25 = vsub.f32 %v7585_v7, %v8527_v23 }
 0x216   : > { %v2580_v52 = vpop.f32.mrf.mxu0 }
 0x217   : > { %v7575_v39 = vadd.f32 %v2539_v12, %v2503_v60  ;;  %v3771_v60 = vand.u32 4294901760, %v3770_v8  ;;  %v7657_v8 = vand.u32 4294901760, %v7204_v27 }
 0x218   : > { %3224 = vmatmul.f32.gmra.mxu1 %v7499_v1  ;;  %3490 = vmatmul.f32.vlgmr.msra.gmra.mxu3 %v7415_v61 }
 0x219   : > { %8569 = vst [vmem:[#allocation14_spill] sm:$0xff] %v7575_v39  ;;  %v2729_v6 = vpop.f32.mrf.mxu3  ;;  %3854 = vmatpush.msra.mxu3 %v7554_v37 }
 0x21a   : > { %3347 = vmatmul.f32.vlgmr.msra.gmra.mxu0 %v7415_v61  ;;  %v2645_v34 = vpop.f32.mrf.mxu1  ;;  %v2687_v24 = vpop.f32.mrf.mxu2 }
 0x21b   : > { %3425 = vmatmul.f32.vlgmr.msra.gmra.mxu2 %v7465_v51  ;;  %3703 = vmatpush.msra.mxu0 %v7554_v37  ;;  %v2646_v59 = vadd.f32 %v2645_v34, %v2580_v52  ;;  %v3764_v51 = vsub.f32 %v7573_v44, %v8529_v63  ;;  %v7632_v34 = vand.u32 4294901760, %v7280_v4 }
 0x21c   : > { %3810 = vmatpush.msra.mxu2 %v7568_v20  ;;  %3856 = vmatpush.msra.mxu3 %v7561_v48 }
 0x21d   : > { %3705 = vmatpush.msra.mxu0 %v7561_v48  ;;  %v2688_v45 = vadd.f32 %v2687_v24, %v2646_v59  ;;  %v3765_v5 = vand.u32 4294901760, %v3764_v51  ;;  %v7652_v51 = vand.u32 4294901760, %v7230_v16 }
 0x21e   : > { %v7598_v47 = vpop.f32.mrf.mxu0  ;;  %3813 = vmatpush.msra.mxu2 %v7573_v44  ;;  %3858 = vmatpush.msra.mxu3 %v7565_v15 }
 0x21f   : > { %3707 = vmatpush.msra.mxu0 %v7565_v15  ;;  %v7607_v13 = vadd.f32 %v2729_v6, %v2688_v45  ;;  %v3777_v6 = vand.u32 4294901760, %v3776_v25  ;;  %v7648_v45 = vsub.f32 %v7280_v4, %v7632_v34  ;;  %v7668_v4 = vsub.f32 %v7230_v16, %v7652_v51 }
 0x220   : > { %3816 = vmatpush.msra.mxu2 %v7578_v36  ;;  %3860 = vmatpush.msra.mxu3 %v7570_v22 }
 0x221   : > { %v7611_v12 = vpop.f32.mrf.mxu3  ;;  %3384 = vmatmul.f32.vlgmr.msra.gmra.mxu1 %v7415_v61  ;;  %3494 = vmatmul.f32.gmra.mxu3 %v7441_v10  ;;  %v8533_v63 = vand.u32 4294901760, %v7668_v4 }
 0x222   : > { %3709 = vmatpush.msra.mxu0 %v7570_v22  ;;  %3760 = vmatpush.msra.mxu1 %v3759_v55  ;;  %v7619_v0 = vpop.f32.mrf.mxu1  ;;  %v7621_v14 = vpop.f32.mrf.mxu2 }
 0x223   : > { %3819 = vmatpush.msra.mxu2 %v7585_v7  ;;  %3351 = vmatmul.f32.gmra.mxu0 %v7441_v10 }
 0x224   : > { %3433 = vmatmul.f32.gmra.mxu2 %v7503_v21  ;;  %3766 = vmatpush.msra.mxu1 %v3765_v5  ;;  %v7643_v21 = vand.u32 4294901760, %v7255_v53 }
 0x226   : > { %v7629_v52 = vpop.f32.mrf.mxu0  ;;  %3772 = vmatpush.msra.mxu1 %v3771_v60  ;;  %v7661_v5 = vsub.f32 %v7255_v53, %v7643_v21  ;;  %v8531_v60 = vand.u32 4294901760, %v7648_v45  ;;  %v7678_v53 = vsub.f32 %v7204_v27, %v7657_v8 }
 0x228   : > { %3778 = vmatpush.msra.mxu1 %v3777_v6  ;;  %v8532_v23 = vand.u32 4294901760, %v7661_v5  ;;  %v4036_v16 = vsub.f32 %v7648_v45, %v8531_v60  ;;  %v8534_v27 = vand.u32 4294901760, %v7678_v53 }
 0x229   : > { %v7634_v24 = vpop.f32.mrf.mxu3  ;;  %3388 = vmatmul.f32.gmra.mxu1 %v7441_v10  ;;  %3498 = vmatmul.f32.gmra.mxu3 %v7467_v2 }
 0x22a   : > { %v7638_v59 = vpop.f32.mrf.mxu1  ;;  %v7640_v40 = vpop.f32.mrf.mxu2  ;;  %v4042_v29 = vsub.f32 %v7661_v5, %v8532_v23  ;;  %v4037_v39 = vand.u32 4294901760, %v4036_v16  ;;  %v4054_v16 = vsub.f32 %v7678_v53, %v8534_v27  ;;  %v8572_v23 = vand.u32 4294901760, %v7568_v20 }
 0x22b   : > { %3355 = vmatmul.f32.gmra.mxu0 %v7467_v2  ;;  %v8574_v27 = vand.u32 4294901760, %v7578_v36 }
 0x22c   : > { %3441 = vmatmul.f32.gmra.mxu2 %v7531_v54 }
 0x22e   : > { %v7654_v55 = vpop.f32.mrf.mxu0 }
 0x231   : > { %v7663_v25 = vpop.f32.mrf.mxu3  ;;  %3392 = vmatmul.f32.gmra.mxu1 %v7467_v2  ;;  %3502 = vmatmul.f32.gmra.mxu3 %v7499_v1 }
 0x232   : > { %8570 = vst [vmem:[#allocation7_spill] sm:$0xff] %v7663_v25  ;;  %v7672_v54 = vpop.f32.mrf.mxu1  ;;  %v7674_v6 = vpop.f32.mrf.mxu2 }
 0x233   : > { %8571 = vst [vmem:[#allocation10_spill] sm:$0xff] %v7674_v6  ;;  %3359 = vmatmul.f32.gmra.mxu0 %v7499_v1  ;;  %v4043_v6 = vand.u32 4294901760, %v4042_v29  ;;  %v4055_v29 = vand.u32 4294901760, %v4054_v16  ;;  %v6119_v16 = vld [vmem:[%s8515_s2 + $0x128] sm:$0xff] }
 0x234   : > { %3449 = vmatmul.f32.gmra.mxu2 %v7558_v38  ;;  %v4048_v38 = vsub.f32 %v7668_v4, %v8533_v63 }
 0x236   : > { %v7686_v58 = vpop.f32.mrf.mxu0  ;;  %v4049_v63 = vand.u32 4294901760, %v4048_v38 }
 0x239   : > { %v7693_v25 = vpop.f32.mrf.mxu3  ;;  %3396 = vmatmul.f32.gmra.mxu1 %v7499_v1  ;;  %3662 = vmatmul.f32.vlgmr.msrb.gmra.mxu3 %v7415_v61 }
 0x23a   : > { %4038 = vmatpush.msrb.mxu3 %v4037_v39  ;;  %v2858_v60 = vpop.f32.mrf.mxu2  ;;  %v7701_v49 = vpop.f32.mrf.mxu1 }
 0x23b   : > { %3532 = vmatmul.f32.vlgmr.msrb.gmra.mxu0 %v7429_v11  ;;  %v8573_v11 = vand.u32 4294901760, %v7573_v44 }
 0x23c   : > { %3625 = vmatmul.f32.vlgmr.msrb.gmra.mxu2 %v7415_v61  ;;  %3901 = vmatpush.msrb.mxu0 %v8572_v23  ;;  %v2213_v61 = vadd.f32 %v7366_v42, %v7311_v18 }
 0x23d   : > { %3981 = vmatpush.msrb.mxu2 %v7632_v34  ;;  %4044 = vmatpush.msrb.mxu3 %v4043_v6 }
 0x23e   : > { %v7710_v39 = vpop.f32.mrf.mxu0  ;;  %3905 = vmatpush.msrb.mxu0 %v8573_v11  ;;  %v2250_v44 = vadd.f32 %v7386_v57, %v2213_v61 }
 0x23f   : > { %3983 = vmatpush.msrb.mxu2 %v7643_v21  ;;  %4050 = vmatpush.msrb.mxu3 %v4049_v63  ;;  %v8575_v63 = vand.u32 4294901760, %v7585_v7 }
 0x240   : > { %3909 = vmatpush.msrb.mxu0 %v8574_v27  ;;  %v3679_v57 = vsel %vm269_vm0, %v2250_v44, 0 }
 0x241   : > { %3985 = vmatpush.msrb.mxu2 %v7652_v51  ;;  %4056 = vmatpush.msrb.mxu3 %v4055_v29  ;;  %v7720_v20 = vpop.f32.mrf.mxu3 }
 0x242   : > { %3574 = vmatmul.f32.vlgmr.msrb.gmra.mxu1 %v7439_v43  ;;  %3666 = vmatmul.f32.gmra.mxu3 %v7441_v10 }
 0x243   : > { %3913 = vmatpush.msrb.mxu0 %v8575_v63  ;;  %3944 = vmatpush.msrb.mxu1 %v7554_v37  ;;  %v7728_v36 = vpop.f32.mrf.mxu1  ;;  %v2866_v42 = vpop.f32.mrf.mxu2  ;;  %v7741_v37 = vand.u32 4294901760, %v3679_v57 }
 0x244   : > { %3987 = vmatpush.msrb.mxu2 %v7657_v8  ;;  %3537 = vmatmul.f32.gmra.mxu0 %v7455_v28  ;;  %v2217_v28 = vadd.f32 %v7393_v41, %v7321_v26  ;;  %v6118_v26 = vld [vmem:[%s8515_s2 + $0x120] sm:$0xff] }
 0x245   : > { %3629 = vmatmul.f32.gmra.mxu2 %v7441_v10  ;;  %3946 = vmatpush.msrb.mxu1 %v7561_v48  ;;  %v7755_v7 = vsub.f32 %v3679_v57, %v7741_v37 }
 0x246   : > { %v7734_v18 = vpop.f32.mrf.mxu0  ;;  %v2254_v48 = vadd.f32 %v7408_v9, %v2217_v28  ;;  %v8577_v9 = vld [vmem:[#allocation15_spill] sm:$0xff] }
 0x247   : > { %3948 = vmatpush.msrb.mxu1 %v7565_v15 }
 0x248   : > { %v3682_v41 = vsel %vm269_vm0, %v2254_v48, 0 }
 0x249   : > { %3950 = vmatpush.msrb.mxu1 %v7570_v22  ;;  %v7739_v43 = vpop.f32.mrf.mxu3  ;;  %v7770_v6 = vand.u32 4294901760, %v3682_v41 }
 0x24a   : > { %3580 = vmatmul.f32.gmra.mxu1 %v7471_v31  ;;  %3670 = vmatmul.f32.gmra.mxu3 %v7467_v2  ;;  %v2859_v31 = vadd.f32 %v6118_v26, %v2858_v60  ;;  %v8579_v26 = vand.u32 4294901760, %v7648_v45 }
 0x24b   : > { %v7747_v10 = vpop.f32.mrf.mxu1  ;;  %v2874_v15 = vpop.f32.mrf.mxu2  ;;  %v7786_v29 = vsub.f32 %v3682_v41, %v7770_v6 }
 0x24c   : > { %3542 = vmatmul.f32.gmra.mxu0 %v7481_v32  ;;  %v2221_v32 = vadd.f32 %v7412_v17, %v8577_v9  ;;  %v2924_v17 = vadd.f32 %v7693_v25, %v2859_v31 }
 0x24d   : > { %3633 = vmatmul.f32.gmra.mxu2 %v7467_v2  ;;  %v7768_v2 = vand.u32 4294901760, %v7755_v7  ;;  %v7799_v57 = vand.u32 4294901760, %v7786_v29 }
 0x24e   : > { %v7752_v22 = vpop.f32.mrf.mxu0  ;;  %v2258_v38 = vadd.f32 %v7426_v3, %v2221_v32  ;;  %v8580_v32 = vand.u32 4294901760, %v7661_v5 }
 0x24f   : > { %8576 = vst [vmem:[#allocation13_spill] sm:$0xff] %v7752_v22  ;;  %v3713_v11 = vsub.f32 %v7755_v7, %v7768_v2  ;;  %v3721_v9 = vsub.f32 %v7786_v29, %v7799_v57 }
 0x250   : > { %v3685_v3 = vsel %vm269_vm0, %v2258_v38, 0 }
 0x251   : > { %v7761_v23 = vpop.f32.mrf.mxu3  ;;  %v7793_v25 = vand.u32 4294901760, %v3713_v11  ;;  %v7795_v63 = vand.u32 4294901760, %v3685_v3 }
 0x252   : > { %3586 = vmatmul.f32.gmra.mxu1 %v7506_v19  ;;  %3674 = vmatmul.f32.gmra.mxu3 %v7499_v1 }
 0x253   : > { %v7772_v27 = vpop.f32.mrf.mxu1  ;;  %v7776_v60 = vpop.f32.mrf.mxu2  ;;  %v7813_v41 = vsub.f32 %v3685_v3, %v7795_v63 }
 0x254   : > { %8578 = vst [vmem:[#allocation6_spill] sm:$0xff] %v7772_v27  ;;  %3547 = vmatmul.f32.gmra.mxu0 %v7517_v35  ;;  %v2867_v35 = vadd.f32 %v6119_v16, %v2866_v42 }
 0x255   : > { %3637 = vmatmul.f32.gmra.mxu2 %v7499_v1  ;;  %v2225_v1 = vadd.f32 %v7432_v50, %v7373_v46 }
 0x256   : > { %v2965_v19 = vpop.f32.mrf.mxu0  ;;  %v2928_v50 = vadd.f32 %v7720_v20, %v2867_v35 }
 0x257   : > { %v2966_v61 = vadd.f32 %v2965_v19, %v2924_v17  ;;  %v2262_v42 = vadd.f32 %v7448_v33, %v2225_v1  ;;  %v8582_v19 = vand.u32 4294901760, %v7668_v4  ;;  %v6121_v1 = vld [vmem:[%s8515_s2 + $0x138] sm:$0xff] }
 0x259   : > { %v3095_v44 = vpop.f32.mrf.mxu3  ;;  %v3688_v20 = vsel %vm269_vm0, %v2262_v42, 0 }
 0x25a   : > { %3592 = vmatmul.f32.gmra.mxu1 %v7534_v56  ;;  %3864 = vmatmul.f32.vlgmr.msra.gmra.mxu3 %v7768_v2  ;;  %v6120_v56 = vld [vmem:[%s8515_s2 + $0x130] sm:$0xff]  ;;  %v7828_v11 = vand.u32 4294901760, %v3688_v20 }
 0x25b   : > { %4222 = vmatpush.msra.mxu3 %v7632_v34  ;;  %v3058_v48 = vpop.f32.mrf.mxu2 }
 0x25c   : > { %3715 = vmatmul.f32.vlgmr.msra.gmra.mxu0 %v7793_v25  ;;  %v3007_v28 = vpop.f32.mrf.mxu1 }
 0x25d   : > { %3822 = vmatmul.f32.vlgmr.msra.gmra.mxu2 %v7755_v7  ;;  %4088 = vmatpush.msra.mxu0 %v7648_v45  ;;  %v3008_v46 = vadd.f32 %v3007_v28, %v2966_v61  ;;  %v2875_v45 = vadd.f32 %v6120_v56, %v2874_v15  ;;  %v7833_v15 = vand.u32 4294901760, %v7813_v41 }
 0x25e   : > { %4179 = vmatpush.msra.mxu2 %v8579_v26  ;;  %4224 = vmatpush.msra.mxu3 %v7643_v21  ;;  %v2970_v33 = vpop.f32.mrf.mxu0 }
 0x25f   : > { %4091 = vmatpush.msra.mxu0 %v7661_v5  ;;  %v3059_v31 = vadd.f32 %v3058_v48, %v3008_v46  ;;  %v2971_v38 = vadd.f32 %v2970_v33, %v2928_v50  ;;  %v3722_v5 = vand.u32 4294901760, %v3721_v9 }
 0x260   : > { %4183 = vmatpush.msra.mxu2 %v8580_v32  ;;  %4226 = vmatpush.msra.mxu3 %v7652_v51 }
 0x261   : > { %4094 = vmatpush.msra.mxu0 %v7668_v4  ;;  %v7823_v17 = vadd.f32 %v3095_v44, %v3059_v31  ;;  %v8583_v4 = vand.u32 4294901760, %v7678_v53  ;;  %v2932_v44 = vadd.f32 %v7739_v43, %v2875_v45  ;;  %v2883_v43 = vadd.f32 %v6121_v1, %v7776_v60 }
 0x262   : > { %4187 = vmatpush.msra.mxu2 %v8582_v19  ;;  %4228 = vmatpush.msra.mxu3 %v7657_v8  ;;  %v3099_v16 = vpop.f32.mrf.mxu3 }
 0x263   : > { %8581 = vst [vmem:[#allocation8_spill] sm:$0xff] %v7823_v17  ;;  %3780 = vmatmul.f32.vlgmr.msra.gmra.mxu1 %v7741_v37  ;;  %3870 = vmatmul.f32.gmra.mxu3 %v7799_v57  ;;  %v2936_v60 = vadd.f32 %v7761_v23, %v2883_v43 }
 0x264   : > { %4097 = vmatpush.msra.mxu0 %v7678_v53  ;;  %4132 = vmatpush.msra.mxu1 %v7632_v34  ;;  %v3013_v3 = vpop.f32.mrf.mxu1  ;;  %v7846_v34 = vsub.f32 %v3688_v20, %v7828_v11  ;;  %v3729_v53 = vsub.f32 %v7813_v41, %v7833_v15 }
 0x265   : > { %4191 = vmatpush.msra.mxu2 %v8583_v4  ;;  %3723 = vmatmul.f32.gmra.mxu0 %v3722_v5  ;;  %v3014_v35 = vadd.f32 %v3013_v3, %v2971_v38  ;;  %v3062_v61 = vpop.f32.mrf.mxu2 }
 0x266   : > { %3827 = vmatmul.f32.gmra.mxu2 %v7786_v29  ;;  %4134 = vmatpush.msra.mxu1 %v7643_v21  ;;  %v2975_v42 = vpop.f32.mrf.mxu0  ;;  %v3730_v21 = vand.u32 4294901760, %v3729_v53  ;;  %v7858_v56 = vand.u32 4294901760, %v7846_v34 }
 0x267   : > { %v3063_v28 = vadd.f32 %v3062_v61, %v3014_v35  ;;  %v2976_v48 = vadd.f32 %v2975_v42, %v2932_v44 }
 0x268   : > { %4136 = vmatpush.msra.mxu1 %v7652_v51 }
 0x269   : > { %v7852_v46 = vadd.f32 %v3099_v16, %v3063_v28 }
 0x26a   : > { %4138 = vmatpush.msra.mxu1 %v7657_v8  ;;  %v3103_v50 = vpop.f32.mrf.mxu3  ;;  %v3737_v8 = vsub.f32 %v7846_v34, %v7858_v56 }
 0x26b   : > { %8584 = vst [vmem:[#allocation11_spill] sm:$0xff] %v7852_v46  ;;  %3784 = vmatmul.f32.gmra.mxu1 %v7770_v6  ;;  %3876 = vmatmul.f32.gmra.mxu3 %v7833_v15 }
 0x26c   : > { %v3019_v26 = vpop.f32.mrf.mxu1  ;;  %v3738_v38 = vand.u32 4294901760, %v3737_v8 }
 0x26d   : > { %3731 = vmatmul.f32.gmra.mxu0 %v3730_v21  ;;  %v3020_v33 = vadd.f32 %v3019_v26, %v2976_v48  ;;  %v3066_v51 = vpop.f32.mrf.mxu2 }
 0x26e   : > { %3832 = vmatmul.f32.gmra.mxu2 %v7813_v41  ;;  %v2980_v31 = vpop.f32.mrf.mxu0 }
 0x26f   : > { %v3067_v9 = vadd.f32 %v3066_v51, %v3020_v33  ;;  %v2981_v20 = vadd.f32 %v2980_v31, %v2936_v60 }
 0x271   : > { %v7864_v32 = vadd.f32 %v3103_v50, %v3067_v9 }
 0x272   : > { %v3107_v45 = vpop.f32.mrf.mxu3 }
 0x273   : > { %8585 = vst [vmem:[#allocation9_spill] sm:$0xff] %v7864_v32  ;;  %3788 = vmatmul.f32.gmra.mxu1 %v7795_v63  ;;  %3882 = vmatmul.f32.gmra.mxu3 %v7858_v56 }
 0x274   : > { %v3025_v19 = vpop.f32.mrf.mxu1 }
 0x275   : > { %3739 = vmatmul.f32.gmra.mxu0 %v3738_v38  ;;  %v3026_v16 = vadd.f32 %v3025_v19, %v2981_v20  ;;  %v3070_v23 = vpop.f32.mrf.mxu2 }
 0x276   : > { %3837 = vmatmul.f32.gmra.mxu2 %v7846_v34  ;;  %v3148_v3 = vpop.f32.mrf.mxu0 }
 0x277   : > { %v3071_v4 = vadd.f32 %v3070_v23, %v3026_v16 }
 0x279   : > { %v7869_v35 = vadd.f32 %v3107_v45, %v3071_v4 }
 0x27a   : > { %v7871_v61 = vpop.f32.mrf.mxu3 }
 0x27b   : > { %8586 = vst [vmem:[#allocation15_spill] sm:$0xff] %v7869_v35  ;;  %3792 = vmatmul.f32.gmra.mxu1 %v7828_v11  ;;  %4058 = vmatmul.f32.vlgmr.msrb.gmra.mxu3 %v7741_v37 }
 0x27d   : > { %3915 = vmatmul.f32.vlgmr.msrb.gmra.mxu0 %v7741_v37  ;;  %v3213_v44 = vpop.f32.mrf.mxu1  ;;  %v3255_v1 = vpop.f32.mrf.mxu2 }
 0x27e   : > { %3993 = vmatmul.f32.vlgmr.msrb.gmra.mxu2 %v7793_v25 }
 0x27f   : > { %v3156_v42 = vpop.f32.mrf.mxu0 }
 0x283   : > { %3952 = vmatmul.f32.vlgmr.msrb.gmra.mxu1 %v7741_v37  ;;  %4062 = vmatmul.f32.gmra.mxu3 %v7770_v6  ;;  %v3303_v28 = vpop.f32.mrf.mxu3 }
 0x285   : > { %3919 = vmatmul.f32.gmra.mxu0 %v7770_v6  ;;  %v3217_v53 = vpop.f32.mrf.mxu1 }
 0x286   : > { %4001 = vmatmul.f32.gmra.mxu2 %v3722_v5  ;;  %v3260_v43 = vpop.f32.mrf.mxu2  ;;  %v3218_v19 = vadd.f32 %v3217_v53, %v3156_v42 }
 0x287   : > { %v3164_v48 = vpop.f32.mrf.mxu0 }
 0x288   : > { %v3261_v35 = vadd.f32 %v3260_v43, %v3218_v19 }
 0x28a   : > { %v3304_v42 = vadd.f32 %v3303_v28, %v3261_v35 }
 0x28b   : > { %3956 = vmatmul.f32.gmra.mxu1 %v7770_v6  ;;  %4066 = vmatmul.f32.gmra.mxu3 %v7795_v63  ;;  %v3309_v50 = vpop.f32.mrf.mxu3 }
 0x28d   : > { %3923 = vmatmul.f32.gmra.mxu0 %v7795_v63  ;;  %v3221_v25 = vpop.f32.mrf.mxu1 }
 0x28e   : > { %4009 = vmatmul.f32.gmra.mxu2 %v3730_v21  ;;  %v3265_v26 = vpop.f32.mrf.mxu2  ;;  %v3222_v45 = vadd.f32 %v3221_v25, %v3164_v48 }
 0x28f   : > { %v3172_v33 = vpop.f32.mrf.mxu0 }
 0x290   : > { %v3266_v23 = vadd.f32 %v3265_v26, %v3222_v45 }
 0x292   : > { %v3310_v25 = vadd.f32 %v3309_v50, %v3266_v23 }
 0x293   : > { %3960 = vmatmul.f32.gmra.mxu1 %v7795_v63  ;;  %4070 = vmatmul.f32.gmra.mxu3 %v7828_v11  ;;  %v3315_v51 = vpop.f32.mrf.mxu3 }
 0x295   : > { %3927 = vmatmul.f32.gmra.mxu0 %v7828_v11  ;;  %v3225_v5 = vpop.f32.mrf.mxu1 }
 0x296   : > { %4017 = vmatmul.f32.gmra.mxu2 %v3738_v38  ;;  %v3270_v60 = vpop.f32.mrf.mxu2  ;;  %v3226_v48 = vadd.f32 %v3225_v5, %v3172_v33 }
 0x297   : > { %v3348_v31 = vpop.f32.mrf.mxu0 }
 0x29b   : > { %3964 = vmatmul.f32.gmra.mxu1 %v7828_v11  ;;  %4230 = vmatmul.f32.vlgmr.msra.gmra.mxu3 %v7741_v37  ;;  %v7888_v9 = vpop.f32.mrf.mxu3 }
 0x29d   : > { %4100 = vmatmul.f32.vlgmr.msra.gmra.mxu0 %v7755_v7  ;;  %v3214_v7 = vadd.f32 %v3213_v44, %v3148_v3  ;;  %v3271_v3 = vadd.f32 %v3270_v60, %v3226_v48 }
 0x29e   : > { %4193 = vmatmul.f32.vlgmr.msra.gmra.mxu2 %v7741_v37  ;;  %v3385_v21 = vpop.f32.mrf.mxu1  ;;  %v7892_v8 = vpop.f32.mrf.mxu2 }
 0x29f   : > { %v3256_v32 = vadd.f32 %v3255_v1, %v3214_v7  ;;  %v3316_v35 = vadd.f32 %v3315_v51, %v3271_v3 }
 0x2a0   : > { %v3352_v20 = vpop.f32.mrf.mxu0 }
 0x2a1   : > { %v3298_v44 = vadd.f32 %v7871_v61, %v3256_v32  ;;  %v3353_v53 = vadd.f32 %v3352_v20, %v3304_v42 }
 0x2a3   : > { %4142 = vmatmul.f32.vlgmr.msra.gmra.mxu1 %v7768_v2  ;;  %4234 = vmatmul.f32.gmra.mxu3 %v7770_v6 }
 0x2a4   : > { %v7896_v38 = vpop.f32.mrf.mxu3 }
 0x2a5   : > { %4105 = vmatmul.f32.gmra.mxu0 %v7786_v29 }
 0x2a6   : > { %4197 = vmatmul.f32.gmra.mxu2 %v7770_v6  ;;  %v3389_v16 = vpop.f32.mrf.mxu1 }
 0x2a7   : > { %v7900_v37 = vpop.f32.mrf.mxu2  ;;  %v3390_v26 = vadd.f32 %v3389_v16, %v3353_v53 }
 0x2a8   : > { %v3356_v4 = vpop.f32.mrf.mxu0 }
 0x2a9   : > { %v3357_v29 = vadd.f32 %v3356_v4, %v3310_v25 }
 0x2ab   : > { %4148 = vmatmul.f32.gmra.mxu1 %v7799_v57  ;;  %4238 = vmatmul.f32.gmra.mxu3 %v7795_v63  ;;  %v3349_v57 = vadd.f32 %v3348_v31, %v3298_v44 }
 0x2ac   : > { %v7904_v2 = vpop.f32.mrf.mxu3 }
 0x2ad   : > { %4110 = vmatmul.f32.gmra.mxu0 %v7813_v41  ;;  %v3386_v33 = vadd.f32 %v3385_v21, %v3349_v57  ;;  %v7917_v41 = vand.u32 4294901760, %v3390_v26 }
 0x2ae   : > { %4201 = vmatmul.f32.gmra.mxu2 %v7795_v63  ;;  %v3393_v6 = vpop.f32.mrf.mxu1 }
 0x2af   : > { %v3394_v1 = vadd.f32 %v3393_v6, %v3357_v29  ;;  %v7909_v43 = vpop.f32.mrf.mxu2  ;;  %v7921_v28 = vand.u32 4294901760, %v3386_v33 }
 0x2b0   : > { %v3360_v50 = vpop.f32.mrf.mxu0 }
 0x2b1   : > { %v7911_v5 = vand.u32 4294901760, %v3394_v1  ;;  %v3361_v32 = vadd.f32 %v3360_v50, %v3316_v35  ;;  %v4342_v45 = vsub.f32 %v3386_v33, %v7921_v28  ;;  %v8588_v35 = vld [vmem:[#allocation2_spill] sm:$0xff] }
 0x2b3   : > { %4154 = vmatmul.f32.gmra.mxu1 %v7833_v15  ;;  %4242 = vmatmul.f32.gmra.mxu3 %v7828_v11  ;;  %v4330_v60 = vsub.f32 %v3394_v1, %v7911_v5  ;;  %v4336_v15 = vsub.f32 %v3390_v26, %v7917_v41  ;;  %v8587_v1 = vld [vmem:[#allocation3_spill] sm:$0xff] }
 0x2b4   : > { %v7915_v63 = vpop.f32.mrf.mxu3  ;;  %v3435_v50 = vadd.f32 %v7900_v37, %v8587_v1 }
 0x2b5   : > { %4115 = vmatmul.f32.gmra.mxu0 %v7846_v34  ;;  %v4331_v34 = vand.u32 4294901760, %v4330_v60  ;;  %v4337_v7 = vand.u32 4294901760, %v4336_v15 }
 0x2b6   : > { %4205 = vmatmul.f32.gmra.mxu2 %v7828_v11  ;;  %v3397_v61 = vpop.f32.mrf.mxu1 }
 0x2b7   : > { %v3398_v31 = vadd.f32 %v3397_v61, %v3361_v32  ;;  %v3450_v51 = vpop.f32.mrf.mxu2  ;;  %v4332_v25 = vsub.f32 %v4330_v60, %v4331_v34  ;;  %v4338_v6 = vsub.f32 %v4336_v15, %v4337_v7  ;;  %v3427_v32 = vadd.f32 %v7892_v8, %v8588_v35  ;;  %v8589_v61 = vld [vmem:[#allocation4_spill] sm:$0xff] }
 0x2b8   : > { %v3533_v21 = vpop.f32.mrf.mxu0 }
 0x2b9   : > { %v4270_v20 = vand.u32 4294901760, %v3398_v31  ;;  %v4333_v3 = vand.u32 4294901760, %v4332_v25  ;;  %v4339_v53 = vand.u32 4294901760, %v4338_v6  ;;  %v3492_v37 = vadd.f32 %v7888_v9, %v3427_v32 }
 0x2bb   : > { %v4324_v19 = vsub.f32 %v3398_v31, %v4270_v20  ;;  %4160 = vmatmul.f32.gmra.mxu1 %v7858_v56  ;;  %4271 = vmatpush.msrb.mxu0 %v4270_v20  ;;  %v4343_v56 = vand.u32 4294901760, %v4342_v45 }
 0x2bc   : > { %4422 = vmatpush.msrb.mxu3 %v4270_v20  ;;  %v7927_v11 = vpop.f32.mrf.mxu3 }
 0x2bd   : > { %4273 = vmatpush.msrb.mxu0 %v7911_v5  ;;  %4378 = vmatpush.msrb.mxu2 %v4324_v19  ;;  %v4325_v16 = vand.u32 4294901760, %v4324_v19  ;;  %v4344_v44 = vsub.f32 %v4342_v45, %v4343_v56 }
 0x2be   : > { %4424 = vmatpush.msrb.mxu3 %v7911_v5 }
 0x2bf   : > { %v3575_v23 = vpop.f32.mrf.mxu1  ;;  %v3626_v4 = vpop.f32.mrf.mxu2  ;;  %4275 = vmatpush.msrb.mxu0 %v7917_v41  ;;  %4381 = vmatpush.msrb.mxu2 %v4330_v60  ;;  %v4326_v48 = vsub.f32 %v4324_v19, %v4325_v16  ;;  %v4345_v33 = vand.u32 4294901760, %v4344_v44  ;;  %v3443_v60 = vadd.f32 %v7909_v43, %v8589_v61 }
 0x2c0   : > { %4426 = vmatpush.msrb.mxu3 %v7917_v41 }
 0x2c1   : > { %v3538_v42 = vpop.f32.mrf.mxu0  ;;  %4277 = vmatpush.msrb.mxu0 %v7921_v28  ;;  %4384 = vmatpush.msrb.mxu2 %v4336_v15  ;;  %v4327_v29 = vand.u32 4294901760, %v4326_v48  ;;  %v8590_v48 = vld [vmem:[#allocation5_spill] sm:$0xff] }
 0x2c2   : > { %4428 = vmatpush.msrb.mxu3 %v7921_v28  ;;  %v3451_v25 = vadd.f32 %v3450_v51, %v8590_v48 }
 0x2c3   : > { %4469 = vmatpush.msra.mxu0 %v4325_v16  ;;  %4328 = vmatpush.msrb.mxu1 %v4327_v29  ;;  %v3534_v16 = vadd.f32 %v3533_v21, %v3492_v37 }
 0x2c4   : > { %4387 = vmatpush.msrb.mxu2 %v4342_v45  ;;  %v3496_v45 = vadd.f32 %v7896_v38, %v3435_v50 }
 0x2c5   : > { %4473 = vmatpush.msra.mxu0 %v4331_v34  ;;  %4334 = vmatpush.msrb.mxu1 %v4333_v3  ;;  %v3667_v57 = vpop.f32.mrf.mxu3  ;;  %v3500_v34 = vadd.f32 %v7904_v2, %v3443_v60 }
 0x2c6   : > { %v3539_v19 = vadd.f32 %v3538_v42, %v3496_v45 }
 0x2c7   : > { %4477 = vmatpush.msra.mxu0 %v4337_v7  ;;  %v3581_v26 = vpop.f32.mrf.mxu1  ;;  %4340 = vmatpush.msrb.mxu1 %v4339_v53 }
 0x2c8   : > { %v3630_v31 = vpop.f32.mrf.mxu2  ;;  %v3582_v7 = vadd.f32 %v3581_v26, %v3539_v19 }
 0x2c9   : > { %4481 = vmatpush.msra.mxu0 %v4343_v56  ;;  %v3543_v15 = vpop.f32.mrf.mxu0  ;;  %4346 = vmatpush.msrb.mxu1 %v4345_v33  ;;  %v3576_v56 = vadd.f32 %v3575_v23, %v3534_v16 }
 0x2ca   : > { %v3544_v8 = vadd.f32 %v3543_v15, %v3500_v34 }
 0x2cb   : > { %4512 = vmatpush.msra.mxu1 %v4270_v20  ;;  %v3631_v20 = vadd.f32 %v3630_v31, %v3582_v7  ;;  %v3627_v2 = vadd.f32 %v3626_v4, %v3576_v56 }
 0x2cd   : > { %4514 = vmatpush.msra.mxu1 %v7911_v5  ;;  %v3671_v38 = vpop.f32.mrf.mxu3  ;;  %v3504_v5 = vadd.f32 %v7915_v63, %v3451_v25  ;;  %v3668_v21 = vadd.f32 %v3667_v57, %v3631_v20 }
 0x2cf   : > { %4516 = vmatpush.msra.mxu1 %v7917_v41  ;;  %v3587_v43 = vpop.f32.mrf.mxu1  ;;  %v3664_v41 = vadd.f32 %v7927_v11, %v3627_v2  ;;  %v7952_v26 = vand.u32 4294901760, %v3668_v21 }
 0x2d0   : > { %v3588_v29 = vadd.f32 %v3587_v43, %v3544_v8  ;;  %v3634_v6 = vpop.f32.mrf.mxu2 }
 0x2d1   : > { %4518 = vmatpush.msra.mxu1 %v7921_v28  ;;  %v3548_v9 = vpop.f32.mrf.mxu0  ;;  %v7954_v35 = vand.u32 4294901760, %v3664_v41  ;;  %v7960_v57 = vsub.f32 %v3668_v21, %v7952_v26 }
 0x2d2   : > { %v3635_v42 = vadd.f32 %v3634_v6, %v3588_v29  ;;  %v3549_v44 = vadd.f32 %v3548_v9, %v3504_v5 }
 0x2d3   : > { %v7965_v11 = vsub.f32 %v3664_v41, %v7954_v35  ;;  %v4615_v37 = vand.u32 4294901760, %v7960_v57 }
 0x2d4   : > { %v3672_v3 = vadd.f32 %v3671_v38, %v3635_v42 }
 0x2d5   : > { %v3675_v33 = vpop.f32.mrf.mxu3  ;;  %v4621_v16 = vand.u32 4294901760, %v7965_v11  ;;  %v4616_v8 = vsub.f32 %v7960_v57, %v4615_v37 }
 0x2d6   : > { %v7950_v1 = vand.u32 4294901760, %v3672_v3 }
 0x2d7   : > { %v3593_v53 = vpop.f32.mrf.mxu1  ;;  %v4622_v25 = vsub.f32 %v7965_v11, %v4621_v16  ;;  %v4617_v29 = vand.u32 4294901760, %v4616_v8 }
 0x2d8   : > { %v3594_v51 = vadd.f32 %v3593_v53, %v3549_v44  ;;  %v3638_v23 = vpop.f32.mrf.mxu2  ;;  %v7957_v4 = vsub.f32 %v3672_v3, %v7950_v1 }
 0x2d9   : > { %v3716_v50 = vpop.f32.mrf.mxu0  ;;  %v4623_v6 = vand.u32 4294901760, %v4622_v25 }
 0x2da   : > { %v3639_v28 = vadd.f32 %v3638_v23, %v3594_v51  ;;  %v4609_v31 = vand.u32 4294901760, %v7957_v4 }
 0x2dc   : > { %v3676_v63 = vadd.f32 %v3675_v33, %v3639_v28  ;;  %v4610_v34 = vsub.f32 %v7957_v4, %v4609_v31 }
 0x2dd   : > { %v3865_v2 = vpop.f32.mrf.mxu3 }
 0x2de   : > { %v7962_v32 = vand.u32 4294901760, %v3676_v63  ;;  %v4611_v48 = vand.u32 4294901760, %v4610_v34 }
 0x2e0   : > { %v7968_v61 = vsub.f32 %v3676_v63, %v7962_v32  ;;  %v3781_v60 = vpop.f32.mrf.mxu1  ;;  %4549 = vmatpush.msra.mxu2 %v7962_v32  ;;  %v3823_v9 = vpop.f32.mrf.mxu2 }
 0x2e1   : > { %v3782_v42 = vadd.f32 %v3781_v60, %v3716_v50 }
 0x2e2   : > { %v3724_v15 = vpop.f32.mrf.mxu0  ;;  %4551 = vmatpush.msra.mxu2 %v7950_v1  ;;  %v4603_v45 = vand.u32 4294901760, %v7968_v61 }
 0x2e3   : > { %v3824_v5 = vadd.f32 %v3823_v9, %v3782_v42 }
 0x2e4   : > { %4553 = vmatpush.msra.mxu2 %v7952_v26  ;;  %v4604_v19 = vsub.f32 %v7968_v61, %v4603_v45 }
 0x2e5   : > { %v3866_v41 = vadd.f32 %v3865_v2, %v3824_v5 }
 0x2e6   : > { %4555 = vmatpush.msra.mxu2 %v7954_v35  ;;  %v4605_v7 = vand.u32 4294901760, %v4604_v19  ;;  %v3871_v23 = vpop.f32.mrf.mxu3 }
 0x2e8   : > { %v3785_v43 = vpop.f32.mrf.mxu1  ;;  %4606 = vmatpush.msra.mxu3 %v4605_v7 }
 0x2e9   : > { %v3828_v44 = vpop.f32.mrf.mxu2  ;;  %v3786_v53 = vadd.f32 %v3785_v43, %v3724_v15 }
 0x2ea   : > { %v3732_v56 = vpop.f32.mrf.mxu0  ;;  %4612 = vmatpush.msra.mxu3 %v4611_v48 }
 0x2eb   : > { %v3829_v33 = vadd.f32 %v3828_v44, %v3786_v53 }
 0x2ec   : > { %4618 = vmatpush.msra.mxu3 %v4617_v29 }
 0x2ed   : > { %v3872_v48 = vadd.f32 %v3871_v23, %v3829_v33 }
 0x2ee   : > { %4624 = vmatpush.msra.mxu3 %v4623_v6 }
 0x2f0   : > { %v3789_v38 = vpop.f32.mrf.mxu1 }
 0x2f1   : > { %v3790_v8 = vadd.f32 %v3789_v38, %v3732_v56  ;;  %v3833_v50 = vpop.f32.mrf.mxu2  ;;  %v3877_v56 = vpop.f32.mrf.mxu3 }
 0x2f2   : > { %v3740_v20 = vpop.f32.mrf.mxu0 }
 0x2f3   : > { %v3834_v29 = vadd.f32 %v3833_v50, %v3790_v8 }
 0x2f5   : > { %v3878_v44 = vadd.f32 %v3877_v56, %v3834_v29 }
 0x2f8   : > { %v3793_v3 = vpop.f32.mrf.mxu1 }
 0x2fa   : > { %v3916_v21 = vpop.f32.mrf.mxu0 }
 0x2fb   : > { %v3917_v51 = vadd.f32 %v3916_v21, %v3866_v41  ;;  %v3794_v21 = vadd.f32 %v3793_v3, %v3740_v20 }
 0x300   : > { %v3953_v28 = vpop.f32.mrf.mxu1 }
 0x301   : > { %v3954_v63 = vadd.f32 %v3953_v28, %v3917_v51 }
 0x302   : > { %v3920_v19 = vpop.f32.mrf.mxu0 }
 0x303   : > { %v4247_v34 = vsel %vm269_vm0, %v3954_v63, 0  ;;  %v3921_v15 = vadd.f32 %v3920_v19, %v3872_v48 }
 0x304   : > { %v7987_v7 = vand.u32 4294901760, %v4247_v34 }
 0x306   : > { %v7990_v60 = vsub.f32 %v4247_v34, %v7987_v7  ;;  %4348 = vmatmul.f32.vlgmr.msrb.gmra.mxu1 %v7987_v7 }
 0x307   : > { %4700 = vmatpush.msrb.mxu1 %v7962_v32 }
 0x308   : > { %v3957_v43 = vpop.f32.mrf.mxu1  ;;  %4390 = vmatmul.f32.vlgmr.msrb.gmra.mxu2 %v7990_v60  ;;  %v7996_v25 = vand.u32 4294901760, %v7990_v60 }
 0x309   : > { %v3958_v6 = vadd.f32 %v3957_v43, %v3921_v15  ;;  %4702 = vmatpush.msrb.mxu1 %v7950_v1  ;;  %4747 = vmatpush.msrb.mxu2 %v4603_v45 }
 0x30a   : > { %v3924_v38 = vpop.f32.mrf.mxu0  ;;  %4432 = vmatmul.f32.vlgmr.msrb.gmra.mxu3 %v7996_v25  ;;  %v4281_v9 = vsub.f32 %v7990_v60, %v7996_v25 }
 0x30b   : > { %v4250_v42 = vsel %vm269_vm0, %v3958_v6, 0  ;;  %4704 = vmatpush.msrb.mxu1 %v7952_v26  ;;  %4751 = vmatpush.msrb.mxu2 %v4609_v31  ;;  %v3925_v53 = vadd.f32 %v3924_v38, %v3878_v44 }
 0x30c   : > { %v8004_v2 = vand.u32 4294901760, %v4250_v42  ;;  %4790 = vmatpush.msrb.mxu3 %v7962_v32  ;;  %v4282_v5 = vand.u32 4294901760, %v4281_v9  ;;  %v3838_v32 = vpop.f32.mrf.mxu2 }
 0x30d   : > { %4706 = vmatpush.msrb.mxu1 %v7954_v35  ;;  %4755 = vmatpush.msrb.mxu2 %v4615_v37  ;;  %v3839_v20 = vadd.f32 %v3838_v32, %v3794_v21 }
 0x30e   : > { %v8011_v45 = vsub.f32 %v4250_v42, %v8004_v2  ;;  %4792 = vmatpush.msrb.mxu3 %v7950_v1  ;;  %4283 = vmatmul.f32.vlgmr.msrb.gmra.mxu0 %v4282_v5 }
 0x30f   : > { %4352 = vmatmul.f32.gmra.mxu1 %v8004_v2  ;;  %4656 = vmatpush.msrb.mxu0 %v7968_v61 }
 0x310   : > { %4759 = vmatpush.msrb.mxu2 %v4621_v16  ;;  %4794 = vmatpush.msrb.mxu3 %v7952_v26  ;;  %v3961_v31 = vpop.f32.mrf.mxu1  ;;  %v4288_v37 = vand.u32 4294901760, %v8011_v45  ;;  %v3883_v16 = vpop.f32.mrf.mxu3 }
 0x311   : > { %v3962_v3 = vadd.f32 %v3961_v31, %v3925_v53  ;;  %4395 = vmatmul.f32.gmra.mxu2 %v8011_v45  ;;  %4659 = vmatpush.msrb.mxu0 %v7957_v4  ;;  %v3884_v23 = vadd.f32 %v3883_v16, %v3839_v20 }
 0x312   : > { %4796 = vmatpush.msrb.mxu3 %v7954_v35  ;;  %v4289_v1 = vsub.f32 %v8011_v45, %v4288_v37  ;;  %v3928_v41 = vpop.f32.mrf.mxu0 }
 0x313   : > { %v4253_v61 = vsel %vm269_vm0, %v3962_v3, 0  ;;  %4438 = vmatmul.f32.gmra.mxu3 %v4288_v37  ;;  %4662 = vmatpush.msrb.mxu0 %v7960_v57  ;;  %v3929_v33 = vadd.f32 %v3928_v41, %v3884_v23 }
 0x314   : > { %v4294_v26 = vand.u32 4294901760, %v4253_v61  ;;  %v4290_v51 = vand.u32 4294901760, %v4289_v1  ;;  %v8034_v43 = vpop.f32.mrf.mxu2 }
 0x315   : > { %4665 = vmatpush.msrb.mxu0 %v7965_v11 }
 0x316   : > { %v4295_v28 = vsub.f32 %v4253_v61, %v4294_v26  ;;  %4291 = vmatmul.f32.gmra.mxu0 %v4290_v51 }
 0x317   : > { %4356 = vmatmul.f32.gmra.mxu1 %v4294_v26 }
 0x318   : > { %v3965_v4 = vpop.f32.mrf.mxu1  ;;  %v4296_v35 = vand.u32 4294901760, %v4295_v28  ;;  %v8036_v29 = vpop.f32.mrf.mxu3 }
 0x319   : > { %v3966_v63 = vadd.f32 %v3965_v4, %v3929_v33  ;;  %4400 = vmatmul.f32.gmra.mxu2 %v4295_v28 }
 0x31a   : > { %v4297_v19 = vsub.f32 %v4295_v28, %v4296_v35 }
 0x31b   : > { %v4256_v34 = vsel %vm269_vm0, %v3966_v63, 0  ;;  %4444 = vmatmul.f32.gmra.mxu3 %v4296_v35 }
 0x31c   : > { %v4302_v57 = vand.u32 4294901760, %v4256_v34  ;;  %v4298_v8 = vand.u32 4294901760, %v4297_v19  ;;  %v8038_v6 = vpop.f32.mrf.mxu2 }
 0x31e   : > { %v4303_v48 = vsub.f32 %v4256_v34, %v4302_v57  ;;  %4299 = vmatmul.f32.gmra.mxu0 %v4298_v8 }
 0x31f   : > { %4360 = vmatmul.f32.gmra.mxu1 %v4302_v57 }
 0x320   : > { %v4304_v50 = vand.u32 4294901760, %v4303_v48  ;;  %v8041_v56 = vpop.f32.mrf.mxu3 }
 0x321   : > { %4405 = vmatmul.f32.gmra.mxu2 %v4303_v48 }
 0x322   : > { %v4305_v11 = vsub.f32 %v4303_v48, %v4304_v50 }
 0x323   : > { %4450 = vmatmul.f32.gmra.mxu3 %v4304_v50 }
 0x324   : > { %v4306_v15 = vand.u32 4294901760, %v4305_v11  ;;  %v8046_v38 = vpop.f32.mrf.mxu2 }
 0x326   : > { %4307 = vmatmul.f32.gmra.mxu0 %v4306_v15 }
 0x327   : > { %4520 = vmatmul.f32.vlgmr.msra.gmra.mxu1 %v7987_v7 }
 0x328   : > { %v8049_v9 = vpop.f32.mrf.mxu3 }
 0x329   : > { %4561 = vmatmul.f32.vlgmr.msra.gmra.mxu2 %v4282_v5 }
 0x32b   : > { %4626 = vmatmul.f32.vlgmr.msra.gmra.mxu3 %v7987_v7 }
 0x32e   : > { %4483 = vmatmul.f32.vlgmr.msra.gmra.mxu0 %v7987_v7 }
 0x32f   : > { %4524 = vmatmul.f32.gmra.mxu1 %v8004_v2 }
 0x330   : > { %v8055_v42 = vpop.f32.mrf.mxu3 }
 0x331   : > { %4569 = vmatmul.f32.gmra.mxu2 %v4290_v51  ;;  %8591 = vst [vmem:[#allocation3_spill] sm:$0xff] %v8055_v42 }
 0x333   : > { %4630 = vmatmul.f32.gmra.mxu3 %v8004_v2 }
 0x336   : > { %4487 = vmatmul.f32.gmra.mxu0 %v8004_v2 }
 0x337   : > { %4528 = vmatmul.f32.gmra.mxu1 %v4294_v26 }
 0x339   : > { %4577 = vmatmul.f32.gmra.mxu2 %v4298_v8 }
 0x33b   : > { %4634 = vmatmul.f32.gmra.mxu3 %v4294_v26 }
 0x33e   : > { %4491 = vmatmul.f32.gmra.mxu0 %v4294_v26 }
 0x33f   : > { %4532 = vmatmul.f32.gmra.mxu1 %v4302_v57 }
 0x341   : > { %4585 = vmatmul.f32.gmra.mxu2 %v4306_v15 }
 0x343   : > { %4638 = vmatmul.f32.gmra.mxu3 %v4302_v57 }
 0x346   : > { %4495 = vmatmul.f32.gmra.mxu0 %v4302_v57 }
 0x347   : > { %4710 = vmatmul.f32.vlgmr.msrb.gmra.mxu1 %v7996_v25  ;;  %v8053_v25 = vpop.f32.mrf.mxu2 }
 0x349   : > { %4761 = vmatmul.f32.vlgmr.msrb.gmra.mxu2 %v7987_v7 }
 0x34b   : > { %4798 = vmatmul.f32.vlgmr.msrb.gmra.mxu3 %v7987_v7  ;;  %v8057_v7 = vpop.f32.mrf.mxu1 }
 0x34e   : > { %4668 = vmatmul.f32.vlgmr.msrb.gmra.mxu0 %v7990_v60  ;;  %v8059_v60 = vpop.f32.mrf.mxu0 }
 0x34f   : > { %4716 = vmatmul.f32.gmra.mxu1 %v4288_v37  ;;  %v8061_v5 = vpop.f32.mrf.mxu2 }
 0x350   : > { %8592 = vst [vmem:[#allocation2_spill] sm:$0xff] %v8061_v5 }
 0x351   : > { %4765 = vmatmul.f32.gmra.mxu2 %v8004_v2 }
 0x353   : > { %4802 = vmatmul.f32.gmra.mxu3 %v8004_v2  ;;  %v8063_v2 = vpop.f32.mrf.mxu3  ;;  %v8065_v21 = vpop.f32.mrf.mxu1 }
 0x354   : > { %8593 = vst [vmem:[#allocation4_spill] sm:$0xff] %v8063_v2 }
 0x356   : > { %4673 = vmatmul.f32.gmra.mxu0 %v8011_v45  ;;  %v8067_v44 = vpop.f32.mrf.mxu0 }
 0x357   : > { %4722 = vmatmul.f32.gmra.mxu1 %v4296_v35  ;;  %v8069_v45 = vpop.f32.mrf.mxu2 }
 0x358   : > { %8594 = vst [vmem:[#allocation5_spill] sm:$0xff] %v8069_v45 }
 0x359   : > { %4769 = vmatmul.f32.gmra.mxu2 %v4294_v26 }
 0x35b   : > { %4806 = vmatmul.f32.gmra.mxu3 %v4294_v26  ;;  %v8071_v53 = vpop.f32.mrf.mxu3  ;;  %v8073_v32 = vpop.f32.mrf.mxu1 }
 0x35c   : > { %8595 = vst [vmem:[#allocation16_spill] sm:$0xff] %v8071_v53  ;;  %v2781_v53 = vadd.f32 %v7686_v58, %v7607_v13  ;;  %v2654_v58 = vadd.f32 %v7638_v59, %v7629_v52 }
 0x35d   : > { %8596 = vst [vmem:[#allocation17_spill] sm:$0xff] %v8073_v32 }
 0x35e   : > { %4678 = vmatmul.f32.gmra.mxu0 %v4295_v28  ;;  %v8075_v31 = vpop.f32.mrf.mxu0  ;;  %v2818_v22 = vadd.f32 %v7701_v49, %v2781_v53 }
 0x35f   : > { %4728 = vmatmul.f32.gmra.mxu1 %v4304_v50  ;;  %v8077_v37 = vpop.f32.mrf.mxu2 }
 0x360   : > { %8597 = vst [vmem:[#allocation18_spill] sm:$0xff] %v8077_v37 }
 0x361   : > { %4773 = vmatmul.f32.gmra.mxu2 %v4302_v57 }
 0x363   : > { %4810 = vmatmul.f32.gmra.mxu3 %v4302_v57  ;;  %v8079_v20 = vpop.f32.mrf.mxu3  ;;  %v8081_v3 = vpop.f32.mrf.mxu1 }
 0x364   : > { %8598 = vst [vmem:[#allocation19_spill] sm:$0xff] %v8079_v20  ;;  %v2650_v20 = vadd.f32 %v7619_v0, %v7598_v47  ;;  %v4815_v47 = vsel %vm269_vm0, %v2818_v22, 0 }
 0x365   : > { %8599 = vst [vmem:[#allocation20_spill] sm:$0xff] %v8081_v3  ;;  %v8110_v53 = vand.u32 4294901760, %v4815_v47 }
 0x366   : > { %4683 = vmatmul.f32.gmra.mxu0 %v4303_v48  ;;  %v8083_v1 = vpop.f32.mrf.mxu0  ;;  %v2693_v5 = vadd.f32 %v7621_v14, %v2650_v20 }
 0x367   : > { %8600 = vst [vmem:[#allocation21_spill] sm:$0xff] %v8083_v1  ;;  %v8085_v61 = vpop.f32.mrf.mxu2 }
 0x368   : > { %8601 = vst [vmem:[#allocation22_spill] sm:$0xff] %v8085_v61  ;;  %v2736_v0 = vadd.f32 %v7611_v12, %v2693_v5 }
 0x36a   : > { %v2785_v14 = vadd.f32 %v7710_v39, %v2736_v0  ;;  %v4003_v39 = vadd.f32 %v8038_v6, %v7527_v62  ;;  %v8605_v62 = vld [vmem:[#allocation12_spill] sm:$0xff] }
 0x36b   : > { %v8087_v26 = vpop.f32.mrf.mxu3  ;;  %v4011_v6 = vadd.f32 %v8046_v38, %v8605_v62  ;;  %v8614_v62 = vld [vmem:[#allocation18_spill] sm:$0xff] }
 0x36c   : > { %8602 = vst [vmem:[#allocation23_spill] sm:$0xff] %v8087_v26  ;;  %v2822_v22 = vadd.f32 %v7728_v36, %v2785_v14  ;;  %v8609_v14 = vld [vmem:[#allocation5_spill] sm:$0xff] }
 0x383   : > { %v4349_v16 = vpop.f32.mrf.mxu1 }
 0x38b   : > { %v4284_v41 = vpop.f32.mrf.mxu0  ;;  %v4391_v51 = vpop.f32.mrf.mxu2 }
 0x38c   : > { %v4353_v23 = vpop.f32.mrf.mxu1  ;;  %v4350_v27 = vadd.f32 %v4349_v16, %v4284_v41 }
 0x38d   : > { %v4433_v28 = vpop.f32.mrf.mxu3 }
 0x38e   : > { %v4392_v45 = vadd.f32 %v4391_v51, %v4350_v27  ;;  %v2658_v51 = vadd.f32 %v7672_v54, %v7654_v55 }
 0x393   : > { %v4292_v33 = vpop.f32.mrf.mxu0 }
 0x394   : > { %v4357_v4 = vpop.f32.mrf.mxu1  ;;  %v4396_v35 = vpop.f32.mrf.mxu2  ;;  %v4354_v2 = vadd.f32 %v4353_v23, %v4292_v33 }
 0x396   : > { %v4439_v63 = vpop.f32.mrf.mxu3 }
 0x39b   : > { %v4300_v19 = vpop.f32.mrf.mxu0 }
 0x39c   : > { %v4361_v34 = vpop.f32.mrf.mxu1  ;;  %v4401_v57 = vpop.f32.mrf.mxu2  ;;  %v4358_v3 = vadd.f32 %v4357_v4, %v4300_v19 }
 0x39e   : > { %v4445_v8 = vpop.f32.mrf.mxu3 }
 0x3a3   : > { %v4308_v48 = vpop.f32.mrf.mxu0 }
 0x3a4   : > { %v4406_v50 = vpop.f32.mrf.mxu2  ;;  %v4521_v11 = vpop.f32.mrf.mxu1  ;;  %v4362_v33 = vadd.f32 %v4361_v34, %v4308_v48 }
 0x3a6   : > { %v4451_v15 = vpop.f32.mrf.mxu3  ;;  %v4407_v12 = vadd.f32 %v4406_v50, %v4362_v33 }
 0x3a8   : > { %v4452_v36 = vadd.f32 %v4451_v15, %v4407_v12  ;;  %v8611_v12 = vld [vmem:[#allocation13_spill] sm:$0xff] }
 0x3ab   : > { %v4484_v46 = vpop.f32.mrf.mxu0 }
 0x3ac   : > { %v4525_v17 = vpop.f32.mrf.mxu1  ;;  %v8089_v61 = vpop.f32.mrf.mxu2 }
 0x3ad   : > { %8603 = vst [vmem:[#allocation24_spill] sm:$0xff] %v8089_v61  ;;  %v4402_v61 = vadd.f32 %v4401_v57, %v4358_v3 }
 0x3ae   : > { %v8091_v26 = vpop.f32.mrf.mxu3 }
 0x3af   : > { %8604 = vst [vmem:[#allocation25_spill] sm:$0xff] %v8091_v26  ;;  %v4397_v26 = vadd.f32 %v4396_v35, %v4354_v2  ;;  %v4446_v23 = vadd.f32 %v4445_v8, %v4402_v61  ;;  %v4434_v2 = vadd.f32 %v4433_v28, %v4392_v45  ;;  %v2698_v61 = vadd.f32 %v7640_v40, %v2654_v58 }
 0x3b0   : > { %v4818_v45 = vsel %vm269_vm0, %v2822_v22, 0 }
 0x3b1   : > { %v4440_v13 = vadd.f32 %v4439_v63, %v4397_v26  ;;  %v4485_v52 = vadd.f32 %v4484_v46, %v4434_v2  ;;  %v8119_v26 = vsub.f32 %v4815_v47, %v8110_v53  ;;  %v2742_v40 = vadd.f32 %v7634_v24, %v2698_v61  ;;  %v8610_v2 = vld [vmem:[#allocation17_spill] sm:$0xff] }
 0x3b3   : > { %v4488_v1 = vpop.f32.mrf.mxu0  ;;  %v4522_v46 = vadd.f32 %v4521_v11, %v4485_v52  ;;  %v2789_v55 = vadd.f32 %v7734_v18, %v2742_v40 }
 0x3b4   : > { %v4529_v42 = vpop.f32.mrf.mxu1  ;;  %v8097_v37 = vpop.f32.mrf.mxu2  ;;  %v4489_v27 = vadd.f32 %v4488_v1, %v4440_v13  ;;  %v3995_v1 = vadd.f32 %v8034_v43, %v7497_v30  ;;  %v8135_v30 = vand.u32 4294901760, %v8119_v26  ;;  %v8137_v43 = vand.u32 4294901760, %v4818_v45 }
 0x3b5   : > { %v2826_v57 = vadd.f32 %v7747_v10, %v2789_v55  ;;  %v8148_v8 = vand.u32 4294901760, %v4522_v46  ;;  %v8616_v55 = vld [vmem:[#allocation16_spill] sm:$0xff] }
 0x3b6   : > { %v8101_v32 = vpop.f32.mrf.mxu3  ;;  %v4526_v41 = vadd.f32 %v4525_v17, %v4489_v27  ;;  %v4064_v17 = vadd.f32 %v8041_v56, %v4003_v39  ;;  %v4060_v54 = vadd.f32 %v8036_v29, %v3995_v1  ;;  %v8606_v56 = vld [vmem:[#allocation10_spill] sm:$0xff]  ;;  %v8161_v15 = vsub.f32 %v4818_v45, %v8137_v43 }
 0x3b7   : > { %v2703_v34 = vadd.f32 %v8606_v56, %v2658_v51  ;;  %v4849_v47 = vsub.f32 %v8119_v26, %v8135_v30  ;;  %v8178_v13 = vsub.f32 %v4522_v46, %v8148_v8  ;;  %v8613_v51 = vld [vmem:[#allocation6_spill] sm:$0xff] }
 0x3b8   : > { %v8140_v24 = vand.u32 4294901760, %v4526_v41  ;;  %v4107_v63 = vadd.f32 %v8067_v44, %v4064_v17  ;;  %v4102_v18 = vadd.f32 %v8059_v60, %v4060_v54  ;;  %v4068_v44 = vadd.f32 %v8049_v9, %v4011_v6  ;;  %v8615_v17 = vld [vmem:[#allocation3_spill] sm:$0xff] }
 0x3b9   : > { %v4821_v9 = vsel %vm269_vm0, %v2826_v57, 0  ;;  %v8199_v1 = vand.u32 4294901760, %v8161_v15 }
 0x3ba   : > { %v4150_v29 = vadd.f32 %v8065_v21, %v4107_v63  ;;  %v8164_v10 = vsub.f32 %v4526_v41, %v8140_v24  ;;  %v4144_v0 = vadd.f32 %v8057_v7, %v4102_v18  ;;  %v8607_v21 = vld [vmem:[#allocation7_spill] sm:$0xff]  ;;  %v8608_v7 = vld [vmem:[#allocation14_spill] sm:$0xff] }
 0x3bb   : > { %v4492_v16 = vpop.f32.mrf.mxu0  ;;  %v2748_v33 = vadd.f32 %v8607_v21, %v2703_v34  ;;  %v8617_v34 = vld [vmem:[#allocation21_spill] sm:$0xff]  ;;  %v8619_v21 = vld [vmem:[#allocation20_spill] sm:$0xff] }
 0x3bc   : > { %v4493_v20 = vadd.f32 %v4492_v16, %v4446_v23  ;;  %v8108_v49 = vpop.f32.mrf.mxu2  ;;  %v4533_v3 = vpop.f32.mrf.mxu1  ;;  %v4112_v23 = vadd.f32 %v8075_v31, %v4068_v44  ;;  %v4019_v31 = vadd.f32 %v8053_v25, %v8608_v7  ;;  %v4905_v52 = vand.u32 4294901760, %v8164_v10 }
 0x3bd   : > { %v2793_v61 = vadd.f32 %v8611_v12, %v2748_v33  ;;  %v8196_v25 = vand.u32 4294901760, %v4849_v47  ;;  %v8620_v33 = vld [vmem:[#allocation24_spill] sm:$0xff] }
 0x3be   : > { %v8113_v5 = vpop.f32.mrf.mxu3  ;;  %v4530_v59 = vadd.f32 %v4529_v42, %v4493_v20  ;;  %v4199_v20 = vadd.f32 %v8609_v14, %v4150_v29  ;;  %v4156_v27 = vadd.f32 %v8610_v2, %v4112_v23  ;;  %v4906_v56 = vsub.f32 %v8164_v10, %v4905_v52 }
 0x3bf   : > { %v2830_v40 = vadd.f32 %v8613_v51, %v2793_v61 }
 0x3c0   : > { %v8127_v42 = vand.u32 4294901760, %v4530_v59  ;;  %v4203_v6 = vadd.f32 %v8614_v62, %v4156_v27  ;;  %v4236_v54 = vadd.f32 %v8616_v55, %v4199_v20  ;;  %v4907_v20 = vand.u32 4294901760, %v4906_v56 }
 0x3c2   : > { %v8153_v50 = vsub.f32 %v4530_v59, %v8127_v42  ;;  %v8612_v59 = vld [vmem:[#allocation2_spill] sm:$0xff]  ;;  %v4571_v29 = vadd.f32 %v8097_v37, %v4236_v54 }
 0x3c3   : > { %v4496_v28 = vpop.f32.mrf.mxu0  ;;  %v4195_v39 = vadd.f32 %v8612_v59, %v4144_v0 }
 0x3c4   : > { %v4497_v4 = vadd.f32 %v4496_v28, %v4452_v36  ;;  %v8132_v35 = vpop.f32.mrf.mxu2  ;;  %v8150_v48 = vpop.f32.mrf.mxu1  ;;  %v4899_v16 = vand.u32 4294901760, %v8153_v50  ;;  %v8201_v36 = vand.u32 4294901760, %v4821_v9  ;;  %v4911_v28 = vand.u32 4294901760, %v8178_v13 }
 0x3c5   : > { %v4632_v2 = vadd.f32 %v8101_v32, %v4571_v29 }
 0x3c6   : > { %v4534_v19 = vadd.f32 %v4533_v3, %v4497_v4  ;;  %v8144_v38 = vpop.f32.mrf.mxu3  ;;  %v4900_v46 = vsub.f32 %v8153_v50, %v4899_v16  ;;  %v4072_v4 = vadd.f32 %v8615_v17, %v4019_v31  ;;  %v8220_v44 = vsub.f32 %v4821_v9, %v8201_v36  ;;  %v8621_v31 = vld [vmem:[#allocation19_spill] sm:$0xff] }
 0x3c7   : > { %v4912_v23 = vsub.f32 %v8178_v13, %v4911_v28  ;;  %v4240_v14 = vadd.f32 %v8621_v31, %v4203_v6  ;;  %v8624_v6 = vld [vmem:[#allocation23_spill] sm:$0xff] }
 0x3c8   : > { %v8158_v11 = vand.u32 4294901760, %v4534_v19  ;;  %v4117_v57 = vadd.f32 %v8617_v34, %v4072_v4  ;;  %v4901_v0 = vand.u32 4294901760, %v4900_v46  ;;  %v8238_v59 = vand.u32 4294901760, %v8220_v44 }
 0x3c9   : > { %v4913_v12 = vand.u32 4294901760, %v4912_v23 }
 0x3ca   : > { %v4892_v60 = vsub.f32 %v4534_v19, %v8158_v11  ;;  %4839 = vmatpush.msra.mxu0 %v8158_v11  ;;  %4990 = vmatpush.msra.mxu3 %v8158_v11  ;;  %v4162_v37 = vadd.f32 %v8619_v21, %v4117_v57 }
 0x3cb   : > { %v8175_v58 = vpop.f32.mrf.mxu0 }
 0x3cc   : > { %v8185_v3 = vpop.f32.mrf.mxu2  ;;  %4841 = vmatpush.msra.mxu0 %v8127_v42  ;;  %4946 = vmatpush.msra.mxu2 %v4892_v60  ;;  %v4893_v22 = vand.u32 4294901760, %v4892_v60  ;;  %v4717_v19 = vpop.f32.mrf.mxu1 }
 0x3cd   : > { %4992 = vmatpush.msra.mxu3 %v8127_v42 }
 0x3ce   : > { %v8192_v41 = vpop.f32.mrf.mxu3  ;;  %4843 = vmatpush.msra.mxu0 %v8140_v24  ;;  %4949 = vmatpush.msra.mxu2 %v8153_v50  ;;  %v4894_v45 = vsub.f32 %v4892_v60, %v4893_v22  ;;  %v8618_v50 = vld [vmem:[#allocation4_spill] sm:$0xff]  ;;  %v4824_v60 = vsel %vm269_vm0, %v2830_v40, 0 }
 0x3cf   : > { %4994 = vmatpush.msra.mxu3 %v8140_v24  ;;  %v4232_v18 = vadd.f32 %v8618_v50, %v4195_v39  ;;  %v8622_v39 = vld [vmem:[#allocation22_spill] sm:$0xff] }
 0x3d0   : > { %4845 = vmatpush.msra.mxu0 %v8148_v8  ;;  %4952 = vmatpush.msra.mxu2 %v8164_v10  ;;  %v4895_v63 = vand.u32 4294901760, %v4894_v45  ;;  %v4857_v10 = vsub.f32 %v8161_v15, %v8199_v1  ;;  %v4207_v45 = vadd.f32 %v8622_v39, %v4162_v37 }
 0x3d1   : > { %4996 = vmatpush.msra.mxu3 %v8148_v8  ;;  %4851 = vmatmul.f32.vlgmr.msra.gmra.mxu0 %v8196_v25  ;;  %v4563_v7 = vadd.f32 %v8620_v33, %v4232_v18 }
 0x3d2   : > { %5000 = vmatmul.f32.vlgmr.msra.gmra.mxu3 %v8135_v30  ;;  %5037 = vmatpush.msrb.mxu0 %v4893_v22  ;;  %v8233_v22 = vand.u32 4294901760, %v4824_v60  ;;  %v8235_v61 = vand.u32 4294901760, %v4857_v10  ;;  %v4244_v17 = vadd.f32 %v8624_v6, %v4207_v45 }
 0x3d3   : > { %4896 = vmatpush.msra.mxu1 %v4895_v63  ;;  %4955 = vmatpush.msra.mxu2 %v8178_v13  ;;  %v4674_v47 = vpop.f32.mrf.mxu0  ;;  %v4579_v13 = vadd.f32 %v8108_v49, %v4240_v14 }
 0x3d4   : > { %v4766_v9 = vpop.f32.mrf.mxu2  ;;  %4958 = vmatmul.f32.vlgmr.msra.gmra.mxu2 %v8119_v26  ;;  %5041 = vmatpush.msrb.mxu0 %v4899_v16  ;;  %v8623_v16 = vld [vmem:[#allocation25_spill] sm:$0xff]  ;;  %v4675_v40 = vadd.f32 %v4674_v47, %v4632_v2  ;;  %v4723_v46 = vpop.f32.mrf.mxu1  ;;  %v4587_v55 = vadd.f32 %v8132_v35, %v4244_v17 }
 0x3d5   : > { %4902 = vmatpush.msra.mxu1 %v4901_v0  ;;  %v4628_v51 = vadd.f32 %v8623_v16, %v4563_v7  ;;  %v4636_v32 = vadd.f32 %v8113_v5, %v4579_v13 }
 0x3d6   : > { %v4803_v27 = vpop.f32.mrf.mxu3  ;;  %5045 = vmatpush.msrb.mxu0 %v4905_v52  ;;  %v8248_v52 = vsub.f32 %v4824_v60, %v8233_v22  ;;  %v4718_v4 = vadd.f32 %v4717_v19, %v4675_v40 }
 0x3d7   : > { %4908 = vmatpush.msra.mxu1 %v4907_v20  ;;  %v4670_v49 = vadd.f32 %v8175_v58, %v4628_v51 }
 0x3d8   : > { %5049 = vmatpush.msrb.mxu0 %v4911_v28  ;;  %v4865_v28 = vsub.f32 %v8220_v44, %v8238_v59  ;;  %v8262_v34 = vand.u32 4294901760, %v8248_v52  ;;  %v4767_v19 = vadd.f32 %v4766_v9, %v4718_v4 }
 0x3d9   : > { %4914 = vmatpush.msra.mxu1 %v4913_v12  ;;  %4859 = vmatmul.f32.gmra.mxu0 %v8235_v61  ;;  %v4712_v54 = vadd.f32 %v8150_v48, %v4670_v49 }
 0x3da   : > { %4916 = vmatmul.f32.vlgmr.msra.gmra.mxu1 %v8110_v53  ;;  %5006 = vmatmul.f32.gmra.mxu3 %v8199_v1  ;;  %v4873_v50 = vsub.f32 %v8248_v52, %v8262_v34  ;;  %v4804_v18 = vadd.f32 %v4803_v27, %v4767_v19 }
 0x3db   : > { %5080 = vmatpush.msrb.mxu1 %v8158_v11  ;;  %v4679_v62 = vpop.f32.mrf.mxu0  ;;  %v8259_v11 = vand.u32 4294901760, %v4865_v28  ;;  %v4763_v35 = vadd.f32 %v8185_v3, %v4712_v54 }
 0x3dc   : > { %v4680_v5 = vadd.f32 %v4679_v62, %v4636_v32  ;;  %4963 = vmatmul.f32.gmra.mxu2 %v8161_v15  ;;  %v4770_v58 = vpop.f32.mrf.mxu2  ;;  %v8274_v3 = vand.u32 4294901760, %v4873_v50  ;;  %v5120_v10 = vand.u32 4294901760, %v4804_v18 }
 0x3dd   : > { %5082 = vmatpush.msrb.mxu1 %v8127_v42  ;;  %v4640_v42 = vadd.f32 %v8144_v38, %v4587_v55  ;;  %v4800_v47 = vadd.f32 %v8192_v41, %v4763_v35 }
 0x3de   : > { %v4724_v63 = vadd.f32 %v4723_v46, %v4680_v5  ;;  %v4807_v56 = vpop.f32.mrf.mxu3  ;;  %v5182_v31 = vsub.f32 %v4804_v18, %v5120_v10 }
 0x3df   : > { %5084 = vmatpush.msrb.mxu1 %v8140_v24  ;;  %v5122_v37 = vand.u32 4294901760, %v4800_v47 }
 0x3e0   : > { %v4771_v57 = vadd.f32 %v4770_v58, %v4724_v63  ;;  %v5183_v13 = vand.u32 4294901760, %v5182_v31 }
 0x3e1   : > { %5086 = vmatpush.msrb.mxu1 %v8148_v8  ;;  %4867 = vmatmul.f32.gmra.mxu0 %v8259_v11  ;;  %v4729_v8 = vpop.f32.mrf.mxu1  ;;  %v5188_v41 = vsub.f32 %v4800_v47, %v5122_v37 }
 0x3e2   : > { %v4808_v48 = vadd.f32 %v4807_v56, %v4771_v57  ;;  %4920 = vmatmul.f32.gmra.mxu1 %v8137_v43  ;;  %5012 = vmatmul.f32.gmra.mxu3 %v8238_v59  ;;  %v5184_v16 = vsub.f32 %v5182_v31, %v5183_v13 }
 0x3e3   : > { %v4684_v24 = vpop.f32.mrf.mxu0  ;;  %v5189_v39 = vand.u32 4294901760, %v5188_v41 }
 0x3e4   : > { %v4685_v29 = vadd.f32 %v4684_v24, %v4640_v42  ;;  %4968 = vmatmul.f32.gmra.mxu2 %v8220_v44  ;;  %v5118_v0 = vand.u32 4294901760, %v4808_v48  ;;  %v4774_v23 = vpop.f32.mrf.mxu2  ;;  %v5185_v32 = vand.u32 4294901760, %v5184_v16 }
 0x3e5   : > { %v5190_v40 = vsub.f32 %v5188_v41, %v5189_v39 }
 0x3e6   : > { %v4730_v38 = vadd.f32 %v4729_v8, %v4685_v29  ;;  %v4811_v21 = vpop.f32.mrf.mxu3  ;;  %v5176_v33 = vsub.f32 %v4808_v48, %v5118_v0 }
 0x3e7   : > { %v5191_v49 = vand.u32 4294901760, %v5190_v40 }
 0x3e8   : > { %v4775_v60 = vadd.f32 %v4774_v23, %v4730_v38  ;;  %v5177_v20 = vand.u32 4294901760, %v5176_v33 }
 0x3e9   : > { %4875 = vmatmul.f32.gmra.mxu0 %v8274_v3 }
 0x3ea   : > { %v4812_v7 = vadd.f32 %v4811_v21, %v4775_v60  ;;  %4924 = vmatmul.f32.gmra.mxu1 %v8201_v36  ;;  %5018 = vmatmul.f32.gmra.mxu3 %v8262_v34  ;;  %v5178_v12 = vsub.f32 %v5176_v33, %v5177_v20  ;;  %v5387_v21 = vld [vmem:[%s8325_s27 + $0x28] sm:$0xff] }
 0x3ec   : > { %v5116_v14 = vand.u32 4294901760, %v4812_v7  ;;  %4973 = vmatmul.f32.gmra.mxu2 %v8248_v52  ;;  %v5179_v51 = vand.u32 4294901760, %v5178_v12 }
 0x3ee   : > { %v5170_v9 = vsub.f32 %v4812_v7, %v5116_v14  ;;  %5117 = vmatpush.msrb.mxu2 %v5116_v14  ;;  %5268 = vmatpush.msra.mxu1 %v5116_v14 }
 0x3f0   : > { %5119 = vmatpush.msrb.mxu2 %v5118_v0  ;;  %5224 = vmatpush.msra.mxu0 %v5170_v9  ;;  %v5171_v2 = vand.u32 4294901760, %v5170_v9 }
 0x3f1   : > { %5270 = vmatpush.msra.mxu1 %v5118_v0  ;;  %5051 = vmatmul.f32.vlgmr.msrb.gmra.mxu0 %v8110_v53 }
 0x3f2   : > { %4928 = vmatmul.f32.gmra.mxu1 %v8233_v22  ;;  %5121 = vmatpush.msrb.mxu2 %v5120_v10  ;;  %v5172_v27 = vsub.f32 %v5170_v9, %v5171_v2 }
 0x3f3   : > { %5227 = vmatpush.msra.mxu0 %v5176_v33  ;;  %5272 = vmatpush.msra.mxu1 %v5120_v10  ;;  %v8347_v33 = vand.u32 4294901760, %v5387_v21 }
 0x3f4   : > { %5123 = vmatpush.msrb.mxu2 %v5122_v37  ;;  %v5173_v45 = vand.u32 4294901760, %v5172_v27  ;;  %v5383_v27 = vld [vmem:[%s8325_s27 + $0x8] sm:$0xff] }
 0x3f5   : > { %5230 = vmatpush.msra.mxu0 %v5182_v31  ;;  %5274 = vmatpush.msra.mxu1 %v5122_v37  ;;  %v8361_v16 = vand.u32 4294901760, %v5383_v27 }
 0x3f6   : > { %5129 = vmatmul.f32.vlgmr.msrb.gmra.mxu2 %v8196_v25  ;;  %5174 = vmatpush.msrb.mxu3 %v5173_v45 }
 0x3f7   : > { %5315 = vmatpush.msra.mxu2 %v5171_v2  ;;  %5233 = vmatpush.msra.mxu0 %v5188_v41 }
 0x3f8   : > { %5180 = vmatpush.msrb.mxu3 %v5179_v51 }
 0x3f9   : > { %5319 = vmatpush.msra.mxu2 %v5177_v20  ;;  %5055 = vmatmul.f32.gmra.mxu0 %v8137_v43  ;;  %v8355_v20 = vsub.f32 %v5387_v21, %v8347_v33 }
 0x3fa   : > { %5088 = vmatmul.f32.vlgmr.msrb.gmra.mxu1 %v8110_v53  ;;  %5186 = vmatpush.msrb.mxu3 %v5185_v32 }
 0x3fb   : > { %5323 = vmatpush.msra.mxu2 %v5183_v13  ;;  %v5773_v45 = vand.u32 4294901760, %v8355_v20 }
 0x3fc   : > { %5192 = vmatpush.msrb.mxu3 %v5191_v49 }
 0x3fd   : > { %5327 = vmatpush.msra.mxu2 %v5189_v39  ;;  %5194 = vmatmul.f32.vlgmr.msrb.gmra.mxu3 %v8110_v53 }
 0x3fe   : > { %5137 = vmatmul.f32.gmra.mxu2 %v8235_v61  ;;  %5358 = vmatpush.msra.mxu3 %v5116_v14  ;;  %v5382_v61 = vld [vmem:[%s8325_s27] sm:$0xff]  ;;  %v5385_v14 = vld [vmem:[%s8325_s27 + $0x18] sm:$0xff] }
 0x3ff   : > { %v5440_v62 = vand.u32 4294901760, %v5382_v61  ;;  %v8352_v9 = vand.u32 4294901760, %v5385_v14 }
 0x400   : > { %5360 = vmatpush.msra.mxu3 %v5118_v0 }
 0x401   : > { %5059 = vmatmul.f32.gmra.mxu0 %v8201_v36  ;;  %v5506_v4 = vsub.f32 %v5382_v61, %v5440_v62  ;;  %v8366_v49 = vsub.f32 %v5385_v14, %v8352_v9 }
 0x402   : > { %5092 = vmatmul.f32.gmra.mxu1 %v8137_v43  ;;  %5362 = vmatpush.msra.mxu3 %v5120_v10 }
 0x403   : > { %v5507_v56 = vand.u32 4294901760, %v5506_v4 }
 0x404   : > { %5364 = vmatpush.msra.mxu3 %v5122_v37 }
 0x405   : > { %5198 = vmatmul.f32.gmra.mxu3 %v8137_v43 }
 0x406   : > { %5145 = vmatmul.f32.gmra.mxu2 %v8259_v11 }
 0x409   : > { %5063 = vmatmul.f32.gmra.mxu0 %v8233_v22 }
 0x40a   : > { %5096 = vmatmul.f32.gmra.mxu1 %v8201_v36 }
 0x40d   : > { %5202 = vmatmul.f32.gmra.mxu3 %v8201_v36 }
 0x40e   : > { %5153 = vmatmul.f32.gmra.mxu2 %v8274_v3  ;;  %v5389_v3 = vld [vmem:[%s8325_s27 + $0x38] sm:$0xff] }
 0x40f   : > { %v8340_v60 = vand.u32 4294901760, %v5389_v3 }
 0x411   : > { %5236 = vmatmul.f32.vlgmr.msra.gmra.mxu0 %v8119_v26  ;;  %v8345_v37 = vsub.f32 %v5389_v3, %v8340_v60 }
 0x412   : > { %5100 = vmatmul.f32.gmra.mxu1 %v8233_v22 }
 0x413   : > { %v5767_v41 = vand.u32 4294901760, %v8345_v37 }
 0x415   : > { %5206 = vmatmul.f32.gmra.mxu3 %v8233_v22  ;;  %v5768_v39 = vsub.f32 %v8345_v37, %v5767_v41 }
 0x416   : > { %5329 = vmatmul.f32.vlgmr.msra.gmra.mxu2 %v8110_v53 }
 0x419   : > { %5241 = vmatmul.f32.gmra.mxu0 %v8161_v15 }
 0x41a   : > { %5278 = vmatmul.f32.vlgmr.msra.gmra.mxu1 %v8135_v30 }
 0x41d   : > { %5366 = vmatmul.f32.vlgmr.msra.gmra.mxu3 %v8110_v53  ;;  %v5388_v53 = vld [vmem:[%s8325_s27 + $0x30] sm:$0xff] }
 0x41e   : > { %5333 = vmatmul.f32.gmra.mxu2 %v8137_v43  ;;  %v5434_v26 = vand.u32 4294901760, %v5388_v53 }
 0x420   : > { %v5488_v15 = vsub.f32 %v5388_v53, %v5434_v26  ;;  %5586 = vmatpush.msrb.mxu3 %v5434_v26  ;;  %5435 = vmatpush.msrb.mxu0 %v5434_v26 }
 0x421   : > { %5246 = vmatmul.f32.gmra.mxu0 %v8220_v44 }
 0x422   : > { %5284 = vmatmul.f32.gmra.mxu1 %v8199_v1  ;;  %v5384_v1 = vld [vmem:[%s8325_s27 + $0x10] sm:$0xff]  ;;  %5542 = vmatpush.msrb.mxu2 %v5488_v15 }
 0x425   : > { %5370 = vmatmul.f32.gmra.mxu3 %v8137_v43  ;;  %v5386_v43 = vld [vmem:[%s8325_s27 + $0x20] sm:$0xff] }
 0x426   : > { %5337 = vmatmul.f32.gmra.mxu2 %v8201_v36  ;;  %v5436_v25 = vand.u32 4294901760, %v5386_v43 }
 0x428   : > { %v5494_v44 = vsub.f32 %v5386_v43, %v5436_v25  ;;  %5588 = vmatpush.msrb.mxu3 %v5436_v25  ;;  %5437 = vmatpush.msrb.mxu0 %v5436_v25  ;;  %v8373_v43 = vsub.f32 %v5383_v27, %v8361_v16 }
 0x429   : > { %5251 = vmatmul.f32.gmra.mxu0 %v8248_v52 }
 0x42a   : > { %5290 = vmatmul.f32.gmra.mxu1 %v8238_v59  ;;  %v5495_v52 = vand.u32 4294901760, %v5494_v44  ;;  %5545 = vmatpush.msrb.mxu2 %v5494_v44 }
 0x42c   : > { %v5496_v6 = vsub.f32 %v5494_v44, %v5495_v52  ;;  %v5785_v44 = vand.u32 4294901760, %v8373_v43 }
 0x42d   : > { %5374 = vmatmul.f32.gmra.mxu3 %v8201_v36  ;;  %v5489_v36 = vand.u32 4294901760, %v5488_v15 }
 0x42e   : > { %5341 = vmatmul.f32.gmra.mxu2 %v8233_v22  ;;  %v5497_v54 = vand.u32 4294901760, %v5496_v6 }
 0x42f   : > { %v5490_v59 = vsub.f32 %v5488_v15, %v5489_v36 }
 0x431   : > { %v5491_v28 = vand.u32 4294901760, %v5490_v59 }
 0x432   : > { %5296 = vmatmul.f32.gmra.mxu1 %v8262_v34  ;;  %v5508_v34 = vsub.f32 %v5506_v4, %v5507_v56 }
 0x433   : > { %5492 = vmatpush.msrb.mxu1 %v5491_v28 }
 0x434   : > { %v5509_v57 = vand.u32 4294901760, %v5508_v34 }
 0x435   : > { %5378 = vmatmul.f32.gmra.mxu3 %v8233_v22  ;;  %v5438_v22 = vand.u32 4294901760, %v5384_v1  ;;  %5498 = vmatpush.msrb.mxu1 %v5497_v54 }
 0x437   : > { %v5500_v46 = vsub.f32 %v5384_v1, %v5438_v22  ;;  %5590 = vmatpush.msrb.mxu3 %v5438_v22  ;;  %5439 = vmatpush.msrb.mxu0 %v5438_v22 }
 0x439   : > { %v5501_v17 = vand.u32 4294901760, %v5500_v46  ;;  %5548 = vmatpush.msrb.mxu2 %v5500_v46  ;;  %5592 = vmatpush.msrb.mxu3 %v5440_v62 }
 0x43a   : > { %5441 = vmatpush.msrb.mxu0 %v5440_v62 }
 0x43b   : > { %v5502_v63 = vsub.f32 %v5500_v46, %v5501_v17  ;;  %5551 = vmatpush.msrb.mxu2 %v5506_v4  ;;  %v5786_v46 = vsub.f32 %v8373_v43, %v5785_v44 }
 0x43c   : > { %5633 = vmatpush.msra.mxu0 %v5489_v36 }
 0x43d   : > { %v5503_v11 = vand.u32 4294901760, %v5502_v63  ;;  %5713 = vmatpush.msra.mxu2 %v8340_v60 }
 0x43e   : > { %5637 = vmatpush.msra.mxu0 %v5495_v52 }
 0x43f   : > { %5504 = vmatpush.msrb.mxu1 %v5503_v11  ;;  %5715 = vmatpush.msra.mxu2 %v8347_v33 }
 0x440   : > { %5641 = vmatpush.msra.mxu0 %v5501_v17 }
 0x441   : > { %5510 = vmatpush.msrb.mxu1 %v5509_v57  ;;  %5717 = vmatpush.msra.mxu2 %v8352_v9  ;;  %v6145_v57 = vmov 0  }
 0x442   : > { %5645 = vmatpush.msra.mxu0 %v5507_v56  ;;  %6135 = vset.pattern.permute.xlu0 %v6145_v57 }
 0x443   : > { %5676 = vmatpush.msra.mxu1 %v5434_v26  ;;  %v5769_v26 = vand.u32 4294901760, %v5768_v39  ;;  %5719 = vmatpush.msra.mxu2 %v8361_v16  ;;  %v8625_v39 = vld [vmem:[#allocation8_spill] sm:$0xff] }
 0x444   : > { %6136 = vset.pattern.permute.xlu1 %v6145_v57 }
 0x445   : > { %5678 = vmatpush.msra.mxu1 %v5436_v25  ;;  %v5779_v25 = vand.u32 4294901760, %v8366_v49  ;;  %5770 = vmatpush.msra.mxu3 %v5769_v26 }
 0x447   : > { %5680 = vmatpush.msra.mxu1 %v5438_v22  ;;  %v5780_v59 = vsub.f32 %v8366_v49, %v5779_v25 }
 0x449   : > { %5682 = vmatpush.msra.mxu1 %v5440_v62  ;;  %v5781_v6 = vand.u32 4294901760, %v5780_v59 }
 0x44e   : > { %v4852_v30 = vpop.f32.mrf.mxu0 }
 0x455   : > { %v5001_v19 = vpop.f32.mrf.mxu3 }
 0x456   : > { %v4860_v5 = vpop.f32.mrf.mxu0 }
 0x457   : > { %v4917_v58 = vpop.f32.mrf.mxu1  ;;  %v4959_v55 = vpop.f32.mrf.mxu2 }
 0x458   : > { %v4918_v8 = vadd.f32 %v4917_v58, %v4852_v30  ;;  %v5774_v30 = vsub.f32 %v8355_v20, %v5773_v45 }
 0x45a   : > { %v4960_v23 = vadd.f32 %v4959_v55, %v4918_v8  ;;  %v5775_v36 = vand.u32 4294901760, %v5774_v30 }
 0x45c   : > { %v5002_v31 = vadd.f32 %v5001_v19, %v4960_v23  ;;  %5776 = vmatpush.msra.mxu3 %v5775_v36  ;;  %v8626_v36 = vld [vmem:[#allocation11_spill] sm:$0xff] }
 0x45d   : > { %v5007_v24 = vpop.f32.mrf.mxu3 }
 0x45e   : > { %v4868_v42 = vpop.f32.mrf.mxu0  ;;  %5782 = vmatpush.msra.mxu3 %v5781_v6 }
 0x45f   : > { %v4921_v35 = vpop.f32.mrf.mxu1  ;;  %v4964_v48 = vpop.f32.mrf.mxu2 }
 0x460   : > { %v4922_v7 = vadd.f32 %v4921_v35, %v4860_v5  ;;  %v5787_v5 = vand.u32 4294901760, %v5786_v46 }
 0x462   : > { %v4965_v51 = vadd.f32 %v4964_v48, %v4922_v7  ;;  %5788 = vmatpush.msra.mxu3 %v5787_v5 }
 0x464   : > { %v5008_v61 = vadd.f32 %v5007_v24, %v4965_v51 }
 0x465   : > { %v8333_v47 = vpop.f32.mrf.mxu3 }
 0x466   : > { %v8331_v50 = vpop.f32.mrf.mxu0 }
 0x467   : > { %v4925_v18 = vpop.f32.mrf.mxu1  ;;  %v4969_v29 = vpop.f32.mrf.mxu2 }
 0x468   : > { %v4926_v22 = vadd.f32 %v4925_v18, %v4868_v42 }
 0x46a   : > { %v4970_v58 = vadd.f32 %v4969_v29, %v4926_v22 }
 0x46c   : > { %v5014_v35 = vadd.f32 %v8333_v47, %v4970_v58  ;;  %v8627_v58 = vld [vmem:[#allocation9_spill] sm:$0xff] }
 0x46d   : > { %v8363_v40 = vpop.f32.mrf.mxu3 }
 0x46e   : > { %v5052_v0 = vpop.f32.mrf.mxu0 }
 0x46f   : > { %v8335_v38 = vpop.f32.mrf.mxu1  ;;  %v8338_v10 = vpop.f32.mrf.mxu2  ;;  %v5053_v2 = vadd.f32 %v5052_v0, %v5002_v31 }
 0x470   : > { %v4930_v42 = vadd.f32 %v8335_v38, %v8331_v50 }
 0x472   : > { %v4975_v8 = vadd.f32 %v8338_v10, %v4930_v42 }
 0x474   : > { %v5020_v21 = vadd.f32 %v8363_v40, %v4975_v8 }
 0x476   : > { %v5056_v13 = vpop.f32.mrf.mxu0 }
 0x477   : > { %v5089_v12 = vpop.f32.mrf.mxu1  ;;  %v5057_v62 = vadd.f32 %v5056_v13, %v5008_v61 }
 0x478   : > { %v5090_v32 = vadd.f32 %v5089_v12, %v5053_v2 }
 0x479   : > { %v8368_v53 = vpop.f32.mrf.mxu2 }
 0x47a   : > { %v5411_v15 = vsel %vm269_vm0, %v5090_v32, 0 }
 0x47b   : > { %v8377_v1 = vand.u32 4294901760, %v5411_v15 }
 0x47d   : > { %v8382_v52 = vsub.f32 %v5411_v15, %v8377_v1  ;;  %5512 = vmatmul.f32.vlgmr.msrb.gmra.mxu1 %v8377_v1 }
 0x47e   : > { %v5060_v28 = vpop.f32.mrf.mxu0  ;;  %5864 = vmatpush.msrb.mxu1 %v8340_v60 }
 0x47f   : > { %v8388_v17 = vand.u32 4294901760, %v8382_v52  ;;  %v5093_v4 = vpop.f32.mrf.mxu1  ;;  %5554 = vmatmul.f32.vlgmr.msrb.gmra.mxu2 %v8382_v52  ;;  %v5061_v24 = vadd.f32 %v5060_v28, %v5014_v35 }
 0x480   : > { %v5094_v55 = vadd.f32 %v5093_v4, %v5057_v62  ;;  %v8391_v54 = vpop.f32.mrf.mxu3  ;;  %5866 = vmatpush.msrb.mxu1 %v8347_v33  ;;  %5911 = vmatpush.msrb.mxu2 %v5767_v41 }
 0x481   : > { %v5445_v63 = vsub.f32 %v8382_v52, %v8388_v17  ;;  %v8396_v56 = vpop.f32.mrf.mxu2  ;;  %5596 = vmatmul.f32.vlgmr.msrb.gmra.mxu3 %v8388_v17 }
 0x482   : > { %v5414_v11 = vsel %vm269_vm0, %v5094_v55, 0  ;;  %5868 = vmatpush.msrb.mxu1 %v8352_v9  ;;  %5915 = vmatpush.msrb.mxu2 %v5773_v45  ;;  %v5131_v45 = vadd.f32 %v8368_v53, %v8625_v39 }
 0x483   : > { %v8401_v34 = vand.u32 4294901760, %v5414_v11  ;;  %v8403_v19 = vand.u32 4294901760, %v5445_v63  ;;  %5954 = vmatpush.msrb.mxu3 %v8340_v60 }
 0x484   : > { %5870 = vmatpush.msrb.mxu1 %v8361_v16  ;;  %5919 = vmatpush.msrb.mxu2 %v5779_v25  ;;  %v5196_v51 = vadd.f32 %v8391_v54, %v5131_v45 }
 0x485   : > { %v8410_v48 = vsub.f32 %v5414_v11, %v8401_v34  ;;  %5447 = vmatmul.f32.vlgmr.msrb.gmra.mxu0 %v8403_v19  ;;  %5516 = vmatmul.f32.gmra.mxu1 %v8401_v34 }
 0x486   : > { %v5064_v18 = vpop.f32.mrf.mxu0  ;;  %5956 = vmatpush.msrb.mxu3 %v8347_v33  ;;  %5820 = vmatpush.msrb.mxu0 %v8345_v37 }
 0x487   : > { %v5097_v29 = vpop.f32.mrf.mxu1  ;;  %5559 = vmatmul.f32.gmra.mxu2 %v8410_v48  ;;  %v8417_v50 = vand.u32 4294901760, %v8410_v48  ;;  %v5065_v33 = vadd.f32 %v5064_v18, %v5020_v21 }
 0x488   : > { %v5098_v47 = vadd.f32 %v5097_v29, %v5061_v24  ;;  %v5199_v0 = vpop.f32.mrf.mxu3  ;;  %5923 = vmatpush.msrb.mxu2 %v5785_v44  ;;  %5958 = vmatpush.msrb.mxu3 %v8352_v9  ;;  %v5139_v44 = vadd.f32 %v8396_v56, %v8626_v36  ;;  %v8628_v24 = vld [vmem:[#allocation15_spill] sm:$0xff] }
 0x489   : > { %v5146_v38 = vpop.f32.mrf.mxu2  ;;  %5602 = vmatmul.f32.gmra.mxu3 %v8417_v50  ;;  %v5453_v23 = vsub.f32 %v8410_v48, %v8417_v50  ;;  %5823 = vmatpush.msrb.mxu0 %v8355_v20 }
 0x48a   : > { %v5417_v3 = vsel %vm269_vm0, %v5098_v47, 0  ;;  %5960 = vmatpush.msrb.mxu3 %v8361_v16  ;;  %v5200_v22 = vadd.f32 %v5199_v0, %v5139_v44  ;;  %v5147_v55 = vadd.f32 %v5146_v38, %v8627_v58 }
 0x48b   : > { %v8428_v60 = vand.u32 4294901760, %v5417_v3  ;;  %v5454_v10 = vand.u32 4294901760, %v5453_v23  ;;  %5826 = vmatpush.msrb.mxu0 %v8366_v49 }
 0x48d   : > { %v8434_v37 = vsub.f32 %v5417_v3, %v8428_v60  ;;  %5455 = vmatmul.f32.gmra.mxu0 %v5454_v10  ;;  %5520 = vmatmul.f32.gmra.mxu1 %v8428_v60 }
 0x48e   : > { %5829 = vmatpush.msrb.mxu0 %v8373_v43  ;;  %v5237_v41 = vpop.f32.mrf.mxu0 }
 0x48f   : > { %v5101_v7 = vpop.f32.mrf.mxu1  ;;  %5564 = vmatmul.f32.gmra.mxu2 %v8434_v37  ;;  %v8440_v31 = vand.u32 4294901760, %v8434_v37  ;;  %v5238_v26 = vadd.f32 %v5237_v41, %v5196_v51 }
 0x490   : > { %v5102_v14 = vadd.f32 %v5101_v7, %v5065_v33  ;;  %v5203_v9 = vpop.f32.mrf.mxu3 }
 0x491   : > { %v5154_v20 = vpop.f32.mrf.mxu2  ;;  %5608 = vmatmul.f32.gmra.mxu3 %v8440_v31  ;;  %v5461_v2 = vsub.f32 %v8434_v37, %v8440_v31  ;;  %v5204_v54 = vadd.f32 %v5203_v9, %v5147_v55 }
 0x492   : > { %v5420_v13 = vsel %vm269_vm0, %v5102_v14, 0  ;;  %v5155_v18 = vadd.f32 %v5154_v20, %v8628_v24 }
 0x493   : > { %v8446_v27 = vand.u32 4294901760, %v5420_v13  ;;  %v5462_v12 = vand.u32 4294901760, %v5461_v2 }
 0x495   : > { %v8451_v16 = vsub.f32 %v5420_v13, %v8446_v27  ;;  %5463 = vmatmul.f32.gmra.mxu0 %v5462_v12  ;;  %5524 = vmatmul.f32.gmra.mxu1 %v8446_v27 }
 0x496   : > { %v5242_v43 = vpop.f32.mrf.mxu0 }
 0x497   : > { %v5279_v40 = vpop.f32.mrf.mxu1  ;;  %5569 = vmatmul.f32.gmra.mxu2 %v8451_v16  ;;  %v8457_v32 = vand.u32 4294901760, %v8451_v16  ;;  %v5243_v62 = vadd.f32 %v5242_v43, %v5200_v22 }
 0x498   : > { %v5207_v49 = vpop.f32.mrf.mxu3  ;;  %v5280_v15 = vadd.f32 %v5279_v40, %v5238_v26 }
 0x499   : > { %v5330_v30 = vpop.f32.mrf.mxu2  ;;  %5614 = vmatmul.f32.gmra.mxu3 %v8457_v32  ;;  %v5469_v53 = vsub.f32 %v8451_v16, %v8457_v32  ;;  %v5208_v8 = vadd.f32 %v5207_v49, %v5155_v18 }
 0x49a   : > { %v5331_v61 = vadd.f32 %v5330_v30, %v5280_v15 }
 0x49b   : > { %v5470_v25 = vand.u32 4294901760, %v5469_v53 }
 0x49d   : > { %5471 = vmatmul.f32.gmra.mxu0 %v5470_v25  ;;  %5684 = vmatmul.f32.vlgmr.msra.gmra.mxu1 %v8377_v1 }
 0x49e   : > { %v5247_v5 = vpop.f32.mrf.mxu0 }
 0x49f   : > { %v5285_v59 = vpop.f32.mrf.mxu1  ;;  %5725 = vmatmul.f32.vlgmr.msra.gmra.mxu2 %v8403_v19  ;;  %v5248_v19 = vadd.f32 %v5247_v5, %v5204_v54 }
 0x4a0   : > { %v5367_v46 = vpop.f32.mrf.mxu3  ;;  %v5286_v4 = vadd.f32 %v5285_v59, %v5243_v62 }
 0x4a1   : > { %v5334_v28 = vpop.f32.mrf.mxu2  ;;  %v5368_v6 = vadd.f32 %v5367_v46, %v5331_v61  ;;  %5790 = vmatmul.f32.vlgmr.msra.gmra.mxu3 %v8377_v1 }
 0x4a2   : > { %v5335_v63 = vadd.f32 %v5334_v28, %v5286_v4 }
 0x4a3   : > { %5392 = vperm.xlu0 %6135, %v5368_v6  }
 0x4a5   : > { %5647 = vmatmul.f32.vlgmr.msra.gmra.mxu0 %v8377_v1  ;;  %5688 = vmatmul.f32.gmra.mxu1 %v8401_v34 }
 0x4a6   : > { %v5252_v29 = vpop.f32.mrf.mxu0 }
 0x4a7   : > { %v5291_v56 = vpop.f32.mrf.mxu1  ;;  %5733 = vmatmul.f32.gmra.mxu2 %v5454_v10  ;;  %v5253_v23 = vadd.f32 %v5252_v29, %v5208_v8 }
 0x4a8   : > { %v5371_v11 = vpop.f32.mrf.mxu3  ;;  %v5292_v35 = vadd.f32 %v5291_v56, %v5248_v19 }
 0x4a9   : > { %v5372_v57 = vadd.f32 %v5371_v11, %v5335_v63  ;;  %5794 = vmatmul.f32.gmra.mxu3 %v8401_v34  ;;  %v5338_v42 = vpop.f32.mrf.mxu2 }
 0x4aa   : > { %v5339_v47 = vadd.f32 %v5338_v42, %v5292_v35 }
 0x4ab   : > { %5397 = vperm.xlu0 %6135, %v5372_v57  }
 0x4ad   : > { %5651 = vmatmul.f32.gmra.mxu0 %v8401_v34  ;;  %5692 = vmatmul.f32.gmra.mxu1 %v8428_v60 }
 0x4af   : > { %5741 = vmatmul.f32.gmra.mxu2 %v5462_v12  ;;  %v5297_v0 = vpop.f32.mrf.mxu1 }
 0x4b0   : > { %v5375_v38 = vpop.f32.mrf.mxu3  ;;  %v5298_v10 = vadd.f32 %v5297_v0, %v5253_v23 }
 0x4b1   : > { %v5376_v3 = vadd.f32 %v5375_v38, %v5339_v47  ;;  %5798 = vmatmul.f32.gmra.mxu3 %v8428_v60  ;;  %v5342_v21 = vpop.f32.mrf.mxu2 }
 0x4b2   : > { %v5343_v33 = vadd.f32 %v5342_v21, %v5298_v10 }
 0x4b3   : > { %5402 = vperm.xlu1 %6136, %v5376_v3  }
 0x4b5   : > { %5655 = vmatmul.f32.gmra.mxu0 %v8428_v60  ;;  %5696 = vmatmul.f32.gmra.mxu1 %v8446_v27 }
 0x4b7   : > { %5749 = vmatmul.f32.gmra.mxu2 %v5470_v25 }
 0x4b8   : > { %v5379_v7 = vpop.f32.mrf.mxu3 }
 0x4b9   : > { %v5380_v14 = vadd.f32 %v5379_v7, %v5343_v33  ;;  %5802 = vmatmul.f32.gmra.mxu3 %v8446_v27 }
 0x4bb   : > { %5407 = vperm.xlu1 %6136, %v5380_v14  }
 0x4bd   : > { %5659 = vmatmul.f32.gmra.mxu0 %v8446_v27  ;;  %5874 = vmatmul.f32.vlgmr.msrb.gmra.mxu1 %v8388_v17 }
 0x4bf   : > { %5925 = vmatmul.f32.vlgmr.msrb.gmra.mxu2 %v8377_v1 }
 0x4c1   : > { %5962 = vmatmul.f32.vlgmr.msrb.gmra.mxu3 %v8377_v1 }
 0x4c5   : > { %5832 = vmatmul.f32.vlgmr.msrb.gmra.mxu0 %v8382_v52  ;;  %5880 = vmatmul.f32.gmra.mxu1 %v8417_v50 }
 0x4c7   : > { %5929 = vmatmul.f32.gmra.mxu2 %v8401_v34 }
 0x4c9   : > { %5966 = vmatmul.f32.gmra.mxu3 %v8401_v34 }
 0x4cd   : > { %5837 = vmatmul.f32.gmra.mxu0 %v8410_v48  ;;  %5886 = vmatmul.f32.gmra.mxu1 %v8440_v31 }
 0x4cf   : > { %5933 = vmatmul.f32.gmra.mxu2 %v8428_v60 }
 0x4d1   : > { %5970 = vmatmul.f32.gmra.mxu3 %v8428_v60 }
 0x4d5   : > { %5842 = vmatmul.f32.gmra.mxu0 %v8434_v37  ;;  %5892 = vmatmul.f32.gmra.mxu1 %v8457_v32 }
 0x4d7   : > { %5937 = vmatmul.f32.gmra.mxu2 %v8446_v27 }
 0x4d9   : > { %5974 = vmatmul.f32.gmra.mxu3 %v8446_v27 }
 0x4dd   : > { %5847 = vmatmul.f32.gmra.mxu0 %v8451_v16 }
 0x4fa   : > { %v5513_v1 = vpop.f32.mrf.mxu1 }
 0x502   : > { %v5448_v52 = vpop.f32.mrf.mxu0  ;;  %v5517_v17 = vpop.f32.mrf.mxu1 }
 0x503   : > { %v5555_v34 = vpop.f32.mrf.mxu2 }
 0x504   : > { %v5597_v48 = vpop.f32.mrf.mxu3 }
 0x50a   : > { %v5456_v50 = vpop.f32.mrf.mxu0  ;;  %v5521_v31 = vpop.f32.mrf.mxu1 }
 0x50b   : > { %v5560_v41 = vpop.f32.mrf.mxu2 }
 0x50c   : > { %v5603_v9 = vpop.f32.mrf.mxu3 }
 0x512   : > { %v5464_v60 = vpop.f32.mrf.mxu0  ;;  %v5525_v20 = vpop.f32.mrf.mxu1 }
 0x513   : > { %v5565_v37 = vpop.f32.mrf.mxu2 }
 0x514   : > { %v5609_v2 = vpop.f32.mrf.mxu3 }
 0x515   : > { %v5393_v13 = vpop.permute.xlu0 %5392 }
 0x516   : > { %v5449_v12 = vadd.f32 %v5448_v52, %v5393_v13 }
 0x518   : > { %v5514_v39 = vadd.f32 %v5513_v1, %v5449_v12 }
 0x51a   : > { %v5472_v27 = vpop.f32.mrf.mxu0  ;;  %v5685_v45 = vpop.f32.mrf.mxu1  ;;  %v5556_v32 = vadd.f32 %v5555_v34, %v5514_v39 }
 0x51b   : > { %v5570_v16 = vpop.f32.mrf.mxu2 }
 0x51c   : > { %v5615_v51 = vpop.f32.mrf.mxu3  ;;  %v5598_v30 = vadd.f32 %v5597_v48, %v5556_v32 }
 0x51d   : > { %v5398_v40 = vpop.permute.xlu0 %5397 }
 0x51e   : > { %v5457_v49 = vadd.f32 %v5456_v50, %v5398_v40 }
 0x520   : > { %v5518_v26 = vadd.f32 %v5517_v17, %v5457_v49 }
 0x522   : > { %v5648_v53 = vpop.f32.mrf.mxu0  ;;  %v5689_v43 = vpop.f32.mrf.mxu1  ;;  %v5561_v61 = vadd.f32 %v5560_v41, %v5518_v26 }
 0x523   : > { %v5649_v15 = vadd.f32 %v5648_v53, %v5598_v30  ;;  %v5726_v25 = vpop.f32.mrf.mxu2 }
 0x524   : > { %v5791_v36 = vpop.f32.mrf.mxu3  ;;  %v5604_v62 = vadd.f32 %v5603_v9, %v5561_v61  ;;  %v5727_v10 = vadd.f32 %v5726_v25, %v5393_v13 }
 0x525   : > { %v5686_v44 = vadd.f32 %v5685_v45, %v5649_v15  ;;  %v5403_v22 = vpop.permute.xlu1 %5402 }
 0x526   : > { %v5465_v59 = vadd.f32 %v5464_v60, %v5403_v22  ;;  %v5792_v7 = vadd.f32 %v5791_v36, %v5727_v10 }
 0x527   : > { %5978 = vst [vmem:[%s8500_s30] sm:$0xff] %v5686_v44 }
 0x528   : > { %v5522_v46 = vadd.f32 %v5521_v31, %v5465_v59 }
 0x52a   : > { %v5652_v28 = vpop.f32.mrf.mxu0  ;;  %v5693_v6 = vpop.f32.mrf.mxu1  ;;  %v5566_v63 = vadd.f32 %v5565_v37, %v5522_v46 }
 0x52b   : > { %v5653_v4 = vadd.f32 %v5652_v28, %v5604_v62  ;;  %v5734_v5 = vpop.f32.mrf.mxu2 }
 0x52c   : > { %v5795_v58 = vpop.f32.mrf.mxu3  ;;  %v5610_v19 = vadd.f32 %v5609_v2, %v5566_v63  ;;  %v5735_v34 = vadd.f32 %v5734_v5, %v5398_v40 }
 0x52d   : > { %v5690_v55 = vadd.f32 %v5689_v43, %v5653_v4  ;;  %v5408_v54 = vpop.permute.xlu1 %5407 }
 0x52e   : > { %v5473_v56 = vadd.f32 %v5472_v27, %v5408_v54  ;;  %v5796_v41 = vadd.f32 %v5795_v58, %v5735_v34 }
 0x52f   : > { %5980 = vst [vmem:[%s8500_s30 + $0x10] sm:$0xff] %v5690_v55 }
 0x530   : > { %v5526_v11 = vadd.f32 %v5525_v20, %v5473_v56 }
 0x532   : > { %v5656_v57 = vpop.f32.mrf.mxu0  ;;  %v5697_v24 = vpop.f32.mrf.mxu1  ;;  %v5571_v8 = vadd.f32 %v5570_v16, %v5526_v11 }
 0x533   : > { %v5657_v42 = vadd.f32 %v5656_v57, %v5610_v19  ;;  %v5742_v35 = vpop.f32.mrf.mxu2 }
 0x534   : > { %v5799_v18 = vpop.f32.mrf.mxu3  ;;  %v5616_v47 = vadd.f32 %v5615_v51, %v5571_v8  ;;  %v5743_v13 = vadd.f32 %v5742_v35, %v5403_v22 }
 0x535   : > { %v5694_v29 = vadd.f32 %v5693_v6, %v5657_v42 }
 0x536   : > { %v5800_v27 = vadd.f32 %v5799_v18, %v5743_v13 }
 0x537   : > { %5982 = vst [vmem:[%s8500_s30 + $0x20] sm:$0xff] %v5694_v29 }
 0x53a   : > { %v5660_v0 = vpop.f32.mrf.mxu0  ;;  %v5875_v33 = vpop.f32.mrf.mxu1 }
 0x53b   : > { %v5661_v38 = vadd.f32 %v5660_v0, %v5616_v47  ;;  %v5750_v23 = vpop.f32.mrf.mxu2 }
 0x53c   : > { %v5803_v3 = vpop.f32.mrf.mxu3  ;;  %v5751_v49 = vadd.f32 %v5750_v23, %v5408_v54 }
 0x53d   : > { %v5698_v21 = vadd.f32 %v5697_v24, %v5661_v38 }
 0x53e   : > { %v5804_v43 = vadd.f32 %v5803_v3, %v5751_v49 }
 0x53f   : > { %5984 = vst [vmem:[%s8500_s30 + $0x30] sm:$0xff] %v5698_v21 }
 0x542   : > { %v5833_v14 = vpop.f32.mrf.mxu0  ;;  %v5881_v31 = vpop.f32.mrf.mxu1 }
 0x543   : > { %v5834_v1 = vadd.f32 %v5833_v14, %v5792_v7  ;;  %v5926_v52 = vpop.f32.mrf.mxu2 }
 0x544   : > { %v5963_v17 = vpop.f32.mrf.mxu3 }
 0x545   : > { %v5876_v48 = vadd.f32 %v5875_v33, %v5834_v1 }
 0x547   : > { %v5927_v50 = vadd.f32 %v5926_v52, %v5876_v48 }
 0x549   : > { %v5964_v9 = vadd.f32 %v5963_v17, %v5927_v50 }
 0x54a   : > { %v5838_v60 = vpop.f32.mrf.mxu0  ;;  %v5887_v16 = vpop.f32.mrf.mxu1 }
 0x54b   : > { %5979 = vst [vmem:[%s8500_s30 + $0x8] sm:$0xff] %v5964_v9  ;;  %v5839_v20 = vadd.f32 %v5838_v60, %v5796_v41  ;;  %v5930_v37 = vpop.f32.mrf.mxu2 }
 0x54c   : > { %v5967_v2 = vpop.f32.mrf.mxu3 }
 0x54d   : > { %v5882_v12 = vadd.f32 %v5881_v31, %v5839_v20 }
 0x54f   : > { %v5931_v39 = vadd.f32 %v5930_v37, %v5882_v12 }
 0x551   : > { %v5968_v45 = vadd.f32 %v5967_v2, %v5931_v39 }
 0x552   : > { %v5843_v51 = vpop.f32.mrf.mxu0  ;;  %v5893_v44 = vpop.f32.mrf.mxu1 }
 0x553   : > { %5981 = vst [vmem:[%s8500_s30 + $0x18] sm:$0xff] %v5968_v45  ;;  %v5844_v40 = vadd.f32 %v5843_v51, %v5800_v27  ;;  %v5934_v32 = vpop.f32.mrf.mxu2 }
 0x554   : > { %v5971_v30 = vpop.f32.mrf.mxu3 }
 0x555   : > { %v5888_v26 = vadd.f32 %v5887_v16, %v5844_v40 }
 0x557   : > { %v5935_v53 = vadd.f32 %v5934_v32, %v5888_v26 }
 0x559   : > { %v5972_v15 = vadd.f32 %v5971_v30, %v5935_v53 }
 0x55a   : > { %v5848_v25 = vpop.f32.mrf.mxu0 }
 0x55b   : > { %5983 = vst [vmem:[%s8500_s30 + $0x28] sm:$0xff] %v5972_v15  ;;  %v5849_v36 = vadd.f32 %v5848_v25, %v5804_v43  ;;  %v5938_v61 = vpop.f32.mrf.mxu2 }
 0x55c   : > { %v5975_v46 = vpop.f32.mrf.mxu3 }
 0x55d   : > { %v5894_v22 = vadd.f32 %v5893_v44, %v5849_v36 }
 0x55f   : > { %v5939_v59 = vadd.f32 %v5938_v61, %v5894_v22 }
 0x561   : > { %v5976_v62 = vadd.f32 %v5975_v46, %v5939_v59 }
 0x563   : > { %5985 = vst [vmem:[%s8500_s30 + $0x38] sm:$0xff] %v5976_v62 }
 0x564 PF: > { %s13_s12 = sadd.s32 1, %s6143_s12  }
 0x565   : > { %p10_p4 = scmp.ge.s32.totalorder %s13_s12, 4  }
 0x567   :  { %12 = sbr.rel (!%p10_p4) target bundleno = 1 (0x1), region = 80 }

</bundles_post_ra>
